<compile_context>
chip_gen: v5e
topology: v5e:2x2
jax: 0.10.0
libtpu: 0.0.40
codegen_flags: <defaults>
</compile_context>

<pallas_src>
import jax
import jax.numpy as jnp
from jax.experimental import pallas as pl
from jax.experimental.pallas import tpu as pltpu

_VMEM_LIMIT = 32 * 1024 * 1024  # >= v5e's 16 MiB scoped default; == v6e/v7x default


def _pick_divisor_tile(n, cap):
    """Largest t <= cap with n % t == 0 (falls back to n)."""
    t = min(n, cap)
    while n % t:
        t -= 1
    return t


def _pick_time_tile(n, cap=128):
    """Tile for a second-minor blocked axis: multiple of 8 dividing n, else full n."""
    if n <= cap:
        return n
    for t in range(cap - cap % 8, 7, -8):
        if n % t == 0:
            return t
    return n


# ----------------------------- batched GRU recurrence kernel -----------------------------
# gi_ref : (tt, D, B, 3H)  precomputed x @ W_ih + b_ih (gate order [r | z | n])
# h0_ref : (D, B, H), whh_ref : (D, H, 3H), bhh_ref : (D, 1, 3H)
# out_ref: (tt, D, B, H)   hidden states for this time tile
# h_scr  : (D, B, H)       VMEM scratch carrying the hidden state across time tiles

def gru_kernel(gi_ref, h0_ref, whh_ref, bhh_ref, out_ref, h_scr):
    tt = gi_ref.shape[0]
    D, B, H = h_scr.shape

    @pl.when(pl.program_id(0) == 0)
    def _init():
        h_scr[...] = h0_ref[...]

    whh = whh_ref[...]                                           # hoisted weight load
    bhh = jnp.broadcast_to(bhh_ref[...], (D, B, 3 * H))          # hoisted bias broadcast

    def step(t, h):
        gi = gi_ref[t]                                           # (D, B, 3H)
        gh = jax.lax.dot_general(                                # one fused MXU matmul/step
            h, whh, (((2,), (1,)), ((0,), (0,))),
            preferred_element_type=jnp.float32) + bhh            # (D, B, 3H)
        r = jax.nn.sigmoid(gi[..., 0:H] + gh[..., 0:H])
        z = jax.nn.sigmoid(gi[..., H:2 * H] + gh[..., H:2 * H])
        n = jnp.tanh(gi[..., 2 * H:] + r * gh[..., 2 * H:])
        h_new = (1.0 - z) * n + z * h
        out_ref[t] = h_new.astype(out_ref.dtype)
        return h_new

    unroll = 8 if tt % 8 == 0 else (4 if tt % 4 == 0 else 1)
    h_scr[...] = jax.lax.fori_loop(0, tt, step, h_scr[...], unroll=unroll)


def run_gru(gi, h0, whh, bhh, *, time_tile=32):
    T, D, B, G = gi.shape
    H = h0.shape[-1]
    tt = _pick_divisor_tile(T, time_tile)
    return pl.pallas_call(
        gru_kernel,
        out_shape=jax.ShapeDtypeStruct((T, D, B, H), jnp.float32),
        grid=(T // tt,),
        in_specs=[
            pl.BlockSpec((tt, D, B, G), lambda i: (i, 0, 0, 0)),
            pl.BlockSpec((D, B, H), lambda i: (0, 0, 0)),
            pl.BlockSpec((D, H, G), lambda i: (0, 0, 0)),
            pl.BlockSpec((D, 1, G), lambda i: (0, 0, 0)),
        ],
        out_specs=pl.BlockSpec((tt, D, B, H), lambda i: (i, 0, 0, 0)),
        scratch_shapes=[pltpu.VMEM((D, B, H), jnp.float32)],
        compiler_params=pltpu.CompilerParams(
            dimension_semantics=("arbitrary",),
            vmem_limit_bytes=_VMEM_LIMIT),
    )(gi, h0, whh, bhh)


# ------------------- hoisted attention + combine + projection + log_softmax -------------------
# enc_ref : (B, T_enc, H)  encoder outputs (shared by both decoders)
# dech_ref: (D, B, tt, H)  decoder hidden states for this time tile
# wc_ref  : (D, 2, H, H)   combined Linear split: [d,0] multiplies mix, [d,1] multiplies o
# bc_ref  : (D, 1, H),  wo_ref: (D, H, Vp),  bo_ref: (D, 1, Vp)  (padded cols biased -1e30)
# out_ref : (D, B, tt, Vp) log-probabilities (lane-dense padded vocab)

def attn_proj_kernel(enc_ref, dech_ref, wc_ref, bc_ref, wo_ref, bo_ref, out_ref):
    D, B, tt, H = dech_ref.shape
    Vp = wo_ref.shape[-1]
    enc = enc_ref[...]                                           # (B, T_enc, H)

    for d in range(D):                                           # static python loop (D == 2)
        o3 = dech_ref[d]                                         # (B, tt, H)

        # Luong dot attention as batched MXU matmuls (contract H, then T_enc).
        # TODO(synk): no encoder-length masking (input_lengths / pack_padded_sequence).
        scores = jnp.einsum('bqh,bkh->bqk', o3, enc,
                            preferred_element_type=jnp.float32)  # (B, tt, T_enc)
        scores = scores - jnp.max(scores, axis=-1, keepdims=True)
        e = jnp.exp(scores)
        attn = e * pl.reciprocal(jnp.sum(e, axis=-1, keepdims=True), approx=True)
        mix = jnp.einsum('bqk,bkh->bqh', attn, enc,
                         preferred_element_type=jnp.float32)     # (B, tt, H)

        # combined = tanh(Linear(cat([mix, o]))), split weight -> no in-kernel concat.
        mix2 = mix.reshape(B * tt, H)
        o2 = o3.reshape(B * tt, H)
        comb = jnp.tanh(
            jnp.dot(mix2, wc_ref[d, 0], preferred_element_type=jnp.float32)
            + jnp.dot(o2, wc_ref[d, 1], preferred_element_type=jnp.float32)
            + bc_ref[d])

        logits = jnp.dot(comb, wo_ref[d],
                         preferred_element_type=jnp.float32) + bo_ref[d]   # (B*tt, Vp)
        m = jnp.max(logits, axis=-1, keepdims=True)
        s = jnp.sum(jnp.exp(logits - m), axis=-1, keepdims=True)
        logp = logits - m - jnp.log(s)
        out_ref[d] = logp.reshape(B, tt, Vp).astype(out_ref.dtype)


def run_attn_proj(enc_bth, dech, wc, bc, wo, bo, *, time_tile=128):
    D, B, T_dec, H = dech.shape
    T_enc = enc_bth.shape[1]
    Vp = wo.shape[-1]
    tt = _pick_time_tile(T_dec, time_tile)
    return pl.pallas_call(
        attn_proj_kernel,
        out_shape=jax.ShapeDtypeStruct((D, B, T_dec, Vp), jnp.float32),
        grid=(T_dec // tt,),
        in_specs=[
            pl.BlockSpec((B, T_enc, H), lambda i: (0, 0, 0)),
            pl.BlockSpec((D, B, tt, H), lambda i: (0, 0, i, 0)),
            pl.BlockSpec((D, 2, H, H), lambda i: (0, 0, 0, 0)),
            pl.BlockSpec((D, 1, H), lambda i: (0, 0, 0)),
            pl.BlockSpec((D, H, Vp), lambda i: (0, 0, 0)),
            pl.BlockSpec((D, 1, Vp), lambda i: (0, 0, 0)),
        ],
        out_specs=pl.BlockSpec((D, B, tt, Vp), lambda i: (0, 0, i, 0)),
        compiler_params=pltpu.CompilerParams(
            dimension_semantics=("parallel",),
            vmem_limit_bytes=_VMEM_LIMIT),
    )(enc_bth, dech, wc, bc, wo, bo)


# ----------------------------- parameters -----------------------------

def init_params(key, word_vocab, prog_vocab, E, H):
    ks = jax.random.split(key, 19)

    def w(k, shape, scale=0.08):
        return (jax.random.normal(k, shape, jnp.float32) * scale).astype(jnp.float32)

    enc = dict(
        emb=w(ks[0], (word_vocab, E), 0.1),
        wih=w(ks[1], (E, 3 * H)), whh=w(ks[2], (H, 3 * H)),
        bih=w(ks[3], (1, 3 * H)), bhh=w(ks[4], (1, 3 * H)),
    )

    def make_dec(base):
        return dict(
            emb=w(ks[base + 0], (prog_vocab, E), 0.1),
            wih=w(ks[base + 1], (E, 3 * H)), whh=w(ks[base + 2], (H, 3 * H)),
            bih=w(ks[base + 3], (1, 3 * H)), bhh=w(ks[base + 4], (1, 3 * H)),
            wc=w(ks[base + 5], (2, H, H)), bc=jnp.zeros((1, H), jnp.float32),
            wo=w(ks[base + 6], (H, prog_vocab)), bo=jnp.zeros((1, prog_vocab), jnp.float32),
        )

    return dict(enc=enc, dec_type=make_dec(5), dec_arg=make_dec(12))


# ----------------------------- forward -----------------------------

@jax.jit
def double_seq2seq_forward(params, x, y):
    """x: (B, T_in) int32 word ids; y: (B, T_dec, 2) int32 program token ids.

    Returns (B, T_dec, 2, prog_vocab) log-probabilities (axis -2: [type, argument]).
    """
    B, T_in = x.shape
    T_dec = y.shape[1]
    enc_p = params["enc"]
    H = enc_p["whh"].shape[0]
    V = params["dec_type"]["wo"].shape[-1]
    Vp = ((V + 127) // 128) * 128

    # ---- encoder: embedding + hoisted input projection (XLA), Pallas GRU recurrence ----
    x_emb = jnp.take(enc_p["emb"], x, axis=0)                                   # (B, T_in, E)
    gi_enc = jnp.einsum("bte,eg->tbg", x_emb, enc_p["wih"]) + enc_p["bih"]      # (T_in, B, 3H)
    enc_out = run_gru(gi_enc[:, None], jnp.zeros((1, B, H), jnp.float32),
                      enc_p["whh"][None], enc_p["bhh"][None])[:, 0]             # (T_in, B, H)
    enc_h = enc_out[-1]                                                         # (B, H)
    enc_bth = jnp.transpose(enc_out, (1, 0, 2))                                 # (B, T_in, H)

    # ---- both decoder recurrences folded into ONE batched Pallas GRU (D = 2) ----
    dt, da = params["dec_type"], params["dec_arg"]
    y_emb = jnp.stack([jnp.take(dt["emb"], y[..., 0], axis=0),
                       jnp.take(da["emb"], y[..., 1], axis=0)], axis=0)         # (2, B, T_dec, E)
    wih_d = jnp.stack([dt["wih"], da["wih"]])
    bih_d = jnp.stack([dt["bih"], da["bih"]])
    gi_dec = jnp.einsum("dbte,deg->tdbg", y_emb, wih_d) + bih_d[None]           # (T_dec, 2, B, 3H)
    whh_d = jnp.stack([dt["whh"], da["whh"]])                                   # (2, H, 3H)
    bhh_d = jnp.stack([dt["bhh"], da["bhh"]])                                   # (2, 1, 3H)
    h0_d = jnp.broadcast_to(enc_h[None], (2, B, H))
    dech = run_gru(gi_dec, h0_d, whh_d, bhh_d)                                  # (T_dec, 2, B, H)
    dech_bm = jnp.transpose(dech, (1, 2, 0, 3))                                 # (2, B, T_dec, H)

    # ---- hoisted attention + combine + projection + log_softmax (batched MXU kernel) ----
    wc_d = jnp.stack([dt["wc"], da["wc"]])                                      # (2, 2, H, H)
    bc_d = jnp.stack([dt["bc"], da["bc"]])                                      # (2, 1, H)
    wo_d = jnp.stack([dt["wo"], da["wo"]])                                      # (2, H, V)
    bo_d = jnp.stack([dt["bo"], da["bo"]])                                      # (2, 1, V)
    # pad vocab to a lane-dense multiple of 128; padded logits biased to -1e30 (prob 0)
    wo_p = jnp.pad(wo_d, ((0, 0), (0, 0), (0, Vp - V)))
    bo_p = jnp.pad(bo_d, ((0, 0), (0, 0), (0, Vp - V)), constant_values=-1e30)
    logp = run_attn_proj(enc_bth, dech_bm, wc_d, bc_d, wo_p, bo_p)              # (2, B, T_dec, Vp)

    return jnp.moveaxis(logp[..., :V], 0, 2)                                    # (B, T_dec, 2, V)


# ----------------------------- main -----------------------------

if __name__ == "__main__":
    B, T_in, T_dec = 2, 8, 8
    E, H = 32, 32
    WORD_VOCAB, PROG_VOCAB = 24, 16

    key = jax.random.PRNGKey(0)
    k_param, k_x, k_y = jax.random.split(key, 3)

    params = init_params(k_param, WORD_VOCAB, PROG_VOCAB, E, H)
    x = jax.random.randint(k_x, (B, T_in), 0, WORD_VOCAB, dtype=jnp.int32)
    y = jax.random.randint(k_y, (B, T_dec, 2), 0, PROG_VOCAB, dtype=jnp.int32)

    out = double_seq2seq_forward(params, x, y)
    out = jax.block_until_ready(out)

    assert out.shape == (B, T_dec, 2, PROG_VOCAB), out.shape
    assert bool(jnp.all(jnp.isfinite(out)))
    # rows are log-softmax -> exp sums to 1 (padded vocab columns carry ~0 probability)
    assert bool(jnp.allclose(jnp.sum(jnp.exp(out), axis=-1), 1.0, atol=1e-4))
    print("KERNEL_OK")
</pallas_src>

<mosaic_0001>
module attributes {stable_mosaic.version = 11 : i64} {
  func.func @gru_kernel(%arg0: i32, %arg1: memref<8x1x2x96xf32, #tpu.memory_space<vmem>>, %arg2: memref<1x2x32xf32, #tpu.memory_space<vmem>>, %arg3: memref<1x32x96xf32, #tpu.memory_space<vmem>>, %arg4: memref<1x1x96xf32, #tpu.memory_space<vmem>>, %arg5: memref<8x1x2x32xf32, #tpu.memory_space<vmem>>, %arg6: memref<1x2x32xf32, #tpu.memory_space<vmem>>) attributes {dimension_semantics = [#tpu.dimension_semantics<arbitrary>], iteration_bounds = array<i64: 1>, scalar_prefetch = 0 : i64, scratch_operands = 1 : i64, tpu.core_type = #tpu.core_type<tc>, window_params = [{transform_indices = @transform_0, window_bounds = array<i64: 8, 1, 2, 96>}, {pipeline_mode = #tpu.pipeline_mode<synchronous>, transform_indices = @transform_1, window_bounds = array<i64: 1, 2, 32>}, {pipeline_mode = #tpu.pipeline_mode<synchronous>, transform_indices = @transform_2, window_bounds = array<i64: 1, 32, 96>}, {pipeline_mode = #tpu.pipeline_mode<synchronous>, transform_indices = @transform_3, window_bounds = array<i64: 1, 1, 96>}, {transform_indices = @transform_4, window_bounds = array<i64: 8, 1, 2, 32>}]} {
    %c0_i32 = arith.constant 0 : i32
    %0 = arith.cmpi eq, %arg0, %c0_i32 : i32
    %1 = arith.extui %0 : i1 to i32
    %c0_i32_0 = arith.constant 0 : i32
    %2 = arith.cmpi ne, %1, %c0_i32_0 : i32
    scf.if %2 {
      %c0_92 = arith.constant 0 : index
      %c0_93 = arith.constant 0 : index
      %c0_94 = arith.constant 0 : index
      %289 = vector.load %arg2[%c0_92, %c0_93, %c0_94] : memref<1x2x32xf32, #tpu.memory_space<vmem>>, vector<1x2x32xf32>
      %c0_95 = arith.constant 0 : index
      %c0_96 = arith.constant 0 : index
      %c0_97 = arith.constant 0 : index
      %290 = vector.load %arg6[%c0_95, %c0_96, %c0_97] : memref<1x2x32xf32, #tpu.memory_space<vmem>>, vector<1x2x32xf32>
      tpu.vector_store %arg6[%c0_95, %c0_96, %c0_97], %289 {strides = array<i32>} : memref<1x2x32xf32, #tpu.memory_space<vmem>>, vector<1x2x32xf32>,
    } else {
    }
    %c0 = arith.constant 0 : index
    %c0_1 = arith.constant 0 : index
    %c0_2 = arith.constant 0 : index
    %3 = vector.load %arg3[%c0, %c0_1, %c0_2] : memref<1x32x96xf32, #tpu.memory_space<vmem>>, vector<1x32x96xf32>
    %c0_3 = arith.constant 0 : index
    %c0_4 = arith.constant 0 : index
    %c0_5 = arith.constant 0 : index
    %4 = vector.load %arg4[%c0_3, %c0_4, %c0_5] : memref<1x1x96xf32, #tpu.memory_space<vmem>>, vector<1x1x96xf32>
    %5 = vector.shape_cast %4 : vector<1x1x96xf32> to vector<1x1x96xf32>
    %6 = vector.broadcast %5 : vector<1x1x96xf32> to vector<1x2x96xf32>
    %c0_6 = arith.constant 0 : index
    %c0_7 = arith.constant 0 : index
    %c0_8 = arith.constant 0 : index
    %7 = vector.load %arg6[%c0_6, %c0_7, %c0_8] : memref<1x2x32xf32, #tpu.memory_space<vmem>>, vector<1x2x32xf32>
    %c0_i32_9 = arith.constant 0 : i32
    %8 = arith.index_cast %c0_i32_9 : i32 to index
    %c0_10 = arith.constant 0 : index
    %c0_11 = arith.constant 0 : index
    %c0_12 = arith.constant 0 : index
    %9 = vector.load %arg1[%8, %c0_10, %c0_11, %c0_12] : memref<8x1x2x96xf32, #tpu.memory_space<vmem>>, vector<1x1x2x96xf32>
    %10 = vector.shape_cast %9 : vector<1x1x2x96xf32> to vector<1x2x96xf32>
    %cst = arith.constant dense<0.000000e+00> : vector<1x2x96xf32>
    %11 = tpu.matmul %7, %3, %cst {dimension_numbers = #tpu.dot_dimension_numbers<[2], [1], [1], [2], [0, 0, 0, 1, 1, 2], [0], [0]>} : vector<1x2x32xf32>, vector<1x32x96xf32>, vector<1x2x96xf32> -> vector<1x2x96xf32>
    %12 = arith.addf %11, %6 : vector<1x2x96xf32>
    %13 = vector.extract_strided_slice %10 {offsets = [0, 0, 0], sizes = [1, 2, 32], strides = [1, 1, 1]} : vector<1x2x96xf32> to vector<1x2x32xf32>
    %14 = vector.extract_strided_slice %12 {offsets = [0, 0, 0], sizes = [1, 2, 32], strides = [1, 1, 1]} : vector<1x2x96xf32> to vector<1x2x32xf32>
    %15 = arith.addf %13, %14 : vector<1x2x32xf32>
    %16 = arith.negf %15 : vector<1x2x32xf32>
    %17 = math.exp %16 : vector<1x2x32xf32>
    %cst_13 = arith.constant 1.000000e+00 : f32
    %18 = vector.broadcast %cst_13 : f32 to vector<1x2x32xf32>
    %19 = arith.addf %18, %17 : vector<1x2x32xf32>
    %20 = arith.divf %18, %19 : vector<1x2x32xf32>
    %21 = vector.extract_strided_slice %10 {offsets = [0, 0, 32], sizes = [1, 2, 32], strides = [1, 1, 1]} : vector<1x2x96xf32> to vector<1x2x32xf32>
    %22 = vector.extract_strided_slice %12 {offsets = [0, 0, 32], sizes = [1, 2, 32], strides = [1, 1, 1]} : vector<1x2x96xf32> to vector<1x2x32xf32>
    %23 = arith.addf %21, %22 : vector<1x2x32xf32>
    %24 = arith.negf %23 : vector<1x2x32xf32>
    %25 = math.exp %24 : vector<1x2x32xf32>
    %cst_14 = arith.constant 1.000000e+00 : f32
    %26 = vector.broadcast %cst_14 : f32 to vector<1x2x32xf32>
    %27 = arith.addf %26, %25 : vector<1x2x32xf32>
    %28 = arith.divf %26, %27 : vector<1x2x32xf32>
    %29 = vector.extract_strided_slice %10 {offsets = [0, 0, 64], sizes = [1, 2, 32], strides = [1, 1, 1]} : vector<1x2x96xf32> to vector<1x2x32xf32>
    %30 = vector.extract_strided_slice %12 {offsets = [0, 0, 64], sizes = [1, 2, 32], strides = [1, 1, 1]} : vector<1x2x96xf32> to vector<1x2x32xf32>
    %31 = arith.mulf %20, %30 : vector<1x2x32xf32>
    %32 = arith.addf %29, %31 : vector<1x2x32xf32>
    %33 = math.tanh %32 : vector<1x2x32xf32>
    %cst_15 = arith.constant 1.000000e+00 : f32
    %34 = vector.broadcast %cst_15 : f32 to vector<1x2x32xf32>
    %35 = arith.subf %34, %28 : vector<1x2x32xf32>
    %36 = arith.mulf %35, %33 : vector<1x2x32xf32>
    %37 = arith.mulf %28, %7 : vector<1x2x32xf32>
    %38 = arith.addf %36, %37 : vector<1x2x32xf32>
    %39 = arith.index_cast %c0_i32_9 : i32 to index
    %c0_16 = arith.constant 0 : index
    %c0_17 = arith.constant 0 : index
    %c0_18 = arith.constant 0 : index
    %40 = vector.load %arg5[%39, %c0_16, %c0_17, %c0_18] : memref<8x1x2x32xf32, #tpu.memory_space<vmem>>, vector<1x1x2x32xf32>
    %41 = vector.shape_cast %40 : vector<1x1x2x32xf32> to vector<1x2x32xf32>
    %42 = vector.shape_cast %38 : vector<1x2x32xf32> to vector<1x1x2x32xf32>
    tpu.vector_store %arg5[%39, %c0_16, %c0_17, %c0_18], %42 {strides = array<i32>} : memref<8x1x2x32xf32, #tpu.memory_space<vmem>>, vector<1x1x2x32xf32>,
    %c1_i32 = arith.constant 1 : i32
    %43 = arith.index_cast %c1_i32 : i32 to index
    %c0_19 = arith.constant 0 : index
    %c0_20 = arith.constant 0 : index
    %c0_21 = arith.constant 0 : index
    %44 = vector.load %arg1[%43, %c0_19, %c0_20, %c0_21] : memref<8x1x2x96xf32, #tpu.memory_space<vmem>>, vector<1x1x2x96xf32>
    %45 = vector.shape_cast %44 : vector<1x1x2x96xf32> to vector<1x2x96xf32>
    %cst_22 = arith.constant dense<0.000000e+00> : vector<1x2x96xf32>
    %46 = tpu.matmul %38, %3, %cst_22 {dimension_numbers = #tpu.dot_dimension_numbers<[2], [1], [1], [2], [0, 0, 0, 1, 1, 2], [0], [0]>} : vector<1x2x32xf32>, vector<1x32x96xf32>, vector<1x2x96xf32> -> vector<1x2x96xf32>
    %47 = arith.addf %46, %6 : vector<1x2x96xf32>
    %48 = vector.extract_strided_slice %45 {offsets = [0, 0, 0], sizes = [1, 2, 32], strides = [1, 1, 1]} : vector<1x2x96xf32> to vector<1x2x32xf32>
    %49 = vector.extract_strided_slice %47 {offsets = [0, 0, 0], sizes = [1, 2, 32], strides = [1, 1, 1]} : vector<1x2x96xf32> to vector<1x2x32xf32>
    %50 = arith.addf %48, %49 : vector<1x2x32xf32>
    %51 = arith.negf %50 : vector<1x2x32xf32>
    %52 = math.exp %51 : vector<1x2x32xf32>
    %cst_23 = arith.constant 1.000000e+00 : f32
    %53 = vector.broadcast %cst_23 : f32 to vector<1x2x32xf32>
    %54 = arith.addf %53, %52 : vector<1x2x32xf32>
    %55 = arith.divf %53, %54 : vector<1x2x32xf32>
    %56 = vector.extract_strided_slice %45 {offsets = [0, 0, 32], sizes = [1, 2, 32], strides = [1, 1, 1]} : vector<1x2x96xf32> to vector<1x2x32xf32>
    %57 = vector.extract_strided_slice %47 {offsets = [0, 0, 32], sizes = [1, 2, 32], strides = [1, 1, 1]} : vector<1x2x96xf32> to vector<1x2x32xf32>
    %58 = arith.addf %56, %57 : vector<1x2x32xf32>
    %59 = arith.negf %58 : vector<1x2x32xf32>
    %60 = math.exp %59 : vector<1x2x32xf32>
    %cst_24 = arith.constant 1.000000e+00 : f32
    %61 = vector.broadcast %cst_24 : f32 to vector<1x2x32xf32>
    %62 = arith.addf %61, %60 : vector<1x2x32xf32>
    %63 = arith.divf %61, %62 : vector<1x2x32xf32>
    %64 = vector.extract_strided_slice %45 {offsets = [0, 0, 64], sizes = [1, 2, 32], strides = [1, 1, 1]} : vector<1x2x96xf32> to vector<1x2x32xf32>
    %65 = vector.extract_strided_slice %47 {offsets = [0, 0, 64], sizes = [1, 2, 32], strides = [1, 1, 1]} : vector<1x2x96xf32> to vector<1x2x32xf32>
    %66 = arith.mulf %55, %65 : vector<1x2x32xf32>
    %67 = arith.addf %64, %66 : vector<1x2x32xf32>
    %68 = math.tanh %67 : vector<1x2x32xf32>
    %cst_25 = arith.constant 1.000000e+00 : f32
    %69 = vector.broadcast %cst_25 : f32 to vector<1x2x32xf32>
    %70 = arith.subf %69, %63 : vector<1x2x32xf32>
    %71 = arith.mulf %70, %68 : vector<1x2x32xf32>
    %72 = arith.mulf %63, %38 : vector<1x2x32xf32>
    %73 = arith.addf %71, %72 : vector<1x2x32xf32>
    %74 = arith.index_cast %c1_i32 : i32 to index
    %c0_26 = arith.constant 0 : index
    %c0_27 = arith.constant 0 : index
    %c0_28 = arith.constant 0 : index
    %75 = vector.load %arg5[%74, %c0_26, %c0_27, %c0_28] : memref<8x1x2x32xf32, #tpu.memory_space<vmem>>, vector<1x1x2x32xf32>
    %76 = vector.shape_cast %75 : vector<1x1x2x32xf32> to vector<1x2x32xf32>
    %77 = vector.shape_cast %73 : vector<1x2x32xf32> to vector<1x1x2x32xf32>
    tpu.vector_store %arg5[%74, %c0_26, %c0_27, %c0_28], %77 {strides = array<i32>} : memref<8x1x2x32xf32, #tpu.memory_space<vmem>>, vector<1x1x2x32xf32>,
    %c2_i32 = arith.constant 2 : i32
    %78 = arith.index_cast %c2_i32 : i32 to index
    %c0_29 = arith.constant 0 : index
    %c0_30 = arith.constant 0 : index
    %c0_31 = arith.constant 0 : index
    %79 = vector.load %arg1[%78, %c0_29, %c0_30, %c0_31] : memref<8x1x2x96xf32, #tpu.memory_space<vmem>>, vector<1x1x2x96xf32>
    %80 = vector.shape_cast %79 : vector<1x1x2x96xf32> to vector<1x2x96xf32>
    %cst_32 = arith.constant dense<0.000000e+00> : vector<1x2x96xf32>
    %81 = tpu.matmul %73, %3, %cst_32 {dimension_numbers = #tpu.dot_dimension_numbers<[2], [1], [1], [2], [0, 0, 0, 1, 1, 2], [0], [0]>} : vector<1x2x32xf32>, vector<1x32x96xf32>, vector<1x2x96xf32> -> vector<1x2x96xf32>
    %82 = arith.addf %81, %6 : vector<1x2x96xf32>
    %83 = vector.extract_strided_slice %80 {offsets = [0, 0, 0], sizes = [1, 2, 32], strides = [1, 1, 1]} : vector<1x2x96xf32> to vector<1x2x32xf32>
    %84 = vector.extract_strided_slice %82 {offsets = [0, 0, 0], sizes = [1, 2, 32], strides = [1, 1, 1]} : vector<1x2x96xf32> to vector<1x2x32xf32>
    %85 = arith.addf %83, %84 : vector<1x2x32xf32>
    %86 = arith.negf %85 : vector<1x2x32xf32>
    %87 = math.exp %86 : vector<1x2x32xf32>
    %cst_33 = arith.constant 1.000000e+00 : f32
    %88 = vector.broadcast %cst_33 : f32 to vector<1x2x32xf32>
    %89 = arith.addf %88, %87 : vector<1x2x32xf32>
    %90 = arith.divf %88, %89 : vector<1x2x32xf32>
    %91 = vector.extract_strided_slice %80 {offsets = [0, 0, 32], sizes = [1, 2, 32], strides = [1, 1, 1]} : vector<1x2x96xf32> to vector<1x2x32xf32>
    %92 = vector.extract_strided_slice %82 {offsets = [0, 0, 32], sizes = [1, 2, 32], strides = [1, 1, 1]} : vector<1x2x96xf32> to vector<1x2x32xf32>
    %93 = arith.addf %91, %92 : vector<1x2x32xf32>
    %94 = arith.negf %93 : vector<1x2x32xf32>
    %95 = math.exp %94 : vector<1x2x32xf32>
    %cst_34 = arith.constant 1.000000e+00 : f32
    %96 = vector.broadcast %cst_34 : f32 to vector<1x2x32xf32>
    %97 = arith.addf %96, %95 : vector<1x2x32xf32>
    %98 = arith.divf %96, %97 : vector<1x2x32xf32>
    %99 = vector.extract_strided_slice %80 {offsets = [0, 0, 64], sizes = [1, 2, 32], strides = [1, 1, 1]} : vector<1x2x96xf32> to vector<1x2x32xf32>
    %100 = vector.extract_strided_slice %82 {offsets = [0, 0, 64], sizes = [1, 2, 32], strides = [1, 1, 1]} : vector<1x2x96xf32> to vector<1x2x32xf32>
    %101 = arith.mulf %90, %100 : vector<1x2x32xf32>
    %102 = arith.addf %99, %101 : vector<1x2x32xf32>
    %103 = math.tanh %102 : vector<1x2x32xf32>
    %cst_35 = arith.constant 1.000000e+00 : f32
    %104 = vector.broadcast %cst_35 : f32 to vector<1x2x32xf32>
    %105 = arith.subf %104, %98 : vector<1x2x32xf32>
    %106 = arith.mulf %105, %103 : vector<1x2x32xf32>
    %107 = arith.mulf %98, %73 : vector<1x2x32xf32>
    %108 = arith.addf %106, %107 : vector<1x2x32xf32>
    %109 = arith.index_cast %c2_i32 : i32 to index
    %c0_36 = arith.constant 0 : index
    %c0_37 = arith.constant 0 : index
    %c0_38 = arith.constant 0 : index
    %110 = vector.load %arg5[%109, %c0_36, %c0_37, %c0_38] : memref<8x1x2x32xf32, #tpu.memory_space<vmem>>, vector<1x1x2x32xf32>
    %111 = vector.shape_cast %110 : vector<1x1x2x32xf32> to vector<1x2x32xf32>
    %112 = vector.shape_cast %108 : vector<1x2x32xf32> to vector<1x1x2x32xf32>
    tpu.vector_store %arg5[%109, %c0_36, %c0_37, %c0_38], %112 {strides = array<i32>} : memref<8x1x2x32xf32, #tpu.memory_space<vmem>>, vector<1x1x2x32xf32>,
    %c3_i32 = arith.constant 3 : i32
    %113 = arith.index_cast %c3_i32 : i32 to index
    %c0_39 = arith.constant 0 : index
    %c0_40 = arith.constant 0 : index
    %c0_41 = arith.constant 0 : index
    %114 = vector.load %arg1[%113, %c0_39, %c0_40, %c0_41] : memref<8x1x2x96xf32, #tpu.memory_space<vmem>>, vector<1x1x2x96xf32>
    %115 = vector.shape_cast %114 : vector<1x1x2x96xf32> to vector<1x2x96xf32>
    %cst_42 = arith.constant dense<0.000000e+00> : vector<1x2x96xf32>
    %116 = tpu.matmul %108, %3, %cst_42 {dimension_numbers = #tpu.dot_dimension_numbers<[2], [1], [1], [2], [0, 0, 0, 1, 1, 2], [0], [0]>} : vector<1x2x32xf32>, vector<1x32x96xf32>, vector<1x2x96xf32> -> vector<1x2x96xf32>
    %117 = arith.addf %116, %6 : vector<1x2x96xf32>
    %118 = vector.extract_strided_slice %115 {offsets = [0, 0, 0], sizes = [1, 2, 32], strides = [1, 1, 1]} : vector<1x2x96xf32> to vector<1x2x32xf32>
    %119 = vector.extract_strided_slice %117 {offsets = [0, 0, 0], sizes = [1, 2, 32], strides = [1, 1, 1]} : vector<1x2x96xf32> to vector<1x2x32xf32>
    %120 = arith.addf %118, %119 : vector<1x2x32xf32>
    %121 = arith.negf %120 : vector<1x2x32xf32>
    %122 = math.exp %121 : vector<1x2x32xf32>
    %cst_43 = arith.constant 1.000000e+00 : f32
    %123 = vector.broadcast %cst_43 : f32 to vector<1x2x32xf32>
    %124 = arith.addf %123, %122 : vector<1x2x32xf32>
    %125 = arith.divf %123, %124 : vector<1x2x32xf32>
    %126 = vector.extract_strided_slice %115 {offsets = [0, 0, 32], sizes = [1, 2, 32], strides = [1, 1, 1]} : vector<1x2x96xf32> to vector<1x2x32xf32>
    %127 = vector.extract_strided_slice %117 {offsets = [0, 0, 32], sizes = [1, 2, 32], strides = [1, 1, 1]} : vector<1x2x96xf32> to vector<1x2x32xf32>
    %128 = arith.addf %126, %127 : vector<1x2x32xf32>
    %129 = arith.negf %128 : vector<1x2x32xf32>
    %130 = math.exp %129 : vector<1x2x32xf32>
    %cst_44 = arith.constant 1.000000e+00 : f32
    %131 = vector.broadcast %cst_44 : f32 to vector<1x2x32xf32>
    %132 = arith.addf %131, %130 : vector<1x2x32xf32>
    %133 = arith.divf %131, %132 : vector<1x2x32xf32>
    %134 = vector.extract_strided_slice %115 {offsets = [0, 0, 64], sizes = [1, 2, 32], strides = [1, 1, 1]} : vector<1x2x96xf32> to vector<1x2x32xf32>
    %135 = vector.extract_strided_slice %117 {offsets = [0, 0, 64], sizes = [1, 2, 32], strides = [1, 1, 1]} : vector<1x2x96xf32> to vector<1x2x32xf32>
    %136 = arith.mulf %125, %135 : vector<1x2x32xf32>
    %137 = arith.addf %134, %136 : vector<1x2x32xf32>
    %138 = math.tanh %137 : vector<1x2x32xf32>
    %cst_45 = arith.constant 1.000000e+00 : f32
    %139 = vector.broadcast %cst_45 : f32 to vector<1x2x32xf32>
    %140 = arith.subf %139, %133 : vector<1x2x32xf32>
    %141 = arith.mulf %140, %138 : vector<1x2x32xf32>
    %142 = arith.mulf %133, %108 : vector<1x2x32xf32>
    %143 = arith.addf %141, %142 : vector<1x2x32xf32>
    %144 = arith.index_cast %c3_i32 : i32 to index
    %c0_46 = arith.constant 0 : index
    %c0_47 = arith.constant 0 : index
    %c0_48 = arith.constant 0 : index
    %145 = vector.load %arg5[%144, %c0_46, %c0_47, %c0_48] : memref<8x1x2x32xf32, #tpu.memory_space<vmem>>, vector<1x1x2x32xf32>
    %146 = vector.shape_cast %145 : vector<1x1x2x32xf32> to vector<1x2x32xf32>
    %147 = vector.shape_cast %143 : vector<1x2x32xf32> to vector<1x1x2x32xf32>
    tpu.vector_store %arg5[%144, %c0_46, %c0_47, %c0_48], %147 {strides = array<i32>} : memref<8x1x2x32xf32, #tpu.memory_space<vmem>>, vector<1x1x2x32xf32>,
    %c4_i32 = arith.constant 4 : i32
    %148 = arith.index_cast %c4_i32 : i32 to index
    %c0_49 = arith.constant 0 : index
    %c0_50 = arith.constant 0 : index
    %c0_51 = arith.constant 0 : index
    %149 = vector.load %arg1[%148, %c0_49, %c0_50, %c0_51] : memref<8x1x2x96xf32, #tpu.memory_space<vmem>>, vector<1x1x2x96xf32>
    %150 = vector.shape_cast %149 : vector<1x1x2x96xf32> to vector<1x2x96xf32>
    %cst_52 = arith.constant dense<0.000000e+00> : vector<1x2x96xf32>
    %151 = tpu.matmul %143, %3, %cst_52 {dimension_numbers = #tpu.dot_dimension_numbers<[2], [1], [1], [2], [0, 0, 0, 1, 1, 2], [0], [0]>} : vector<1x2x32xf32>, vector<1x32x96xf32>, vector<1x2x96xf32> -> vector<1x2x96xf32>
    %152 = arith.addf %151, %6 : vector<1x2x96xf32>
    %153 = vector.extract_strided_slice %150 {offsets = [0, 0, 0], sizes = [1, 2, 32], strides = [1, 1, 1]} : vector<1x2x96xf32> to vector<1x2x32xf32>
    %154 = vector.extract_strided_slice %152 {offsets = [0, 0, 0], sizes = [1, 2, 32], strides = [1, 1, 1]} : vector<1x2x96xf32> to vector<1x2x32xf32>
    %155 = arith.addf %153, %154 : vector<1x2x32xf32>
    %156 = arith.negf %155 : vector<1x2x32xf32>
    %157 = math.exp %156 : vector<1x2x32xf32>
    %cst_53 = arith.constant 1.000000e+00 : f32
    %158 = vector.broadcast %cst_53 : f32 to vector<1x2x32xf32>
    %159 = arith.addf %158, %157 : vector<1x2x32xf32>
    %160 = arith.divf %158, %159 : vector<1x2x32xf32>
    %161 = vector.extract_strided_slice %150 {offsets = [0, 0, 32], sizes = [1, 2, 32], strides = [1, 1, 1]} : vector<1x2x96xf32> to vector<1x2x32xf32>
    %162 = vector.extract_strided_slice %152 {offsets = [0, 0, 32], sizes = [1, 2, 32], strides = [1, 1, 1]} : vector<1x2x96xf32> to vector<1x2x32xf32>
    %163 = arith.addf %161, %162 : vector<1x2x32xf32>
    %164 = arith.negf %163 : vector<1x2x32xf32>
    %165 = math.exp %164 : vector<1x2x32xf32>
    %cst_54 = arith.constant 1.000000e+00 : f32
    %166 = vector.broadcast %cst_54 : f32 to vector<1x2x32xf32>
    %167 = arith.addf %166, %165 : vector<1x2x32xf32>
    %168 = arith.divf %166, %167 : vector<1x2x32xf32>
    %169 = vector.extract_strided_slice %150 {offsets = [0, 0, 64], sizes = [1, 2, 32], strides = [1, 1, 1]} : vector<1x2x96xf32> to vector<1x2x32xf32>
    %170 = vector.extract_strided_slice %152 {offsets = [0, 0, 64], sizes = [1, 2, 32], strides = [1, 1, 1]} : vector<1x2x96xf32> to vector<1x2x32xf32>
    %171 = arith.mulf %160, %170 : vector<1x2x32xf32>
    %172 = arith.addf %169, %171 : vector<1x2x32xf32>
    %173 = math.tanh %172 : vector<1x2x32xf32>
    %cst_55 = arith.constant 1.000000e+00 : f32
    %174 = vector.broadcast %cst_55 : f32 to vector<1x2x32xf32>
    %175 = arith.subf %174, %168 : vector<1x2x32xf32>
    %176 = arith.mulf %175, %173 : vector<1x2x32xf32>
    %177 = arith.mulf %168, %143 : vector<1x2x32xf32>
    %178 = arith.addf %176, %177 : vector<1x2x32xf32>
    %179 = arith.index_cast %c4_i32 : i32 to index
    %c0_56 = arith.constant 0 : index
    %c0_57 = arith.constant 0 : index
    %c0_58 = arith.constant 0 : index
    %180 = vector.load %arg5[%179, %c0_56, %c0_57, %c0_58] : memref<8x1x2x32xf32, #tpu.memory_space<vmem>>, vector<1x1x2x32xf32>
    %181 = vector.shape_cast %180 : vector<1x1x2x32xf32> to vector<1x2x32xf32>
    %182 = vector.shape_cast %178 : vector<1x2x32xf32> to vector<1x1x2x32xf32>
    tpu.vector_store %arg5[%179, %c0_56, %c0_57, %c0_58], %182 {strides = array<i32>} : memref<8x1x2x32xf32, #tpu.memory_space<vmem>>, vector<1x1x2x32xf32>,
    %c5_i32 = arith.constant 5 : i32
    %183 = arith.index_cast %c5_i32 : i32 to index
    %c0_59 = arith.constant 0 : index
    %c0_60 = arith.constant 0 : index
    %c0_61 = arith.constant 0 : index
    %184 = vector.load %arg1[%183, %c0_59, %c0_60, %c0_61] : memref<8x1x2x96xf32, #tpu.memory_space<vmem>>, vector<1x1x2x96xf32>
    %185 = vector.shape_cast %184 : vector<1x1x2x96xf32> to vector<1x2x96xf32>
    %cst_62 = arith.constant dense<0.000000e+00> : vector<1x2x96xf32>
    %186 = tpu.matmul %178, %3, %cst_62 {dimension_numbers = #tpu.dot_dimension_numbers<[2], [1], [1], [2], [0, 0, 0, 1, 1, 2], [0], [0]>} : vector<1x2x32xf32>, vector<1x32x96xf32>, vector<1x2x96xf32> -> vector<1x2x96xf32>
    %187 = arith.addf %186, %6 : vector<1x2x96xf32>
    %188 = vector.extract_strided_slice %185 {offsets = [0, 0, 0], sizes = [1, 2, 32], strides = [1, 1, 1]} : vector<1x2x96xf32> to vector<1x2x32xf32>
    %189 = vector.extract_strided_slice %187 {offsets = [0, 0, 0], sizes = [1, 2, 32], strides = [1, 1, 1]} : vector<1x2x96xf32> to vector<1x2x32xf32>
    %190 = arith.addf %188, %189 : vector<1x2x32xf32>
    %191 = arith.negf %190 : vector<1x2x32xf32>
    %192 = math.exp %191 : vector<1x2x32xf32>
    %cst_63 = arith.constant 1.000000e+00 : f32
    %193 = vector.broadcast %cst_63 : f32 to vector<1x2x32xf32>
    %194 = arith.addf %193, %192 : vector<1x2x32xf32>
    %195 = arith.divf %193, %194 : vector<1x2x32xf32>
    %196 = vector.extract_strided_slice %185 {offsets = [0, 0, 32], sizes = [1, 2, 32], strides = [1, 1, 1]} : vector<1x2x96xf32> to vector<1x2x32xf32>
    %197 = vector.extract_strided_slice %187 {offsets = [0, 0, 32], sizes = [1, 2, 32], strides = [1, 1, 1]} : vector<1x2x96xf32> to vector<1x2x32xf32>
    %198 = arith.addf %196, %197 : vector<1x2x32xf32>
    %199 = arith.negf %198 : vector<1x2x32xf32>
    %200 = math.exp %199 : vector<1x2x32xf32>
    %cst_64 = arith.constant 1.000000e+00 : f32
    %201 = vector.broadcast %cst_64 : f32 to vector<1x2x32xf32>
    %202 = arith.addf %201, %200 : vector<1x2x32xf32>
    %203 = arith.divf %201, %202 : vector<1x2x32xf32>
    %204 = vector.extract_strided_slice %185 {offsets = [0, 0, 64], sizes = [1, 2, 32], strides = [1, 1, 1]} : vector<1x2x96xf32> to vector<1x2x32xf32>
    %205 = vector.extract_strided_slice %187 {offsets = [0, 0, 64], sizes = [1, 2, 32], strides = [1, 1, 1]} : vector<1x2x96xf32> to vector<1x2x32xf32>
    %206 = arith.mulf %195, %205 : vector<1x2x32xf32>
    %207 = arith.addf %204, %206 : vector<1x2x32xf32>
    %208 = math.tanh %207 : vector<1x2x32xf32>
    %cst_65 = arith.constant 1.000000e+00 : f32
    %209 = vector.broadcast %cst_65 : f32 to vector<1x2x32xf32>
    %210 = arith.subf %209, %203 : vector<1x2x32xf32>
    %211 = arith.mulf %210, %208 : vector<1x2x32xf32>
    %212 = arith.mulf %203, %178 : vector<1x2x32xf32>
    %213 = arith.addf %211, %212 : vector<1x2x32xf32>
    %214 = arith.index_cast %c5_i32 : i32 to index
    %c0_66 = arith.constant 0 : index
    %c0_67 = arith.constant 0 : index
    %c0_68 = arith.constant 0 : index
    %215 = vector.load %arg5[%214, %c0_66, %c0_67, %c0_68] : memref<8x1x2x32xf32, #tpu.memory_space<vmem>>, vector<1x1x2x32xf32>
    %216 = vector.shape_cast %215 : vector<1x1x2x32xf32> to vector<1x2x32xf32>
    %217 = vector.shape_cast %213 : vector<1x2x32xf32> to vector<1x1x2x32xf32>
    tpu.vector_store %arg5[%214, %c0_66, %c0_67, %c0_68], %217 {strides = array<i32>} : memref<8x1x2x32xf32, #tpu.memory_space<vmem>>, vector<1x1x2x32xf32>,
    %c6_i32 = arith.constant 6 : i32
    %218 = arith.index_cast %c6_i32 : i32 to index
    %c0_69 = arith.constant 0 : index
    %c0_70 = arith.constant 0 : index
    %c0_71 = arith.constant 0 : index
    %219 = vector.load %arg1[%218, %c0_69, %c0_70, %c0_71] : memref<8x1x2x96xf32, #tpu.memory_space<vmem>>, vector<1x1x2x96xf32>
    %220 = vector.shape_cast %219 : vector<1x1x2x96xf32> to vector<1x2x96xf32>
    %cst_72 = arith.constant dense<0.000000e+00> : vector<1x2x96xf32>
    %221 = tpu.matmul %213, %3, %cst_72 {dimension_numbers = #tpu.dot_dimension_numbers<[2], [1], [1], [2], [0, 0, 0, 1, 1, 2], [0], [0]>} : vector<1x2x32xf32>, vector<1x32x96xf32>, vector<1x2x96xf32> -> vector<1x2x96xf32>
    %222 = arith.addf %221, %6 : vector<1x2x96xf32>
    %223 = vector.extract_strided_slice %220 {offsets = [0, 0, 0], sizes = [1, 2, 32], strides = [1, 1, 1]} : vector<1x2x96xf32> to vector<1x2x32xf32>
    %224 = vector.extract_strided_slice %222 {offsets = [0, 0, 0], sizes = [1, 2, 32], strides = [1, 1, 1]} : vector<1x2x96xf32> to vector<1x2x32xf32>
    %225 = arith.addf %223, %224 : vector<1x2x32xf32>
    %226 = arith.negf %225 : vector<1x2x32xf32>
    %227 = math.exp %226 : vector<1x2x32xf32>
    %cst_73 = arith.constant 1.000000e+00 : f32
    %228 = vector.broadcast %cst_73 : f32 to vector<1x2x32xf32>
    %229 = arith.addf %228, %227 : vector<1x2x32xf32>
    %230 = arith.divf %228, %229 : vector<1x2x32xf32>
    %231 = vector.extract_strided_slice %220 {offsets = [0, 0, 32], sizes = [1, 2, 32], strides = [1, 1, 1]} : vector<1x2x96xf32> to vector<1x2x32xf32>
    %232 = vector.extract_strided_slice %222 {offsets = [0, 0, 32], sizes = [1, 2, 32], strides = [1, 1, 1]} : vector<1x2x96xf32> to vector<1x2x32xf32>
    %233 = arith.addf %231, %232 : vector<1x2x32xf32>
    %234 = arith.negf %233 : vector<1x2x32xf32>
    %235 = math.exp %234 : vector<1x2x32xf32>
    %cst_74 = arith.constant 1.000000e+00 : f32
    %236 = vector.broadcast %cst_74 : f32 to vector<1x2x32xf32>
    %237 = arith.addf %236, %235 : vector<1x2x32xf32>
    %238 = arith.divf %236, %237 : vector<1x2x32xf32>
    %239 = vector.extract_strided_slice %220 {offsets = [0, 0, 64], sizes = [1, 2, 32], strides = [1, 1, 1]} : vector<1x2x96xf32> to vector<1x2x32xf32>
    %240 = vector.extract_strided_slice %222 {offsets = [0, 0, 64], sizes = [1, 2, 32], strides = [1, 1, 1]} : vector<1x2x96xf32> to vector<1x2x32xf32>
    %241 = arith.mulf %230, %240 : vector<1x2x32xf32>
    %242 = arith.addf %239, %241 : vector<1x2x32xf32>
    %243 = math.tanh %242 : vector<1x2x32xf32>
    %cst_75 = arith.constant 1.000000e+00 : f32
    %244 = vector.broadcast %cst_75 : f32 to vector<1x2x32xf32>
    %245 = arith.subf %244, %238 : vector<1x2x32xf32>
    %246 = arith.mulf %245, %243 : vector<1x2x32xf32>
    %247 = arith.mulf %238, %213 : vector<1x2x32xf32>
    %248 = arith.addf %246, %247 : vector<1x2x32xf32>
    %249 = arith.index_cast %c6_i32 : i32 to index
    %c0_76 = arith.constant 0 : index
    %c0_77 = arith.constant 0 : index
    %c0_78 = arith.constant 0 : index
    %250 = vector.load %arg5[%249, %c0_76, %c0_77, %c0_78] : memref<8x1x2x32xf32, #tpu.memory_space<vmem>>, vector<1x1x2x32xf32>
    %251 = vector.shape_cast %250 : vector<1x1x2x32xf32> to vector<1x2x32xf32>
    %252 = vector.shape_cast %248 : vector<1x2x32xf32> to vector<1x1x2x32xf32>
    tpu.vector_store %arg5[%249, %c0_76, %c0_77, %c0_78], %252 {strides = array<i32>} : memref<8x1x2x32xf32, #tpu.memory_space<vmem>>, vector<1x1x2x32xf32>,
    %c7_i32 = arith.constant 7 : i32
    %253 = arith.index_cast %c7_i32 : i32 to index
    %c0_79 = arith.constant 0 : index
    %c0_80 = arith.constant 0 : index
    %c0_81 = arith.constant 0 : index
    %254 = vector.load %arg1[%253, %c0_79, %c0_80, %c0_81] : memref<8x1x2x96xf32, #tpu.memory_space<vmem>>, vector<1x1x2x96xf32>
    %255 = vector.shape_cast %254 : vector<1x1x2x96xf32> to vector<1x2x96xf32>
    %cst_82 = arith.constant dense<0.000000e+00> : vector<1x2x96xf32>
    %256 = tpu.matmul %248, %3, %cst_82 {dimension_numbers = #tpu.dot_dimension_numbers<[2], [1], [1], [2], [0, 0, 0, 1, 1, 2], [0], [0]>} : vector<1x2x32xf32>, vector<1x32x96xf32>, vector<1x2x96xf32> -> vector<1x2x96xf32>
    %257 = arith.addf %256, %6 : vector<1x2x96xf32>
    %258 = vector.extract_strided_slice %255 {offsets = [0, 0, 0], sizes = [1, 2, 32], strides = [1, 1, 1]} : vector<1x2x96xf32> to vector<1x2x32xf32>
    %259 = vector.extract_strided_slice %257 {offsets = [0, 0, 0], sizes = [1, 2, 32], strides = [1, 1, 1]} : vector<1x2x96xf32> to vector<1x2x32xf32>
    %260 = arith.addf %258, %259 : vector<1x2x32xf32>
    %261 = arith.negf %260 : vector<1x2x32xf32>
    %262 = math.exp %261 : vector<1x2x32xf32>
    %cst_83 = arith.constant 1.000000e+00 : f32
    %263 = vector.broadcast %cst_83 : f32 to vector<1x2x32xf32>
    %264 = arith.addf %263, %262 : vector<1x2x32xf32>
    %265 = arith.divf %263, %264 : vector<1x2x32xf32>
    %266 = vector.extract_strided_slice %255 {offsets = [0, 0, 32], sizes = [1, 2, 32], strides = [1, 1, 1]} : vector<1x2x96xf32> to vector<1x2x32xf32>
    %267 = vector.extract_strided_slice %257 {offsets = [0, 0, 32], sizes = [1, 2, 32], strides = [1, 1, 1]} : vector<1x2x96xf32> to vector<1x2x32xf32>
    %268 = arith.addf %266, %267 : vector<1x2x32xf32>
    %269 = arith.negf %268 : vector<1x2x32xf32>
    %270 = math.exp %269 : vector<1x2x32xf32>
    %cst_84 = arith.constant 1.000000e+00 : f32
    %271 = vector.broadcast %cst_84 : f32 to vector<1x2x32xf32>
    %272 = arith.addf %271, %270 : vector<1x2x32xf32>
    %273 = arith.divf %271, %272 : vector<1x2x32xf32>
    %274 = vector.extract_strided_slice %255 {offsets = [0, 0, 64], sizes = [1, 2, 32], strides = [1, 1, 1]} : vector<1x2x96xf32> to vector<1x2x32xf32>
    %275 = vector.extract_strided_slice %257 {offsets = [0, 0, 64], sizes = [1, 2, 32], strides = [1, 1, 1]} : vector<1x2x96xf32> to vector<1x2x32xf32>
    %276 = arith.mulf %265, %275 : vector<1x2x32xf32>
    %277 = arith.addf %274, %276 : vector<1x2x32xf32>
    %278 = math.tanh %277 : vector<1x2x32xf32>
    %cst_85 = arith.constant 1.000000e+00 : f32
    %279 = vector.broadcast %cst_85 : f32 to vector<1x2x32xf32>
    %280 = arith.subf %279, %273 : vector<1x2x32xf32>
    %281 = arith.mulf %280, %278 : vector<1x2x32xf32>
    %282 = arith.mulf %273, %248 : vector<1x2x32xf32>
    %283 = arith.addf %281, %282 : vector<1x2x32xf32>
    %284 = arith.index_cast %c7_i32 : i32 to index
    %c0_86 = arith.constant 0 : index
    %c0_87 = arith.constant 0 : index
    %c0_88 = arith.constant 0 : index
    %285 = vector.load %arg5[%284, %c0_86, %c0_87, %c0_88] : memref<8x1x2x32xf32, #tpu.memory_space<vmem>>, vector<1x1x2x32xf32>
    %286 = vector.shape_cast %285 : vector<1x1x2x32xf32> to vector<1x2x32xf32>
    %287 = vector.shape_cast %283 : vector<1x2x32xf32> to vector<1x1x2x32xf32>
    tpu.vector_store %arg5[%284, %c0_86, %c0_87, %c0_88], %287 {strides = array<i32>} : memref<8x1x2x32xf32, #tpu.memory_space<vmem>>, vector<1x1x2x32xf32>,
    %c8_i32 = arith.constant 8 : i32
    %c0_89 = arith.constant 0 : index
    %c0_90 = arith.constant 0 : index
    %c0_91 = arith.constant 0 : index
    %288 = vector.load %arg6[%c0_89, %c0_90, %c0_91] : memref<1x2x32xf32, #tpu.memory_space<vmem>>, vector<1x2x32xf32>
    tpu.vector_store %arg6[%c0_89, %c0_90, %c0_91], %283 {strides = array<i32>} : memref<1x2x32xf32, #tpu.memory_space<vmem>>, vector<1x2x32xf32>,
    return
  }
  func.func @transform_0(%arg0: i32) -> (i32, i32, i32, i32) {
    %c0_i32 = arith.constant 0 : i32
    %c0_i32_0 = arith.constant 0 : i32
    %c0_i32_1 = arith.constant 0 : i32
    %c0_i32_2 = arith.constant 0 : i32
    return %arg0, %c0_i32, %c0_i32_0, %c0_i32_1 : i32, i32, i32, i32
  }
  func.func @transform_1(%arg0: i32) -> (i32, i32, i32) {
    %c0_i32 = arith.constant 0 : i32
    %c0_i32_0 = arith.constant 0 : i32
    %c0_i32_1 = arith.constant 0 : i32
    %c0_i32_2 = arith.constant 0 : i32
    return %c0_i32, %c0_i32_0, %c0_i32_1 : i32, i32, i32
  }
  func.func @transform_2(%arg0: i32) -> (i32, i32, i32) {
    %c0_i32 = arith.constant 0 : i32
    %c0_i32_0 = arith.constant 0 : i32
    %c0_i32_1 = arith.constant 0 : i32
    %c0_i32_2 = arith.constant 0 : i32
    return %c0_i32, %c0_i32_0, %c0_i32_1 : i32, i32, i32
  }
  func.func @transform_3(%arg0: i32) -> (i32, i32, i32) {
    %c0_i32 = arith.constant 0 : i32
    %c0_i32_0 = arith.constant 0 : i32
    %c0_i32_1 = arith.constant 0 : i32
    %c0_i32_2 = arith.constant 0 : i32
    return %c0_i32, %c0_i32_0, %c0_i32_1 : i32, i32, i32
  }
  func.func @transform_4(%arg0: i32) -> (i32, i32, i32, i32) {
    %c0_i32 = arith.constant 0 : i32
    %c0_i32_0 = arith.constant 0 : i32
    %c0_i32_1 = arith.constant 0 : i32
    %c0_i32_2 = arith.constant 0 : i32
    return %arg0, %c0_i32, %c0_i32_0, %c0_i32_1 : i32, i32, i32, i32
  }
}

module attributes {stable_mosaic.version = 11 : i64} {
  func.func @gru_kernel(%arg0: i32, %arg1: memref<8x2x2x96xf32, #tpu.memory_space<vmem>>, %arg2: memref<2x2x32xf32, #tpu.memory_space<vmem>>, %arg3: memref<2x32x96xf32, #tpu.memory_space<vmem>>, %arg4: memref<2x1x96xf32, #tpu.memory_space<vmem>>, %arg5: memref<8x2x2x32xf32, #tpu.memory_space<vmem>>, %arg6: memref<2x2x32xf32, #tpu.memory_space<vmem>>) attributes {dimension_semantics = [#tpu.dimension_semantics<arbitrary>], iteration_bounds = array<i64: 1>, scalar_prefetch = 0 : i64, scratch_operands = 1 : i64, tpu.core_type = #tpu.core_type<tc>, window_params = [{transform_indices = @transform_0, window_bounds = array<i64: 8, 2, 2, 96>}, {pipeline_mode = #tpu.pipeline_mode<synchronous>, transform_indices = @transform_1, window_bounds = array<i64: 2, 2, 32>}, {pipeline_mode = #tpu.pipeline_mode<synchronous>, transform_indices = @transform_2, window_bounds = array<i64: 2, 32, 96>}, {pipeline_mode = #tpu.pipeline_mode<synchronous>, transform_indices = @transform_3, window_bounds = array<i64: 2, 1, 96>}, {transform_indices = @transform_4, window_bounds = array<i64: 8, 2, 2, 32>}]} {
    %c0_i32 = arith.constant 0 : i32
    %0 = arith.cmpi eq, %arg0, %c0_i32 : i32
    %1 = arith.extui %0 : i1 to i32
    %c0_i32_0 = arith.constant 0 : i32
    %2 = arith.cmpi ne, %1, %c0_i32_0 : i32
    scf.if %2 {
      %c0_92 = arith.constant 0 : index
      %c0_93 = arith.constant 0 : index
      %c0_94 = arith.constant 0 : index
      %289 = vector.load %arg2[%c0_92, %c0_93, %c0_94] : memref<2x2x32xf32, #tpu.memory_space<vmem>>, vector<2x2x32xf32>
      %c0_95 = arith.constant 0 : index
      %c0_96 = arith.constant 0 : index
      %c0_97 = arith.constant 0 : index
      %290 = vector.load %arg6[%c0_95, %c0_96, %c0_97] : memref<2x2x32xf32, #tpu.memory_space<vmem>>, vector<2x2x32xf32>
      tpu.vector_store %arg6[%c0_95, %c0_96, %c0_97], %289 {strides = array<i32>} : memref<2x2x32xf32, #tpu.memory_space<vmem>>, vector<2x2x32xf32>,
    } else {
    }
    %c0 = arith.constant 0 : index
    %c0_1 = arith.constant 0 : index
    %c0_2 = arith.constant 0 : index
    %3 = vector.load %arg3[%c0, %c0_1, %c0_2] : memref<2x32x96xf32, #tpu.memory_space<vmem>>, vector<2x32x96xf32>
    %c0_3 = arith.constant 0 : index
    %c0_4 = arith.constant 0 : index
    %c0_5 = arith.constant 0 : index
    %4 = vector.load %arg4[%c0_3, %c0_4, %c0_5] : memref<2x1x96xf32, #tpu.memory_space<vmem>>, vector<2x1x96xf32>
    %5 = vector.shape_cast %4 : vector<2x1x96xf32> to vector<2x1x96xf32>
    %6 = vector.broadcast %5 : vector<2x1x96xf32> to vector<2x2x96xf32>
    %c0_6 = arith.constant 0 : index
    %c0_7 = arith.constant 0 : index
    %c0_8 = arith.constant 0 : index
    %7 = vector.load %arg6[%c0_6, %c0_7, %c0_8] : memref<2x2x32xf32, #tpu.memory_space<vmem>>, vector<2x2x32xf32>
    %c0_i32_9 = arith.constant 0 : i32
    %8 = arith.index_cast %c0_i32_9 : i32 to index
    %c0_10 = arith.constant 0 : index
    %c0_11 = arith.constant 0 : index
    %c0_12 = arith.constant 0 : index
    %9 = vector.load %arg1[%8, %c0_10, %c0_11, %c0_12] : memref<8x2x2x96xf32, #tpu.memory_space<vmem>>, vector<1x2x2x96xf32>
    %10 = vector.shape_cast %9 : vector<1x2x2x96xf32> to vector<2x2x96xf32>
    %cst = arith.constant dense<0.000000e+00> : vector<2x2x96xf32>
    %11 = tpu.matmul %7, %3, %cst {dimension_numbers = #tpu.dot_dimension_numbers<[2], [1], [1], [2], [0, 0, 0, 1, 1, 2], [0], [0]>} : vector<2x2x32xf32>, vector<2x32x96xf32>, vector<2x2x96xf32> -> vector<2x2x96xf32>
    %12 = arith.addf %11, %6 : vector<2x2x96xf32>
    %13 = vector.extract_strided_slice %10 {offsets = [0, 0, 0], sizes = [2, 2, 32], strides = [1, 1, 1]} : vector<2x2x96xf32> to vector<2x2x32xf32>
    %14 = vector.extract_strided_slice %12 {offsets = [0, 0, 0], sizes = [2, 2, 32], strides = [1, 1, 1]} : vector<2x2x96xf32> to vector<2x2x32xf32>
    %15 = arith.addf %13, %14 : vector<2x2x32xf32>
    %16 = arith.negf %15 : vector<2x2x32xf32>
    %17 = math.exp %16 : vector<2x2x32xf32>
    %cst_13 = arith.constant 1.000000e+00 : f32
    %18 = vector.broadcast %cst_13 : f32 to vector<2x2x32xf32>
    %19 = arith.addf %18, %17 : vector<2x2x32xf32>
    %20 = arith.divf %18, %19 : vector<2x2x32xf32>
    %21 = vector.extract_strided_slice %10 {offsets = [0, 0, 32], sizes = [2, 2, 32], strides = [1, 1, 1]} : vector<2x2x96xf32> to vector<2x2x32xf32>
    %22 = vector.extract_strided_slice %12 {offsets = [0, 0, 32], sizes = [2, 2, 32], strides = [1, 1, 1]} : vector<2x2x96xf32> to vector<2x2x32xf32>
    %23 = arith.addf %21, %22 : vector<2x2x32xf32>
    %24 = arith.negf %23 : vector<2x2x32xf32>
    %25 = math.exp %24 : vector<2x2x32xf32>
    %cst_14 = arith.constant 1.000000e+00 : f32
    %26 = vector.broadcast %cst_14 : f32 to vector<2x2x32xf32>
    %27 = arith.addf %26, %25 : vector<2x2x32xf32>
    %28 = arith.divf %26, %27 : vector<2x2x32xf32>
    %29 = vector.extract_strided_slice %10 {offsets = [0, 0, 64], sizes = [2, 2, 32], strides = [1, 1, 1]} : vector<2x2x96xf32> to vector<2x2x32xf32>
    %30 = vector.extract_strided_slice %12 {offsets = [0, 0, 64], sizes = [2, 2, 32], strides = [1, 1, 1]} : vector<2x2x96xf32> to vector<2x2x32xf32>
    %31 = arith.mulf %20, %30 : vector<2x2x32xf32>
    %32 = arith.addf %29, %31 : vector<2x2x32xf32>
    %33 = math.tanh %32 : vector<2x2x32xf32>
    %cst_15 = arith.constant 1.000000e+00 : f32
    %34 = vector.broadcast %cst_15 : f32 to vector<2x2x32xf32>
    %35 = arith.subf %34, %28 : vector<2x2x32xf32>
    %36 = arith.mulf %35, %33 : vector<2x2x32xf32>
    %37 = arith.mulf %28, %7 : vector<2x2x32xf32>
    %38 = arith.addf %36, %37 : vector<2x2x32xf32>
    %39 = arith.index_cast %c0_i32_9 : i32 to index
    %c0_16 = arith.constant 0 : index
    %c0_17 = arith.constant 0 : index
    %c0_18 = arith.constant 0 : index
    %40 = vector.load %arg5[%39, %c0_16, %c0_17, %c0_18] : memref<8x2x2x32xf32, #tpu.memory_space<vmem>>, vector<1x2x2x32xf32>
    %41 = vector.shape_cast %40 : vector<1x2x2x32xf32> to vector<2x2x32xf32>
    %42 = vector.shape_cast %38 : vector<2x2x32xf32> to vector<1x2x2x32xf32>
    tpu.vector_store %arg5[%39, %c0_16, %c0_17, %c0_18], %42 {strides = array<i32>} : memref<8x2x2x32xf32, #tpu.memory_space<vmem>>, vector<1x2x2x32xf32>,
    %c1_i32 = arith.constant 1 : i32
    %43 = arith.index_cast %c1_i32 : i32 to index
    %c0_19 = arith.constant 0 : index
    %c0_20 = arith.constant 0 : index
    %c0_21 = arith.constant 0 : index
    %44 = vector.load %arg1[%43, %c0_19, %c0_20, %c0_21] : memref<8x2x2x96xf32, #tpu.memory_space<vmem>>, vector<1x2x2x96xf32>
    %45 = vector.shape_cast %44 : vector<1x2x2x96xf32> to vector<2x2x96xf32>
    %cst_22 = arith.constant dense<0.000000e+00> : vector<2x2x96xf32>
    %46 = tpu.matmul %38, %3, %cst_22 {dimension_numbers = #tpu.dot_dimension_numbers<[2], [1], [1], [2], [0, 0, 0, 1, 1, 2], [0], [0]>} : vector<2x2x32xf32>, vector<2x32x96xf32>, vector<2x2x96xf32> -> vector<2x2x96xf32>
    %47 = arith.addf %46, %6 : vector<2x2x96xf32>
    %48 = vector.extract_strided_slice %45 {offsets = [0, 0, 0], sizes = [2, 2, 32], strides = [1, 1, 1]} : vector<2x2x96xf32> to vector<2x2x32xf32>
    %49 = vector.extract_strided_slice %47 {offsets = [0, 0, 0], sizes = [2, 2, 32], strides = [1, 1, 1]} : vector<2x2x96xf32> to vector<2x2x32xf32>
    %50 = arith.addf %48, %49 : vector<2x2x32xf32>
    %51 = arith.negf %50 : vector<2x2x32xf32>
    %52 = math.exp %51 : vector<2x2x32xf32>
    %cst_23 = arith.constant 1.000000e+00 : f32
    %53 = vector.broadcast %cst_23 : f32 to vector<2x2x32xf32>
    %54 = arith.addf %53, %52 : vector<2x2x32xf32>
    %55 = arith.divf %53, %54 : vector<2x2x32xf32>
    %56 = vector.extract_strided_slice %45 {offsets = [0, 0, 32], sizes = [2, 2, 32], strides = [1, 1, 1]} : vector<2x2x96xf32> to vector<2x2x32xf32>
    %57 = vector.extract_strided_slice %47 {offsets = [0, 0, 32], sizes = [2, 2, 32], strides = [1, 1, 1]} : vector<2x2x96xf32> to vector<2x2x32xf32>
    %58 = arith.addf %56, %57 : vector<2x2x32xf32>
    %59 = arith.negf %58 : vector<2x2x32xf32>
    %60 = math.exp %59 : vector<2x2x32xf32>
    %cst_24 = arith.constant 1.000000e+00 : f32
    %61 = vector.broadcast %cst_24 : f32 to vector<2x2x32xf32>
    %62 = arith.addf %61, %60 : vector<2x2x32xf32>
    %63 = arith.divf %61, %62 : vector<2x2x32xf32>
    %64 = vector.extract_strided_slice %45 {offsets = [0, 0, 64], sizes = [2, 2, 32], strides = [1, 1, 1]} : vector<2x2x96xf32> to vector<2x2x32xf32>
    %65 = vector.extract_strided_slice %47 {offsets = [0, 0, 64], sizes = [2, 2, 32], strides = [1, 1, 1]} : vector<2x2x96xf32> to vector<2x2x32xf32>
    %66 = arith.mulf %55, %65 : vector<2x2x32xf32>
    %67 = arith.addf %64, %66 : vector<2x2x32xf32>
    %68 = math.tanh %67 : vector<2x2x32xf32>
    %cst_25 = arith.constant 1.000000e+00 : f32
    %69 = vector.broadcast %cst_25 : f32 to vector<2x2x32xf32>
    %70 = arith.subf %69, %63 : vector<2x2x32xf32>
    %71 = arith.mulf %70, %68 : vector<2x2x32xf32>
    %72 = arith.mulf %63, %38 : vector<2x2x32xf32>
    %73 = arith.addf %71, %72 : vector<2x2x32xf32>
    %74 = arith.index_cast %c1_i32 : i32 to index
    %c0_26 = arith.constant 0 : index
    %c0_27 = arith.constant 0 : index
    %c0_28 = arith.constant 0 : index
    %75 = vector.load %arg5[%74, %c0_26, %c0_27, %c0_28] : memref<8x2x2x32xf32, #tpu.memory_space<vmem>>, vector<1x2x2x32xf32>
    %76 = vector.shape_cast %75 : vector<1x2x2x32xf32> to vector<2x2x32xf32>
    %77 = vector.shape_cast %73 : vector<2x2x32xf32> to vector<1x2x2x32xf32>
    tpu.vector_store %arg5[%74, %c0_26, %c0_27, %c0_28], %77 {strides = array<i32>} : memref<8x2x2x32xf32, #tpu.memory_space<vmem>>, vector<1x2x2x32xf32>,
    %c2_i32 = arith.constant 2 : i32
    %78 = arith.index_cast %c2_i32 : i32 to index
    %c0_29 = arith.constant 0 : index
    %c0_30 = arith.constant 0 : index
    %c0_31 = arith.constant 0 : index
    %79 = vector.load %arg1[%78, %c0_29, %c0_30, %c0_31] : memref<8x2x2x96xf32, #tpu.memory_space<vmem>>, vector<1x2x2x96xf32>
    %80 = vector.shape_cast %79 : vector<1x2x2x96xf32> to vector<2x2x96xf32>
    %cst_32 = arith.constant dense<0.000000e+00> : vector<2x2x96xf32>
    %81 = tpu.matmul %73, %3, %cst_32 {dimension_numbers = #tpu.dot_dimension_numbers<[2], [1], [1], [2], [0, 0, 0, 1, 1, 2], [0], [0]>} : vector<2x2x32xf32>, vector<2x32x96xf32>, vector<2x2x96xf32> -> vector<2x2x96xf32>
    %82 = arith.addf %81, %6 : vector<2x2x96xf32>
    %83 = vector.extract_strided_slice %80 {offsets = [0, 0, 0], sizes = [2, 2, 32], strides = [1, 1, 1]} : vector<2x2x96xf32> to vector<2x2x32xf32>
    %84 = vector.extract_strided_slice %82 {offsets = [0, 0, 0], sizes = [2, 2, 32], strides = [1, 1, 1]} : vector<2x2x96xf32> to vector<2x2x32xf32>
    %85 = arith.addf %83, %84 : vector<2x2x32xf32>
    %86 = arith.negf %85 : vector<2x2x32xf32>
    %87 = math.exp %86 : vector<2x2x32xf32>
    %cst_33 = arith.constant 1.000000e+00 : f32
    %88 = vector.broadcast %cst_33 : f32 to vector<2x2x32xf32>
    %89 = arith.addf %88, %87 : vector<2x2x32xf32>
    %90 = arith.divf %88, %89 : vector<2x2x32xf32>
    %91 = vector.extract_strided_slice %80 {offsets = [0, 0, 32], sizes = [2, 2, 32], strides = [1, 1, 1]} : vector<2x2x96xf32> to vector<2x2x32xf32>
    %92 = vector.extract_strided_slice %82 {offsets = [0, 0, 32], sizes = [2, 2, 32], strides = [1, 1, 1]} : vector<2x2x96xf32> to vector<2x2x32xf32>
    %93 = arith.addf %91, %92 : vector<2x2x32xf32>
    %94 = arith.negf %93 : vector<2x2x32xf32>
    %95 = math.exp %94 : vector<2x2x32xf32>
    %cst_34 = arith.constant 1.000000e+00 : f32
    %96 = vector.broadcast %cst_34 : f32 to vector<2x2x32xf32>
    %97 = arith.addf %96, %95 : vector<2x2x32xf32>
    %98 = arith.divf %96, %97 : vector<2x2x32xf32>
    %99 = vector.extract_strided_slice %80 {offsets = [0, 0, 64], sizes = [2, 2, 32], strides = [1, 1, 1]} : vector<2x2x96xf32> to vector<2x2x32xf32>
    %100 = vector.extract_strided_slice %82 {offsets = [0, 0, 64], sizes = [2, 2, 32], strides = [1, 1, 1]} : vector<2x2x96xf32> to vector<2x2x32xf32>
    %101 = arith.mulf %90, %100 : vector<2x2x32xf32>
    %102 = arith.addf %99, %101 : vector<2x2x32xf32>
    %103 = math.tanh %102 : vector<2x2x32xf32>
    %cst_35 = arith.constant 1.000000e+00 : f32
    %104 = vector.broadcast %cst_35 : f32 to vector<2x2x32xf32>
    %105 = arith.subf %104, %98 : vector<2x2x32xf32>
    %106 = arith.mulf %105, %103 : vector<2x2x32xf32>
    %107 = arith.mulf %98, %73 : vector<2x2x32xf32>
    %108 = arith.addf %106, %107 : vector<2x2x32xf32>
    %109 = arith.index_cast %c2_i32 : i32 to index
    %c0_36 = arith.constant 0 : index
    %c0_37 = arith.constant 0 : index
    %c0_38 = arith.constant 0 : index
    %110 = vector.load %arg5[%109, %c0_36, %c0_37, %c0_38] : memref<8x2x2x32xf32, #tpu.memory_space<vmem>>, vector<1x2x2x32xf32>
    %111 = vector.shape_cast %110 : vector<1x2x2x32xf32> to vector<2x2x32xf32>
    %112 = vector.shape_cast %108 : vector<2x2x32xf32> to vector<1x2x2x32xf32>
    tpu.vector_store %arg5[%109, %c0_36, %c0_37, %c0_38], %112 {strides = array<i32>} : memref<8x2x2x32xf32, #tpu.memory_space<vmem>>, vector<1x2x2x32xf32>,
    %c3_i32 = arith.constant 3 : i32
    %113 = arith.index_cast %c3_i32 : i32 to index
    %c0_39 = arith.constant 0 : index
    %c0_40 = arith.constant 0 : index
    %c0_41 = arith.constant 0 : index
    %114 = vector.load %arg1[%113, %c0_39, %c0_40, %c0_41] : memref<8x2x2x96xf32, #tpu.memory_space<vmem>>, vector<1x2x2x96xf32>
    %115 = vector.shape_cast %114 : vector<1x2x2x96xf32> to vector<2x2x96xf32>
    %cst_42 = arith.constant dense<0.000000e+00> : vector<2x2x96xf32>
    %116 = tpu.matmul %108, %3, %cst_42 {dimension_numbers = #tpu.dot_dimension_numbers<[2], [1], [1], [2], [0, 0, 0, 1, 1, 2], [0], [0]>} : vector<2x2x32xf32>, vector<2x32x96xf32>, vector<2x2x96xf32> -> vector<2x2x96xf32>
    %117 = arith.addf %116, %6 : vector<2x2x96xf32>
    %118 = vector.extract_strided_slice %115 {offsets = [0, 0, 0], sizes = [2, 2, 32], strides = [1, 1, 1]} : vector<2x2x96xf32> to vector<2x2x32xf32>
    %119 = vector.extract_strided_slice %117 {offsets = [0, 0, 0], sizes = [2, 2, 32], strides = [1, 1, 1]} : vector<2x2x96xf32> to vector<2x2x32xf32>
    %120 = arith.addf %118, %119 : vector<2x2x32xf32>
    %121 = arith.negf %120 : vector<2x2x32xf32>
    %122 = math.exp %121 : vector<2x2x32xf32>
    %cst_43 = arith.constant 1.000000e+00 : f32
    %123 = vector.broadcast %cst_43 : f32 to vector<2x2x32xf32>
    %124 = arith.addf %123, %122 : vector<2x2x32xf32>
    %125 = arith.divf %123, %124 : vector<2x2x32xf32>
    %126 = vector.extract_strided_slice %115 {offsets = [0, 0, 32], sizes = [2, 2, 32], strides = [1, 1, 1]} : vector<2x2x96xf32> to vector<2x2x32xf32>
    %127 = vector.extract_strided_slice %117 {offsets = [0, 0, 32], sizes = [2, 2, 32], strides = [1, 1, 1]} : vector<2x2x96xf32> to vector<2x2x32xf32>
    %128 = arith.addf %126, %127 : vector<2x2x32xf32>
    %129 = arith.negf %128 : vector<2x2x32xf32>
    %130 = math.exp %129 : vector<2x2x32xf32>
    %cst_44 = arith.constant 1.000000e+00 : f32
    %131 = vector.broadcast %cst_44 : f32 to vector<2x2x32xf32>
    %132 = arith.addf %131, %130 : vector<2x2x32xf32>
    %133 = arith.divf %131, %132 : vector<2x2x32xf32>
    %134 = vector.extract_strided_slice %115 {offsets = [0, 0, 64], sizes = [2, 2, 32], strides = [1, 1, 1]} : vector<2x2x96xf32> to vector<2x2x32xf32>
    %135 = vector.extract_strided_slice %117 {offsets = [0, 0, 64], sizes = [2, 2, 32], strides = [1, 1, 1]} : vector<2x2x96xf32> to vector<2x2x32xf32>
    %136 = arith.mulf %125, %135 : vector<2x2x32xf32>
    %137 = arith.addf %134, %136 : vector<2x2x32xf32>
    %138 = math.tanh %137 : vector<2x2x32xf32>
    %cst_45 = arith.constant 1.000000e+00 : f32
    %139 = vector.broadcast %cst_45 : f32 to vector<2x2x32xf32>
    %140 = arith.subf %139, %133 : vector<2x2x32xf32>
    %141 = arith.mulf %140, %138 : vector<2x2x32xf32>
    %142 = arith.mulf %133, %108 : vector<2x2x32xf32>
    %143 = arith.addf %141, %142 : vector<2x2x32xf32>
    %144 = arith.index_cast %c3_i32 : i32 to index
    %c0_46 = arith.constant 0 : index
    %c0_47 = arith.constant 0 : index
    %c0_48 = arith.constant 0 : index
    %145 = vector.load %arg5[%144, %c0_46, %c0_47, %c0_48] : memref<8x2x2x32xf32, #tpu.memory_space<vmem>>, vector<1x2x2x32xf32>
    %146 = vector.shape_cast %145 : vector<1x2x2x32xf32> to vector<2x2x32xf32>
    %147 = vector.shape_cast %143 : vector<2x2x32xf32> to vector<1x2x2x32xf32>
    tpu.vector_store %arg5[%144, %c0_46, %c0_47, %c0_48], %147 {strides = array<i32>} : memref<8x2x2x32xf32, #tpu.memory_space<vmem>>, vector<1x2x2x32xf32>,
    %c4_i32 = arith.constant 4 : i32
    %148 = arith.index_cast %c4_i32 : i32 to index
    %c0_49 = arith.constant 0 : index
    %c0_50 = arith.constant 0 : index
    %c0_51 = arith.constant 0 : index
    %149 = vector.load %arg1[%148, %c0_49, %c0_50, %c0_51] : memref<8x2x2x96xf32, #tpu.memory_space<vmem>>, vector<1x2x2x96xf32>
    %150 = vector.shape_cast %149 : vector<1x2x2x96xf32> to vector<2x2x96xf32>
    %cst_52 = arith.constant dense<0.000000e+00> : vector<2x2x96xf32>
    %151 = tpu.matmul %143, %3, %cst_52 {dimension_numbers = #tpu.dot_dimension_numbers<[2], [1], [1], [2], [0, 0, 0, 1, 1, 2], [0], [0]>} : vector<2x2x32xf32>, vector<2x32x96xf32>, vector<2x2x96xf32> -> vector<2x2x96xf32>
    %152 = arith.addf %151, %6 : vector<2x2x96xf32>
    %153 = vector.extract_strided_slice %150 {offsets = [0, 0, 0], sizes = [2, 2, 32], strides = [1, 1, 1]} : vector<2x2x96xf32> to vector<2x2x32xf32>
    %154 = vector.extract_strided_slice %152 {offsets = [0, 0, 0], sizes = [2, 2, 32], strides = [1, 1, 1]} : vector<2x2x96xf32> to vector<2x2x32xf32>
    %155 = arith.addf %153, %154 : vector<2x2x32xf32>
    %156 = arith.negf %155 : vector<2x2x32xf32>
    %157 = math.exp %156 : vector<2x2x32xf32>
    %cst_53 = arith.constant 1.000000e+00 : f32
    %158 = vector.broadcast %cst_53 : f32 to vector<2x2x32xf32>
    %159 = arith.addf %158, %157 : vector<2x2x32xf32>
    %160 = arith.divf %158, %159 : vector<2x2x32xf32>
    %161 = vector.extract_strided_slice %150 {offsets = [0, 0, 32], sizes = [2, 2, 32], strides = [1, 1, 1]} : vector<2x2x96xf32> to vector<2x2x32xf32>
    %162 = vector.extract_strided_slice %152 {offsets = [0, 0, 32], sizes = [2, 2, 32], strides = [1, 1, 1]} : vector<2x2x96xf32> to vector<2x2x32xf32>
    %163 = arith.addf %161, %162 : vector<2x2x32xf32>
    %164 = arith.negf %163 : vector<2x2x32xf32>
    %165 = math.exp %164 : vector<2x2x32xf32>
    %cst_54 = arith.constant 1.000000e+00 : f32
    %166 = vector.broadcast %cst_54 : f32 to vector<2x2x32xf32>
    %167 = arith.addf %166, %165 : vector<2x2x32xf32>
    %168 = arith.divf %166, %167 : vector<2x2x32xf32>
    %169 = vector.extract_strided_slice %150 {offsets = [0, 0, 64], sizes = [2, 2, 32], strides = [1, 1, 1]} : vector<2x2x96xf32> to vector<2x2x32xf32>
    %170 = vector.extract_strided_slice %152 {offsets = [0, 0, 64], sizes = [2, 2, 32], strides = [1, 1, 1]} : vector<2x2x96xf32> to vector<2x2x32xf32>
    %171 = arith.mulf %160, %170 : vector<2x2x32xf32>
    %172 = arith.addf %169, %171 : vector<2x2x32xf32>
    %173 = math.tanh %172 : vector<2x2x32xf32>
    %cst_55 = arith.constant 1.000000e+00 : f32
    %174 = vector.broadcast %cst_55 : f32 to vector<2x2x32xf32>
    %175 = arith.subf %174, %168 : vector<2x2x32xf32>
    %176 = arith.mulf %175, %173 : vector<2x2x32xf32>
    %177 = arith.mulf %168, %143 : vector<2x2x32xf32>
    %178 = arith.addf %176, %177 : vector<2x2x32xf32>
    %179 = arith.index_cast %c4_i32 : i32 to index
    %c0_56 = arith.constant 0 : index
    %c0_57 = arith.constant 0 : index
    %c0_58 = arith.constant 0 : index
    %180 = vector.load %arg5[%179, %c0_56, %c0_57, %c0_58] : memref<8x2x2x32xf32, #tpu.memory_space<vmem>>, vector<1x2x2x32xf32>
    %181 = vector.shape_cast %180 : vector<1x2x2x32xf32> to vector<2x2x32xf32>
    %182 = vector.shape_cast %178 : vector<2x2x32xf32> to vector<1x2x2x32xf32>
    tpu.vector_store %arg5[%179, %c0_56, %c0_57, %c0_58], %182 {strides = array<i32>} : memref<8x2x2x32xf32, #tpu.memory_space<vmem>>, vector<1x2x2x32xf32>,
    %c5_i32 = arith.constant 5 : i32
    %183 = arith.index_cast %c5_i32 : i32 to index
    %c0_59 = arith.constant 0 : index
    %c0_60 = arith.constant 0 : index
    %c0_61 = arith.constant 0 : index
    %184 = vector.load %arg1[%183, %c0_59, %c0_60, %c0_61] : memref<8x2x2x96xf32, #tpu.memory_space<vmem>>, vector<1x2x2x96xf32>
    %185 = vector.shape_cast %184 : vector<1x2x2x96xf32> to vector<2x2x96xf32>
    %cst_62 = arith.constant dense<0.000000e+00> : vector<2x2x96xf32>
    %186 = tpu.matmul %178, %3, %cst_62 {dimension_numbers = #tpu.dot_dimension_numbers<[2], [1], [1], [2], [0, 0, 0, 1, 1, 2], [0], [0]>} : vector<2x2x32xf32>, vector<2x32x96xf32>, vector<2x2x96xf32> -> vector<2x2x96xf32>
    %187 = arith.addf %186, %6 : vector<2x2x96xf32>
    %188 = vector.extract_strided_slice %185 {offsets = [0, 0, 0], sizes = [2, 2, 32], strides = [1, 1, 1]} : vector<2x2x96xf32> to vector<2x2x32xf32>
    %189 = vector.extract_strided_slice %187 {offsets = [0, 0, 0], sizes = [2, 2, 32], strides = [1, 1, 1]} : vector<2x2x96xf32> to vector<2x2x32xf32>
    %190 = arith.addf %188, %189 : vector<2x2x32xf32>
    %191 = arith.negf %190 : vector<2x2x32xf32>
    %192 = math.exp %191 : vector<2x2x32xf32>
    %cst_63 = arith.constant 1.000000e+00 : f32
    %193 = vector.broadcast %cst_63 : f32 to vector<2x2x32xf32>
    %194 = arith.addf %193, %192 : vector<2x2x32xf32>
    %195 = arith.divf %193, %194 : vector<2x2x32xf32>
    %196 = vector.extract_strided_slice %185 {offsets = [0, 0, 32], sizes = [2, 2, 32], strides = [1, 1, 1]} : vector<2x2x96xf32> to vector<2x2x32xf32>
    %197 = vector.extract_strided_slice %187 {offsets = [0, 0, 32], sizes = [2, 2, 32], strides = [1, 1, 1]} : vector<2x2x96xf32> to vector<2x2x32xf32>
    %198 = arith.addf %196, %197 : vector<2x2x32xf32>
    %199 = arith.negf %198 : vector<2x2x32xf32>
    %200 = math.exp %199 : vector<2x2x32xf32>
    %cst_64 = arith.constant 1.000000e+00 : f32
    %201 = vector.broadcast %cst_64 : f32 to vector<2x2x32xf32>
    %202 = arith.addf %201, %200 : vector<2x2x32xf32>
    %203 = arith.divf %201, %202 : vector<2x2x32xf32>
    %204 = vector.extract_strided_slice %185 {offsets = [0, 0, 64], sizes = [2, 2, 32], strides = [1, 1, 1]} : vector<2x2x96xf32> to vector<2x2x32xf32>
    %205 = vector.extract_strided_slice %187 {offsets = [0, 0, 64], sizes = [2, 2, 32], strides = [1, 1, 1]} : vector<2x2x96xf32> to vector<2x2x32xf32>
    %206 = arith.mulf %195, %205 : vector<2x2x32xf32>
    %207 = arith.addf %204, %206 : vector<2x2x32xf32>
    %208 = math.tanh %207 : vector<2x2x32xf32>
    %cst_65 = arith.constant 1.000000e+00 : f32
    %209 = vector.broadcast %cst_65 : f32 to vector<2x2x32xf32>
    %210 = arith.subf %209, %203 : vector<2x2x32xf32>
    %211 = arith.mulf %210, %208 : vector<2x2x32xf32>
    %212 = arith.mulf %203, %178 : vector<2x2x32xf32>
    %213 = arith.addf %211, %212 : vector<2x2x32xf32>
    %214 = arith.index_cast %c5_i32 : i32 to index
    %c0_66 = arith.constant 0 : index
    %c0_67 = arith.constant 0 : index
    %c0_68 = arith.constant 0 : index
    %215 = vector.load %arg5[%214, %c0_66, %c0_67, %c0_68] : memref<8x2x2x32xf32, #tpu.memory_space<vmem>>, vector<1x2x2x32xf32>
    %216 = vector.shape_cast %215 : vector<1x2x2x32xf32> to vector<2x2x32xf32>
    %217 = vector.shape_cast %213 : vector<2x2x32xf32> to vector<1x2x2x32xf32>
    tpu.vector_store %arg5[%214, %c0_66, %c0_67, %c0_68], %217 {strides = array<i32>} : memref<8x2x2x32xf32, #tpu.memory_space<vmem>>, vector<1x2x2x32xf32>,
    %c6_i32 = arith.constant 6 : i32
    %218 = arith.index_cast %c6_i32 : i32 to index
    %c0_69 = arith.constant 0 : index
    %c0_70 = arith.constant 0 : index
    %c0_71 = arith.constant 0 : index
    %219 = vector.load %arg1[%218, %c0_69, %c0_70, %c0_71] : memref<8x2x2x96xf32, #tpu.memory_space<vmem>>, vector<1x2x2x96xf32>
    %220 = vector.shape_cast %219 : vector<1x2x2x96xf32> to vector<2x2x96xf32>
    %cst_72 = arith.constant dense<0.000000e+00> : vector<2x2x96xf32>
    %221 = tpu.matmul %213, %3, %cst_72 {dimension_numbers = #tpu.dot_dimension_numbers<[2], [1], [1], [2], [0, 0, 0, 1, 1, 2], [0], [0]>} : vector<2x2x32xf32>, vector<2x32x96xf32>, vector<2x2x96xf32> -> vector<2x2x96xf32>
    %222 = arith.addf %221, %6 : vector<2x2x96xf32>
    %223 = vector.extract_strided_slice %220 {offsets = [0, 0, 0], sizes = [2, 2, 32], strides = [1, 1, 1]} : vector<2x2x96xf32> to vector<2x2x32xf32>
    %224 = vector.extract_strided_slice %222 {offsets = [0, 0, 0], sizes = [2, 2, 32], strides = [1, 1, 1]} : vector<2x2x96xf32> to vector<2x2x32xf32>
    %225 = arith.addf %223, %224 : vector<2x2x32xf32>
    %226 = arith.negf %225 : vector<2x2x32xf32>
    %227 = math.exp %226 : vector<2x2x32xf32>
    %cst_73 = arith.constant 1.000000e+00 : f32
    %228 = vector.broadcast %cst_73 : f32 to vector<2x2x32xf32>
    %229 = arith.addf %228, %227 : vector<2x2x32xf32>
    %230 = arith.divf %228, %229 : vector<2x2x32xf32>
    %231 = vector.extract_strided_slice %220 {offsets = [0, 0, 32], sizes = [2, 2, 32], strides = [1, 1, 1]} : vector<2x2x96xf32> to vector<2x2x32xf32>
    %232 = vector.extract_strided_slice %222 {offsets = [0, 0, 32], sizes = [2, 2, 32], strides = [1, 1, 1]} : vector<2x2x96xf32> to vector<2x2x32xf32>
    %233 = arith.addf %231, %232 : vector<2x2x32xf32>
    %234 = arith.negf %233 : vector<2x2x32xf32>
    %235 = math.exp %234 : vector<2x2x32xf32>
    %cst_74 = arith.constant 1.000000e+00 : f32
    %236 = vector.broadcast %cst_74 : f32 to vector<2x2x32xf32>
    %237 = arith.addf %236, %235 : vector<2x2x32xf32>
    %238 = arith.divf %236, %237 : vector<2x2x32xf32>
    %239 = vector.extract_strided_slice %220 {offsets = [0, 0, 64], sizes = [2, 2, 32], strides = [1, 1, 1]} : vector<2x2x96xf32> to vector<2x2x32xf32>
    %240 = vector.extract_strided_slice %222 {offsets = [0, 0, 64], sizes = [2, 2, 32], strides = [1, 1, 1]} : vector<2x2x96xf32> to vector<2x2x32xf32>
    %241 = arith.mulf %230, %240 : vector<2x2x32xf32>
    %242 = arith.addf %239, %241 : vector<2x2x32xf32>
    %243 = math.tanh %242 : vector<2x2x32xf32>
    %cst_75 = arith.constant 1.000000e+00 : f32
    %244 = vector.broadcast %cst_75 : f32 to vector<2x2x32xf32>
    %245 = arith.subf %244, %238 : vector<2x2x32xf32>
    %246 = arith.mulf %245, %243 : vector<2x2x32xf32>
    %247 = arith.mulf %238, %213 : vector<2x2x32xf32>
    %248 = arith.addf %246, %247 : vector<2x2x32xf32>
    %249 = arith.index_cast %c6_i32 : i32 to index
    %c0_76 = arith.constant 0 : index
    %c0_77 = arith.constant 0 : index
    %c0_78 = arith.constant 0 : index
    %250 = vector.load %arg5[%249, %c0_76, %c0_77, %c0_78] : memref<8x2x2x32xf32, #tpu.memory_space<vmem>>, vector<1x2x2x32xf32>
    %251 = vector.shape_cast %250 : vector<1x2x2x32xf32> to vector<2x2x32xf32>
    %252 = vector.shape_cast %248 : vector<2x2x32xf32> to vector<1x2x2x32xf32>
    tpu.vector_store %arg5[%249, %c0_76, %c0_77, %c0_78], %252 {strides = array<i32>} : memref<8x2x2x32xf32, #tpu.memory_space<vmem>>, vector<1x2x2x32xf32>,
    %c7_i32 = arith.constant 7 : i32
    %253 = arith.index_cast %c7_i32 : i32 to index
    %c0_79 = arith.constant 0 : index
    %c0_80 = arith.constant 0 : index
    %c0_81 = arith.constant 0 : index
    %254 = vector.load %arg1[%253, %c0_79, %c0_80, %c0_81] : memref<8x2x2x96xf32, #tpu.memory_space<vmem>>, vector<1x2x2x96xf32>
    %255 = vector.shape_cast %254 : vector<1x2x2x96xf32> to vector<2x2x96xf32>
    %cst_82 = arith.constant dense<0.000000e+00> : vector<2x2x96xf32>
    %256 = tpu.matmul %248, %3, %cst_82 {dimension_numbers = #tpu.dot_dimension_numbers<[2], [1], [1], [2], [0, 0, 0, 1, 1, 2], [0], [0]>} : vector<2x2x32xf32>, vector<2x32x96xf32>, vector<2x2x96xf32> -> vector<2x2x96xf32>
    %257 = arith.addf %256, %6 : vector<2x2x96xf32>
    %258 = vector.extract_strided_slice %255 {offsets = [0, 0, 0], sizes = [2, 2, 32], strides = [1, 1, 1]} : vector<2x2x96xf32> to vector<2x2x32xf32>
    %259 = vector.extract_strided_slice %257 {offsets = [0, 0, 0], sizes = [2, 2, 32], strides = [1, 1, 1]} : vector<2x2x96xf32> to vector<2x2x32xf32>
    %260 = arith.addf %258, %259 : vector<2x2x32xf32>
    %261 = arith.negf %260 : vector<2x2x32xf32>
    %262 = math.exp %261 : vector<2x2x32xf32>
    %cst_83 = arith.constant 1.000000e+00 : f32
    %263 = vector.broadcast %cst_83 : f32 to vector<2x2x32xf32>
    %264 = arith.addf %263, %262 : vector<2x2x32xf32>
    %265 = arith.divf %263, %264 : vector<2x2x32xf32>
    %266 = vector.extract_strided_slice %255 {offsets = [0, 0, 32], sizes = [2, 2, 32], strides = [1, 1, 1]} : vector<2x2x96xf32> to vector<2x2x32xf32>
    %267 = vector.extract_strided_slice %257 {offsets = [0, 0, 32], sizes = [2, 2, 32], strides = [1, 1, 1]} : vector<2x2x96xf32> to vector<2x2x32xf32>
    %268 = arith.addf %266, %267 : vector<2x2x32xf32>
    %269 = arith.negf %268 : vector<2x2x32xf32>
    %270 = math.exp %269 : vector<2x2x32xf32>
    %cst_84 = arith.constant 1.000000e+00 : f32
    %271 = vector.broadcast %cst_84 : f32 to vector<2x2x32xf32>
    %272 = arith.addf %271, %270 : vector<2x2x32xf32>
    %273 = arith.divf %271, %272 : vector<2x2x32xf32>
    %274 = vector.extract_strided_slice %255 {offsets = [0, 0, 64], sizes = [2, 2, 32], strides = [1, 1, 1]} : vector<2x2x96xf32> to vector<2x2x32xf32>
    %275 = vector.extract_strided_slice %257 {offsets = [0, 0, 64], sizes = [2, 2, 32], strides = [1, 1, 1]} : vector<2x2x96xf32> to vector<2x2x32xf32>
    %276 = arith.mulf %265, %275 : vector<2x2x32xf32>
    %277 = arith.addf %274, %276 : vector<2x2x32xf32>
    %278 = math.tanh %277 : vector<2x2x32xf32>
    %cst_85 = arith.constant 1.000000e+00 : f32
    %279 = vector.broadcast %cst_85 : f32 to vector<2x2x32xf32>
    %280 = arith.subf %279, %273 : vector<2x2x32xf32>
    %281 = arith.mulf %280, %278 : vector<2x2x32xf32>
    %282 = arith.mulf %273, %248 : vector<2x2x32xf32>
    %283 = arith.addf %281, %282 : vector<2x2x32xf32>
    %284 = arith.index_cast %c7_i32 : i32 to index
    %c0_86 = arith.constant 0 : index
    %c0_87 = arith.constant 0 : index
    %c0_88 = arith.constant 0 : index
    %285 = vector.load %arg5[%284, %c0_86, %c0_87, %c0_88] : memref<8x2x2x32xf32, #tpu.memory_space<vmem>>, vector<1x2x2x32xf32>
    %286 = vector.shape_cast %285 : vector<1x2x2x32xf32> to vector<2x2x32xf32>
    %287 = vector.shape_cast %283 : vector<2x2x32xf32> to vector<1x2x2x32xf32>
    tpu.vector_store %arg5[%284, %c0_86, %c0_87, %c0_88], %287 {strides = array<i32>} : memref<8x2x2x32xf32, #tpu.memory_space<vmem>>, vector<1x2x2x32xf32>,
    %c8_i32 = arith.constant 8 : i32
    %c0_89 = arith.constant 0 : index
    %c0_90 = arith.constant 0 : index
    %c0_91 = arith.constant 0 : index
    %288 = vector.load %arg6[%c0_89, %c0_90, %c0_91] : memref<2x2x32xf32, #tpu.memory_space<vmem>>, vector<2x2x32xf32>
    tpu.vector_store %arg6[%c0_89, %c0_90, %c0_91], %283 {strides = array<i32>} : memref<2x2x32xf32, #tpu.memory_space<vmem>>, vector<2x2x32xf32>,
    return
  }
  func.func @transform_0(%arg0: i32) -> (i32, i32, i32, i32) {
    %c0_i32 = arith.constant 0 : i32
    %c0_i32_0 = arith.constant 0 : i32
    %c0_i32_1 = arith.constant 0 : i32
    %c0_i32_2 = arith.constant 0 : i32
    return %arg0, %c0_i32, %c0_i32_0, %c0_i32_1 : i32, i32, i32, i32
  }
  func.func @transform_1(%arg0: i32) -> (i32, i32, i32) {
    %c0_i32 = arith.constant 0 : i32
    %c0_i32_0 = arith.constant 0 : i32
    %c0_i32_1 = arith.constant 0 : i32
    %c0_i32_2 = arith.constant 0 : i32
    return %c0_i32, %c0_i32_0, %c0_i32_1 : i32, i32, i32
  }
  func.func @transform_2(%arg0: i32) -> (i32, i32, i32) {
    %c0_i32 = arith.constant 0 : i32
    %c0_i32_0 = arith.constant 0 : i32
    %c0_i32_1 = arith.constant 0 : i32
    %c0_i32_2 = arith.constant 0 : i32
    return %c0_i32, %c0_i32_0, %c0_i32_1 : i32, i32, i32
  }
  func.func @transform_3(%arg0: i32) -> (i32, i32, i32) {
    %c0_i32 = arith.constant 0 : i32
    %c0_i32_0 = arith.constant 0 : i32
    %c0_i32_1 = arith.constant 0 : i32
    %c0_i32_2 = arith.constant 0 : i32
    return %c0_i32, %c0_i32_0, %c0_i32_1 : i32, i32, i32
  }
  func.func @transform_4(%arg0: i32) -> (i32, i32, i32, i32) {
    %c0_i32 = arith.constant 0 : i32
    %c0_i32_0 = arith.constant 0 : i32
    %c0_i32_1 = arith.constant 0 : i32
    %c0_i32_2 = arith.constant 0 : i32
    return %arg0, %c0_i32, %c0_i32_0, %c0_i32_1 : i32, i32, i32, i32
  }
}

module attributes {stable_mosaic.version = 11 : i64} {
  func.func @attn_proj_kernel(%arg0: i32, %arg1: memref<2x8x32xf32, #tpu.memory_space<vmem>>, %arg2: memref<2x2x8x32xf32, #tpu.memory_space<vmem>>, %arg3: memref<2x2x32x32xf32, #tpu.memory_space<vmem>>, %arg4: memref<2x1x32xf32, #tpu.memory_space<vmem>>, %arg5: memref<2x32x128xf32, #tpu.memory_space<vmem>>, %arg6: memref<2x1x128xf32, #tpu.memory_space<vmem>>, %arg7: memref<2x2x8x128xf32, #tpu.memory_space<vmem>>) attributes {dimension_semantics = [#tpu.dimension_semantics<parallel>], iteration_bounds = array<i64: 1>, scalar_prefetch = 0 : i64, scratch_operands = 0 : i64, tpu.core_type = #tpu.core_type<tc>, window_params = [{pipeline_mode = #tpu.pipeline_mode<synchronous>, transform_indices = @transform_0, window_bounds = array<i64: 2, 8, 32>}, {transform_indices = @transform_1, window_bounds = array<i64: 2, 2, 8, 32>}, {pipeline_mode = #tpu.pipeline_mode<synchronous>, transform_indices = @transform_2, window_bounds = array<i64: 2, 2, 32, 32>}, {pipeline_mode = #tpu.pipeline_mode<synchronous>, transform_indices = @transform_3, window_bounds = array<i64: 2, 1, 32>}, {pipeline_mode = #tpu.pipeline_mode<synchronous>, transform_indices = @transform_4, window_bounds = array<i64: 2, 32, 128>}, {pipeline_mode = #tpu.pipeline_mode<synchronous>, transform_indices = @transform_5, window_bounds = array<i64: 2, 1, 128>}, {transform_indices = @transform_6, window_bounds = array<i64: 2, 2, 8, 128>}]} {
    %c0 = arith.constant 0 : index
    %c0_0 = arith.constant 0 : index
    %c0_1 = arith.constant 0 : index
    %0 = vector.load %arg1[%c0, %c0_0, %c0_1] : memref<2x8x32xf32, #tpu.memory_space<vmem>>, vector<2x8x32xf32>
    %c0_2 = arith.constant 0 : index
    %c0_3 = arith.constant 0 : index
    %c0_4 = arith.constant 0 : index
    %c0_5 = arith.constant 0 : index
    %1 = vector.load %arg2[%c0_2, %c0_3, %c0_4, %c0_5] : memref<2x2x8x32xf32, #tpu.memory_space<vmem>>, vector<1x2x8x32xf32>
    %2 = vector.shape_cast %1 : vector<1x2x8x32xf32> to vector<2x8x32xf32>
    "tpu.trace_start"() <{level = 10 : i32, message = "bqh,bkh->bqk"}> : () -> ()
    %cst = arith.constant dense<0.000000e+00> : vector<2x8x8xf32>
    %3 = tpu.matmul %2, %0, %cst {dimension_numbers = #tpu.dot_dimension_numbers<[2], [2], [1], [1], [0, 0, 0, 1, 1, 1], [0], [0]>} : vector<2x8x32xf32>, vector<2x8x32xf32>, vector<2x8x8xf32> -> vector<2x8x8xf32>
    "tpu.trace_stop"() : () -> ()
    %cst_6 = arith.constant dense<0xFF800000> : vector<2x8xf32>
    %4 = vector.multi_reduction <maximumf>, %3, %cst_6 [2] : vector<2x8x8xf32> to vector<2x8xf32>
    %5 = vector.shape_cast %4 : vector<2x8xf32> to vector<2x8x1xf32>
    %6 = vector.broadcast %5 : vector<2x8x1xf32> to vector<2x8x8xf32>
    %7 = arith.subf %3, %6 : vector<2x8x8xf32>
    %8 = math.exp %7 : vector<2x8x8xf32>
    %cst_7 = arith.constant dense<0.000000e+00> : vector<2x8xf32>
    %9 = vector.multi_reduction <add>, %8, %cst_7 [2] : vector<2x8x8xf32> to vector<2x8xf32>
    %10 = vector.shape_cast %9 : vector<2x8xf32> to vector<2x8x1xf32>
    %11 = tpu.reciprocal %10 {approx = true} : vector<2x8x1xf32> -> vector<2x8x1xf32>
    %12 = vector.broadcast %11 : vector<2x8x1xf32> to vector<2x8x8xf32>
    %13 = arith.mulf %8, %12 : vector<2x8x8xf32>
    "tpu.trace_start"() <{level = 10 : i32, message = "bqk,bkh->bqh"}> : () -> ()
    %cst_8 = arith.constant dense<0.000000e+00> : vector<2x8x32xf32>
    %14 = tpu.matmul %13, %0, %cst_8 {dimension_numbers = #tpu.dot_dimension_numbers<[2], [1], [1], [2], [0, 0, 0, 1, 1, 2], [0], [0]>} : vector<2x8x8xf32>, vector<2x8x32xf32>, vector<2x8x32xf32> -> vector<2x8x32xf32>
    "tpu.trace_stop"() : () -> ()
    %15 = vector.shape_cast %14 : vector<2x8x32xf32> to vector<16x32xf32>
    %16 = vector.shape_cast %2 : vector<2x8x32xf32> to vector<16x32xf32>
    %c0_9 = arith.constant 0 : index
    %c0_10 = arith.constant 0 : index
    %c0_11 = arith.constant 0 : index
    %c0_12 = arith.constant 0 : index
    %17 = vector.load %arg3[%c0_9, %c0_10, %c0_11, %c0_12] : memref<2x2x32x32xf32, #tpu.memory_space<vmem>>, vector<1x1x32x32xf32>
    %18 = vector.shape_cast %17 : vector<1x1x32x32xf32> to vector<32x32xf32>
    %cst_13 = arith.constant dense<0.000000e+00> : vector<16x32xf32>
    %19 = tpu.matmul %15, %18, %cst_13 {dimension_numbers = #tpu.dot_dimension_numbers<[1], [0], [0], [1], [0, 0, 1, 1], [], []>} : vector<16x32xf32>, vector<32x32xf32>, vector<16x32xf32> -> vector<16x32xf32>
    %c0_14 = arith.constant 0 : index
    %c1 = arith.constant 1 : index
    %c0_15 = arith.constant 0 : index
    %c0_16 = arith.constant 0 : index
    %20 = vector.load %arg3[%c0_14, %c1, %c0_15, %c0_16] : memref<2x2x32x32xf32, #tpu.memory_space<vmem>>, vector<1x1x32x32xf32>
    %21 = vector.shape_cast %20 : vector<1x1x32x32xf32> to vector<32x32xf32>
    %cst_17 = arith.constant dense<0.000000e+00> : vector<16x32xf32>
    %22 = tpu.matmul %16, %21, %cst_17 {dimension_numbers = #tpu.dot_dimension_numbers<[1], [0], [0], [1], [0, 0, 1, 1], [], []>} : vector<16x32xf32>, vector<32x32xf32>, vector<16x32xf32> -> vector<16x32xf32>
    %23 = arith.addf %19, %22 : vector<16x32xf32>
    %c0_18 = arith.constant 0 : index
    %c0_19 = arith.constant 0 : index
    %c0_20 = arith.constant 0 : index
    %24 = vector.load %arg4[%c0_18, %c0_19, %c0_20] : memref<2x1x32xf32, #tpu.memory_space<vmem>>, vector<1x1x32xf32>
    %25 = vector.shape_cast %24 : vector<1x1x32xf32> to vector<1x32xf32>
    %26 = vector.broadcast %25 : vector<1x32xf32> to vector<16x32xf32>
    %27 = arith.addf %23, %26 : vector<16x32xf32>
    %28 = math.tanh %27 : vector<16x32xf32>
    %c0_21 = arith.constant 0 : index
    %c0_22 = arith.constant 0 : index
    %c0_23 = arith.constant 0 : index
    %29 = vector.load %arg5[%c0_21, %c0_22, %c0_23] : memref<2x32x128xf32, #tpu.memory_space<vmem>>, vector<1x32x128xf32>
    %30 = vector.shape_cast %29 : vector<1x32x128xf32> to vector<32x128xf32>
    %cst_24 = arith.constant dense<0.000000e+00> : vector<16x128xf32>
    %31 = tpu.matmul %28, %30, %cst_24 {dimension_numbers = #tpu.dot_dimension_numbers<[1], [0], [0], [1], [0, 0, 1, 1], [], []>} : vector<16x32xf32>, vector<32x128xf32>, vector<16x128xf32> -> vector<16x128xf32>
    %c0_25 = arith.constant 0 : index
    %c0_26 = arith.constant 0 : index
    %c0_27 = arith.constant 0 : index
    %32 = vector.load %arg6[%c0_25, %c0_26, %c0_27] : memref<2x1x128xf32, #tpu.memory_space<vmem>>, vector<1x1x128xf32>
    %33 = vector.shape_cast %32 : vector<1x1x128xf32> to vector<1x128xf32>
    %34 = vector.broadcast %33 : vector<1x128xf32> to vector<16x128xf32>
    %35 = arith.addf %31, %34 : vector<16x128xf32>
    %cst_28 = arith.constant dense<0xFF800000> : vector<16xf32>
    %36 = vector.multi_reduction <maximumf>, %35, %cst_28 [1] : vector<16x128xf32> to vector<16xf32>
    %37 = vector.shape_cast %36 : vector<16xf32> to vector<16x1xf32>
    %38 = vector.broadcast %37 : vector<16x1xf32> to vector<16x128xf32>
    %39 = arith.subf %35, %38 : vector<16x128xf32>
    %40 = math.exp %39 : vector<16x128xf32>
    %cst_29 = arith.constant dense<0.000000e+00> : vector<16xf32>
    %41 = vector.multi_reduction <add>, %40, %cst_29 [1] : vector<16x128xf32> to vector<16xf32>
    %42 = vector.shape_cast %41 : vector<16xf32> to vector<16x1xf32>
    %43 = vector.broadcast %37 : vector<16x1xf32> to vector<16x128xf32>
    %44 = arith.subf %35, %43 : vector<16x128xf32>
    %45 = math.log %42 : vector<16x1xf32>
    %46 = vector.broadcast %45 : vector<16x1xf32> to vector<16x128xf32>
    %47 = arith.subf %44, %46 : vector<16x128xf32>
    %48 = vector.shape_cast %47 : vector<16x128xf32> to vector<2x8x128xf32>
    %c0_30 = arith.constant 0 : index
    %c0_31 = arith.constant 0 : index
    %c0_32 = arith.constant 0 : index
    %c0_33 = arith.constant 0 : index
    %49 = vector.load %arg7[%c0_30, %c0_31, %c0_32, %c0_33] : memref<2x2x8x128xf32, #tpu.memory_space<vmem>>, vector<1x2x8x128xf32>
    %50 = vector.shape_cast %49 : vector<1x2x8x128xf32> to vector<2x8x128xf32>
    %51 = vector.shape_cast %48 : vector<2x8x128xf32> to vector<1x2x8x128xf32>
    tpu.vector_store %arg7[%c0_30, %c0_31, %c0_32, %c0_33], %51 {strides = array<i32>} : memref<2x2x8x128xf32, #tpu.memory_space<vmem>>, vector<1x2x8x128xf32>,
    %c1_34 = arith.constant 1 : index
    %c0_35 = arith.constant 0 : index
    %c0_36 = arith.constant 0 : index
    %c0_37 = arith.constant 0 : index
    %52 = vector.load %arg2[%c1_34, %c0_35, %c0_36, %c0_37] : memref<2x2x8x32xf32, #tpu.memory_space<vmem>>, vector<1x2x8x32xf32>
    %53 = vector.shape_cast %52 : vector<1x2x8x32xf32> to vector<2x8x32xf32>
    "tpu.trace_start"() <{level = 10 : i32, message = "bqh,bkh->bqk"}> : () -> ()
    %cst_38 = arith.constant dense<0.000000e+00> : vector<2x8x8xf32>
    %54 = tpu.matmul %53, %0, %cst_38 {dimension_numbers = #tpu.dot_dimension_numbers<[2], [2], [1], [1], [0, 0, 0, 1, 1, 1], [0], [0]>} : vector<2x8x32xf32>, vector<2x8x32xf32>, vector<2x8x8xf32> -> vector<2x8x8xf32>
    "tpu.trace_stop"() : () -> ()
    %cst_39 = arith.constant dense<0xFF800000> : vector<2x8xf32>
    %55 = vector.multi_reduction <maximumf>, %54, %cst_39 [2] : vector<2x8x8xf32> to vector<2x8xf32>
    %56 = vector.shape_cast %55 : vector<2x8xf32> to vector<2x8x1xf32>
    %57 = vector.broadcast %56 : vector<2x8x1xf32> to vector<2x8x8xf32>
    %58 = arith.subf %54, %57 : vector<2x8x8xf32>
    %59 = math.exp %58 : vector<2x8x8xf32>
    %cst_40 = arith.constant dense<0.000000e+00> : vector<2x8xf32>
    %60 = vector.multi_reduction <add>, %59, %cst_40 [2] : vector<2x8x8xf32> to vector<2x8xf32>
    %61 = vector.shape_cast %60 : vector<2x8xf32> to vector<2x8x1xf32>
    %62 = tpu.reciprocal %61 {approx = true} : vector<2x8x1xf32> -> vector<2x8x1xf32>
    %63 = vector.broadcast %62 : vector<2x8x1xf32> to vector<2x8x8xf32>
    %64 = arith.mulf %59, %63 : vector<2x8x8xf32>
    "tpu.trace_start"() <{level = 10 : i32, message = "bqk,bkh->bqh"}> : () -> ()
    %cst_41 = arith.constant dense<0.000000e+00> : vector<2x8x32xf32>
    %65 = tpu.matmul %64, %0, %cst_41 {dimension_numbers = #tpu.dot_dimension_numbers<[2], [1], [1], [2], [0, 0, 0, 1, 1, 2], [0], [0]>} : vector<2x8x8xf32>, vector<2x8x32xf32>, vector<2x8x32xf32> -> vector<2x8x32xf32>
    "tpu.trace_stop"() : () -> ()
    %66 = vector.shape_cast %65 : vector<2x8x32xf32> to vector<16x32xf32>
    %67 = vector.shape_cast %53 : vector<2x8x32xf32> to vector<16x32xf32>
    %c1_42 = arith.constant 1 : index
    %c0_43 = arith.constant 0 : index
    %c0_44 = arith.constant 0 : index
    %c0_45 = arith.constant 0 : index
    %68 = vector.load %arg3[%c1_42, %c0_43, %c0_44, %c0_45] : memref<2x2x32x32xf32, #tpu.memory_space<vmem>>, vector<1x1x32x32xf32>
    %69 = vector.shape_cast %68 : vector<1x1x32x32xf32> to vector<32x32xf32>
    %cst_46 = arith.constant dense<0.000000e+00> : vector<16x32xf32>
    %70 = tpu.matmul %66, %69, %cst_46 {dimension_numbers = #tpu.dot_dimension_numbers<[1], [0], [0], [1], [0, 0, 1, 1], [], []>} : vector<16x32xf32>, vector<32x32xf32>, vector<16x32xf32> -> vector<16x32xf32>
    %c1_47 = arith.constant 1 : index
    %c1_48 = arith.constant 1 : index
    %c0_49 = arith.constant 0 : index
    %c0_50 = arith.constant 0 : index
    %71 = vector.load %arg3[%c1_47, %c1_48, %c0_49, %c0_50] : memref<2x2x32x32xf32, #tpu.memory_space<vmem>>, vector<1x1x32x32xf32>
    %72 = vector.shape_cast %71 : vector<1x1x32x32xf32> to vector<32x32xf32>
    %cst_51 = arith.constant dense<0.000000e+00> : vector<16x32xf32>
    %73 = tpu.matmul %67, %72, %cst_51 {dimension_numbers = #tpu.dot_dimension_numbers<[1], [0], [0], [1], [0, 0, 1, 1], [], []>} : vector<16x32xf32>, vector<32x32xf32>, vector<16x32xf32> -> vector<16x32xf32>
    %74 = arith.addf %70, %73 : vector<16x32xf32>
    %c1_52 = arith.constant 1 : index
    %c0_53 = arith.constant 0 : index
    %c0_54 = arith.constant 0 : index
    %75 = vector.load %arg4[%c1_52, %c0_53, %c0_54] : memref<2x1x32xf32, #tpu.memory_space<vmem>>, vector<1x1x32xf32>
    %76 = vector.shape_cast %75 : vector<1x1x32xf32> to vector<1x32xf32>
    %77 = vector.broadcast %76 : vector<1x32xf32> to vector<16x32xf32>
    %78 = arith.addf %74, %77 : vector<16x32xf32>
    %79 = math.tanh %78 : vector<16x32xf32>
    %c1_55 = arith.constant 1 : index
    %c0_56 = arith.constant 0 : index
    %c0_57 = arith.constant 0 : index
    %80 = vector.load %arg5[%c1_55, %c0_56, %c0_57] : memref<2x32x128xf32, #tpu.memory_space<vmem>>, vector<1x32x128xf32>
    %81 = vector.shape_cast %80 : vector<1x32x128xf32> to vector<32x128xf32>
    %cst_58 = arith.constant dense<0.000000e+00> : vector<16x128xf32>
    %82 = tpu.matmul %79, %81, %cst_58 {dimension_numbers = #tpu.dot_dimension_numbers<[1], [0], [0], [1], [0, 0, 1, 1], [], []>} : vector<16x32xf32>, vector<32x128xf32>, vector<16x128xf32> -> vector<16x128xf32>
    %c1_59 = arith.constant 1 : index
    %c0_60 = arith.constant 0 : index
    %c0_61 = arith.constant 0 : index
    %83 = vector.load %arg6[%c1_59, %c0_60, %c0_61] : memref<2x1x128xf32, #tpu.memory_space<vmem>>, vector<1x1x128xf32>
    %84 = vector.shape_cast %83 : vector<1x1x128xf32> to vector<1x128xf32>
    %85 = vector.broadcast %84 : vector<1x128xf32> to vector<16x128xf32>
    %86 = arith.addf %82, %85 : vector<16x128xf32>
    %cst_62 = arith.constant dense<0xFF800000> : vector<16xf32>
    %87 = vector.multi_reduction <maximumf>, %86, %cst_62 [1] : vector<16x128xf32> to vector<16xf32>
    %88 = vector.shape_cast %87 : vector<16xf32> to vector<16x1xf32>
    %89 = vector.broadcast %88 : vector<16x1xf32> to vector<16x128xf32>
    %90 = arith.subf %86, %89 : vector<16x128xf32>
    %91 = math.exp %90 : vector<16x128xf32>
    %cst_63 = arith.constant dense<0.000000e+00> : vector<16xf32>
    %92 = vector.multi_reduction <add>, %91, %cst_63 [1] : vector<16x128xf32> to vector<16xf32>
    %93 = vector.shape_cast %92 : vector<16xf32> to vector<16x1xf32>
    %94 = vector.broadcast %88 : vector<16x1xf32> to vector<16x128xf32>
    %95 = arith.subf %86, %94 : vector<16x128xf32>
    %96 = math.log %93 : vector<16x1xf32>
    %97 = vector.broadcast %96 : vector<16x1xf32> to vector<16x128xf32>
    %98 = arith.subf %95, %97 : vector<16x128xf32>
    %99 = vector.shape_cast %98 : vector<16x128xf32> to vector<2x8x128xf32>
    %c1_64 = arith.constant 1 : index
    %c0_65 = arith.constant 0 : index
    %c0_66 = arith.constant 0 : index
    %c0_67 = arith.constant 0 : index
    %100 = vector.load %arg7[%c1_64, %c0_65, %c0_66, %c0_67] : memref<2x2x8x128xf32, #tpu.memory_space<vmem>>, vector<1x2x8x128xf32>
    %101 = vector.shape_cast %100 : vector<1x2x8x128xf32> to vector<2x8x128xf32>
    %102 = vector.shape_cast %99 : vector<2x8x128xf32> to vector<1x2x8x128xf32>
    tpu.vector_store %arg7[%c1_64, %c0_65, %c0_66, %c0_67], %102 {strides = array<i32>} : memref<2x2x8x128xf32, #tpu.memory_space<vmem>>, vector<1x2x8x128xf32>,
    return
  }
  func.func @transform_0(%arg0: i32) -> (i32, i32, i32) {
    %c0_i32 = arith.constant 0 : i32
    %c0_i32_0 = arith.constant 0 : i32
    %c0_i32_1 = arith.constant 0 : i32
    %c0_i32_2 = arith.constant 0 : i32
    return %c0_i32, %c0_i32_0, %c0_i32_1 : i32, i32, i32
  }
  func.func @transform_1(%arg0: i32) -> (i32, i32, i32, i32) {
    %c0_i32 = arith.constant 0 : i32
    %c0_i32_0 = arith.constant 0 : i32
    %c0_i32_1 = arith.constant 0 : i32
    %c0_i32_2 = arith.constant 0 : i32
    return %c0_i32, %c0_i32_0, %arg0, %c0_i32_1 : i32, i32, i32, i32
  }
  func.func @transform_2(%arg0: i32) -> (i32, i32, i32, i32) {
    %c0_i32 = arith.constant 0 : i32
    %c0_i32_0 = arith.constant 0 : i32
    %c0_i32_1 = arith.constant 0 : i32
    %c0_i32_2 = arith.constant 0 : i32
    %c0_i32_3 = arith.constant 0 : i32
    return %c0_i32, %c0_i32_0, %c0_i32_1, %c0_i32_2 : i32, i32, i32, i32
  }
  func.func @transform_3(%arg0: i32) -> (i32, i32, i32) {
    %c0_i32 = arith.constant 0 : i32
    %c0_i32_0 = arith.constant 0 : i32
    %c0_i32_1 = arith.constant 0 : i32
    %c0_i32_2 = arith.constant 0 : i32
    return %c0_i32, %c0_i32_0, %c0_i32_1 : i32, i32, i32
  }
  func.func @transform_4(%arg0: i32) -> (i32, i32, i32) {
    %c0_i32 = arith.constant 0 : i32
    %c0_i32_0 = arith.constant 0 : i32
    %c0_i32_1 = arith.constant 0 : i32
    %c0_i32_2 = arith.constant 0 : i32
    return %c0_i32, %c0_i32_0, %c0_i32_1 : i32, i32, i32
  }
  func.func @transform_5(%arg0: i32) -> (i32, i32, i32) {
    %c0_i32 = arith.constant 0 : i32
    %c0_i32_0 = arith.constant 0 : i32
    %c0_i32_1 = arith.constant 0 : i32
    %c0_i32_2 = arith.constant 0 : i32
    return %c0_i32, %c0_i32_0, %c0_i32_1 : i32, i32, i32
  }
  func.func @transform_6(%arg0: i32) -> (i32, i32, i32, i32) {
    %c0_i32 = arith.constant 0 : i32
    %c0_i32_0 = arith.constant 0 : i32
    %c0_i32_1 = arith.constant 0 : i32
    %c0_i32_2 = arith.constant 0 : i32
    return %c0_i32, %c0_i32_0, %arg0, %c0_i32_1 : i32, i32, i32, i32
  }
}

</mosaic_0001>

<bundles_post_ra>
// kernel: double_seq2seq_forward.3
= control target key start
LH: loop header
LB: loop body
LE: loop exit
PB: predicated region body
PF: predicated region fallthrough
CT: control target
= control target key end

     0   :  { %vm22_vm0 = vcmask 254976   ;;  %vm34_vm1 = vcmask 261120   ;;  %s676_s25 = smov 64   ;;  %s678_s28 = smov 32   ;;  %s830_s2 = inlined_call_operand.vmem [shape: f32[1,32,96], index: 2, kind: input, shape index: {}]   ;;  %s831_s1 = inlined_call_operand.vmem [shape: f32[1,2,32], index: 1, kind: input, shape index: {}]   ;;  %s832_s3 = inlined_call_operand.vmem [shape: f32[1,1,96], index: 3, kind: input, shape index: {}]   ;;  %s833_s0 = inlined_call_operand.vmem [shape: f32[8,1,2,96], index: 0, kind: input, shape index: {}]   ;;  %s834_s4 = inlined_call_operand.vmem [shape: f32[8,1,2,32], index: 4, kind: output, shape index: {}]  }
   0x1   :  { %v27_v0 = vld [vmem:[%s830_s2 + $0x18] sm:$0xff]  ;;  %v26_v1 = vld [vmem:[%s830_s2 + $0x10] sm:$0xff]  ;;  %v21_v2 = vld [vmem:[%s831_s1] sm:$0x3] }
   0x2   :  { %50 = vmatpush.msra.mxu0 %v27_v0  ;;  %122 = vmatpush.msra.mxu1 %v27_v0  ;;  %v25_v3 = vld [vmem:[%s830_s2 + $0x8] sm:$0xff]  ;;  %23 = vst.msk [vmem:[#allocation2] sm:$0x3] %vm22_vm0, %v21_v2  ;;  %v24_v4 = vld [vmem:[%s830_s2] sm:$0xff] }
   0x3   :  { %191 = vmatpush.msra.mxu2 %v27_v0  ;;  %260 = vmatpush.msra.mxu3 %v27_v0  ;;  %v724_v6 = vld [vmem:[%s832_s3] ss:$0 sm:$0xff]  ;;  %s677_s3 = smov 96   ;;  %v596_v38 = vld [vmem:[%s833_s0 + $0x2] sm:$0x3] }
   0x4   :  { %51 = vmatpush.msra.mxu0 %v26_v1  ;;  %123 = vmatpush.msra.mxu1 %v26_v1  ;;  %v33_v9 = vld [vmem:[%s833_s0] sm:$0x3]  ;;  %v600_v2 = vld [vmem:[%s833_s0 + $0x4] sm:$0x3] }
   0x5   :  { %192 = vmatpush.msra.mxu2 %v26_v1  ;;  %261 = vmatpush.msra.mxu3 %v26_v1 }
   0x6   :  { %52 = vmatpush.msra.mxu0 %v25_v3  ;;  %124 = vmatpush.msra.mxu1 %v25_v3 }
   0x7   :  { %193 = vmatpush.msra.mxu2 %v25_v3  ;;  %262 = vmatpush.msra.mxu3 %v25_v3 }
   0x8   :  { %53 = vmatpush.msra.mxu0 %v24_v4  ;;  %125 = vmatpush.msra.mxu1 %v24_v4 }
   0x9   :  { %194 = vmatpush.msra.mxu2 %v24_v4  ;;  %263 = vmatpush.msra.mxu3 %v24_v4  ;;  %v32_v5 = vld [vmem:[#allocation2] sm:$0x3] }
   0xa   :  { %329 = vmatpush.msrb.mxu0 %v27_v0  ;;  %398 = vmatpush.msrb.mxu1 %v27_v0 }
   0xb   :  { %594 = vmatmul.msk.f32.vlgmr.msra.gmra.mxu0 %vm34_vm1, %v32_v5  ;;  %467 = vmatpush.msrb.mxu2 %v27_v0 }
   0xc   :  { %330 = vmatpush.msrb.mxu0 %v26_v1  ;;  %399 = vmatpush.msrb.mxu1 %v26_v1 }
   0xd   :  { %468 = vmatpush.msrb.mxu2 %v26_v1  ;;  %536 = vmatpush.msrb.mxu3 %v27_v0 }
   0xe   :  { %331 = vmatpush.msrb.mxu0 %v25_v3  ;;  %400 = vmatpush.msrb.mxu1 %v25_v3 }
   0xf   :  { %469 = vmatpush.msrb.mxu2 %v25_v3  ;;  %537 = vmatpush.msrb.mxu3 %v26_v1 }
  0x10   :  { %332 = vmatpush.msrb.mxu0 %v24_v4  ;;  %401 = vmatpush.msrb.mxu1 %v24_v4 }
  0x11   :  { %470 = vmatpush.msrb.mxu2 %v24_v4  ;;  %538 = vmatpush.msrb.mxu3 %v25_v3 }
  0x13   :  { %539 = vmatpush.msrb.mxu3 %v24_v4 }
  0x88   :  { %v55_v7 = vpop.f32.mrf.mxu0 }
  0x89   :  { %v56_v8 = vadd.f32 %v724_v6, %v55_v7 }
  0x8b   :  { %79 = vrot.lane.b32.xlu0 %v56_v8, %s676_s25  ;;  %v58_v10 = vadd.f32 %v56_v8, %v33_v9 }
  0x8d   :  { %v595_v11 = vmul.f32 -1.442695, %v58_v10 }
  0x8f   :  { %628 = vpow2.f32 %v595_v11 }
  0x95   :  { %v629_v12 = vpop.eup %628 }
  0x96   :  { %v62_v13 = vadd.f32 1.0, %v629_v12 }
  0x98   :  { %630 = vrcp.f32 %v62_v13  ;;  %v74_v19 = vand.u32 2147483648, %v62_v13  ;;  %vm68_vm3 = vweird.f32 %v62_v13  ;;  %v72_v20 = vand.u32 2147483647, %v62_v13 }
  0x9a   :  { %v75_v22 = vor.u32 1.1754944e-38, %v74_v19  ;;  %vm73_vm5 = vcmp.eq.f32.partialorder %v72_v20, 8.507059e+37 }
  0x9e   :  { %v631_v14 = vpop.eup %630 }
  0x9f   :  { %v64_v15 = vmul.f32 %v631_v14, %v62_v13  ;;  %vm69_vm2 = vweird.f32 %v631_v14 }
  0xa0   :  { %vm70_vm4 = vmor %vm68_vm3, %vm69_vm2 }
  0xa1   :  { %v65_v16 = vsub.f32 1.0, %v64_v15 }
  0xa3   :  { %v66_v17 = vmul.f32 %v631_v14, %v65_v16 }
  0xa5   :  { %v67_v18 = vadd.f32 %v631_v14, %v66_v17 }
  0xa7   :  { %v71_v21 = vsel %vm70_vm4, %v631_v14, %v67_v18 }
  0xa8   :  { %v76_v24 = vsel %vm73_vm5, %v75_v22, %v71_v21 }
  0xa9   :  { %v89_v30 = vsub.f32 1.0, %v76_v24 }
  0xfd   :  { %v80_v23 = vpop.permute.xlu0 %79 }
  0xfe   :  { %v82_v25 = vmul.f32 %v80_v23, %v76_v24 }
 0x100   :  { %84 = vrot.lane.b32.xlu0 %v82_v25, %s676_s25 }
 0x172   :  { %v85_v26 = vpop.permute.xlu0 %84 }
 0x173   :  { %v87_v27 = vadd.f32 %v85_v26, %v33_v9 }
 0x175   :  { %632 = vtanh.f32 %v87_v27 }
 0x17b   :  { %v633_v28 = vpop.eup %632 }
 0x17c   :  { %91 = vrot.lane.b32.xlu1 %v633_v28, %s677_s3 }
 0x184   :  { %95 = vrot.lane.b32.xlu1 %v32_v5, %s678_s28 }
 0x1ee   :  { %v92_v29 = vpop.permute.xlu1 %91 }
 0x1ef   :  { %v94_v32 = vmul.f32 %v92_v29, %v89_v30 }
 0x1f6   :  { %v96_v31 = vpop.permute.xlu1 %95 }
 0x1f7   :  { %v98_v33 = vmul.f32 %v96_v31, %v76_v24  ;;  %v604_v31 = vld [vmem:[%s833_s0 + $0x6] sm:$0x3] }
 0x1f9   :  { %v99_v34 = vadd.f32 %v98_v33, %v94_v32 }
 0x1fb   :  { %101 = vrot.lane.b32.xlu2 %v99_v34, %s677_s3 }
 0x255   :  { %v102_v35 = vpop.permute.xlu2 %101 }
 0x256   :  { %105 = vst.msk [vmem:[%s834_s4] sm:$0x3] %vm22_vm0, %v102_v35  ;;  %597 = vmatmul.msk.f32.vlgmr.msra.gmra.mxu1 %vm34_vm1, %v102_v35 }
 0x2d3   :  { %v127_v36 = vpop.f32.mrf.mxu1 }
 0x2d4   :  { %v128_v37 = vadd.f32 %v724_v6, %v127_v36 }
 0x2d6   :  { %151 = vrot.lane.b32.xlu2 %v128_v37, %s676_s25  ;;  %v130_v39 = vadd.f32 %v596_v38, %v128_v37 }
 0x2d8   :  { %v598_v40 = vmul.f32 -1.442695, %v130_v39 }
 0x2da   :  { %634 = vpow2.f32 %v598_v40 }
 0x2e0   :  { %v635_v41 = vpop.eup %634 }
 0x2e1   :  { %v134_v42 = vadd.f32 1.0, %v635_v41 }
 0x2e3   :  { %636 = vrcp.f32 %v134_v42  ;;  %v146_v48 = vand.u32 2147483648, %v134_v42  ;;  %vm140_vm7 = vweird.f32 %v134_v42  ;;  %v144_v49 = vand.u32 2147483647, %v134_v42 }
 0x2e5   :  { %v147_v51 = vor.u32 1.1754944e-38, %v146_v48  ;;  %vm145_vm9 = vcmp.eq.f32.partialorder %v144_v49, 8.507059e+37 }
 0x2e9   :  { %v637_v43 = vpop.eup %636 }
 0x2ea   :  { %v136_v44 = vmul.f32 %v637_v43, %v134_v42  ;;  %vm141_vm6 = vweird.f32 %v637_v43 }
 0x2eb   :  { %vm142_vm8 = vmor %vm140_vm7, %vm141_vm6 }
 0x2ec   :  { %v137_v45 = vsub.f32 1.0, %v136_v44 }
 0x2ee   :  { %v138_v46 = vmul.f32 %v637_v43, %v137_v45 }
 0x2f0   :  { %v139_v47 = vadd.f32 %v637_v43, %v138_v46 }
 0x2f2   :  { %v143_v50 = vsel %vm142_vm8, %v637_v43, %v139_v47 }
 0x2f3   :  { %v148_v53 = vsel %vm145_vm9, %v147_v51, %v143_v50 }
 0x2f4   :  { %v161_v58 = vsub.f32 1.0, %v148_v53  ;;  %v167_v60 = vmul.f32 %v148_v53, %v99_v34 }
 0x330   :  { %v152_v52 = vpop.permute.xlu2 %151 }
 0x331   :  { %v154_v54 = vmul.f32 %v152_v52, %v148_v53 }
 0x333   :  { %156 = vrot.lane.b32.xlu0 %v154_v54, %s676_s25 }
 0x3a5   :  { %v157_v55 = vpop.permute.xlu0 %156 }
 0x3a6   :  { %v159_v56 = vadd.f32 %v596_v38, %v157_v55 }
 0x3a8   :  { %638 = vtanh.f32 %v159_v56 }
 0x3ae   :  { %v639_v57 = vpop.eup %638 }
 0x3af   :  { %163 = vrot.lane.b32.xlu1 %v639_v57, %s677_s3 }
 0x421   :  { %v164_v59 = vpop.permute.xlu1 %163 }
 0x422   :  { %v166_v61 = vmul.f32 %v164_v59, %v161_v58  ;;  %v608_v59 = vld [vmem:[%s833_s0 + $0x8] sm:$0x3] }
 0x424   :  { %v168_v62 = vadd.f32 %v167_v60, %v166_v61 }
 0x426   :  { %170 = vrot.lane.b32.xlu2 %v168_v62, %s677_s3 }
 0x480   :  { %v171_v63 = vpop.permute.xlu2 %170 }
 0x481   :  { %599 = vst.msk [vmem:[%s834_s4 + $0x2] sm:$0x3] %vm22_vm0, %v171_v63  ;;  %601 = vmatmul.msk.f32.vlgmr.msra.gmra.mxu2 %vm34_vm1, %v171_v63 }
 0x504   :  { %v196_v0 = vpop.f32.mrf.mxu2 }
 0x505   :  { %v197_v1 = vadd.f32 %v724_v6, %v196_v0 }
 0x507   :  { %220 = vrot.lane.b32.xlu0 %v197_v1, %s676_s25  ;;  %v199_v3 = vadd.f32 %v600_v2, %v197_v1 }
 0x509   :  { %v602_v4 = vmul.f32 -1.442695, %v199_v3 }
 0x50b   :  { %640 = vpow2.f32 %v602_v4 }
 0x511   :  { %v641_v5 = vpop.eup %640 }
 0x512   :  { %v203_v7 = vadd.f32 1.0, %v641_v5 }
 0x514   :  { %642 = vrcp.f32 %v203_v7  ;;  %v215_v13 = vand.u32 2147483648, %v203_v7  ;;  %vm209_vm11 = vweird.f32 %v203_v7  ;;  %v213_v14 = vand.u32 2147483647, %v203_v7 }
 0x516   :  { %v216_v16 = vor.u32 1.1754944e-38, %v215_v13  ;;  %vm214_vm13 = vcmp.eq.f32.partialorder %v213_v14, 8.507059e+37 }
 0x51a   :  { %v643_v8 = vpop.eup %642 }
 0x51b   :  { %v205_v9 = vmul.f32 %v643_v8, %v203_v7  ;;  %vm210_vm10 = vweird.f32 %v643_v8 }
 0x51c   :  { %vm211_vm12 = vmor %vm209_vm11, %vm210_vm10 }
 0x51d   :  { %v206_v10 = vsub.f32 1.0, %v205_v9 }
 0x51f   :  { %v207_v11 = vmul.f32 %v643_v8, %v206_v10 }
 0x521   :  { %v208_v12 = vadd.f32 %v643_v8, %v207_v11 }
 0x523   :  { %v212_v15 = vsel %vm211_vm12, %v643_v8, %v208_v12 }
 0x524   :  { %v217_v18 = vsel %vm214_vm13, %v216_v16, %v212_v15 }
 0x525   :  { %v230_v23 = vsub.f32 1.0, %v217_v18  ;;  %v236_v25 = vmul.f32 %v217_v18, %v168_v62 }
 0x579   :  { %v221_v17 = vpop.permute.xlu0 %220 }
 0x57a   :  { %v223_v19 = vmul.f32 %v221_v17, %v217_v18 }
 0x57c   :  { %225 = vrot.lane.b32.xlu1 %v223_v19, %s676_s25 }
 0x5ee   :  { %v226_v20 = vpop.permute.xlu1 %225 }
 0x5ef   :  { %v228_v21 = vadd.f32 %v600_v2, %v226_v20 }
 0x5f1   :  { %644 = vtanh.f32 %v228_v21 }
 0x5f7   :  { %v645_v22 = vpop.eup %644 }
 0x5f8   :  { %232 = vrot.lane.b32.xlu2 %v645_v22, %s677_s3 }
 0x652   :  { %v233_v24 = vpop.permute.xlu2 %232 }
 0x653   :  { %v235_v26 = vmul.f32 %v233_v24, %v230_v23  ;;  %v612_v24 = vld [vmem:[%s833_s0 + $0xa] sm:$0x3] }
 0x655   :  { %v237_v27 = vadd.f32 %v236_v25, %v235_v26 }
 0x657   :  { %239 = vrot.lane.b32.xlu0 %v237_v27, %s677_s3 }
 0x6c9   :  { %v240_v28 = vpop.permute.xlu0 %239 }
 0x6ca   :  { %603 = vst.msk [vmem:[%s834_s4 + $0x4] sm:$0x3] %vm22_vm0, %v240_v28  ;;  %605 = vmatmul.msk.f32.vlgmr.msra.gmra.mxu3 %vm34_vm1, %v240_v28 }
 0x74d   :  { %v265_v29 = vpop.f32.mrf.mxu3 }
 0x74e   :  { %v266_v30 = vadd.f32 %v724_v6, %v265_v29 }
 0x750   :  { %289 = vrot.lane.b32.xlu1 %v266_v30, %s676_s25  ;;  %v268_v32 = vadd.f32 %v604_v31, %v266_v30 }
 0x752   :  { %v606_v33 = vmul.f32 -1.442695, %v268_v32 }
 0x754   :  { %646 = vpow2.f32 %v606_v33 }
 0x75a   :  { %v647_v34 = vpop.eup %646 }
 0x75b   :  { %v272_v35 = vadd.f32 1.0, %v647_v34 }
 0x75d   :  { %648 = vrcp.f32 %v272_v35  ;;  %v284_v41 = vand.u32 2147483648, %v272_v35  ;;  %vm278_vm15 = vweird.f32 %v272_v35  ;;  %v282_v42 = vand.u32 2147483647, %v272_v35 }
 0x75f   :  { %v285_v44 = vor.u32 1.1754944e-38, %v284_v41  ;;  %vm283_vm3 = vcmp.eq.f32.partialorder %v282_v42, 8.507059e+37 }
 0x763   :  { %v649_v36 = vpop.eup %648 }
 0x764   :  { %v274_v37 = vmul.f32 %v649_v36, %v272_v35  ;;  %vm279_vm14 = vweird.f32 %v649_v36 }
 0x765   :  { %vm280_vm2 = vmor %vm278_vm15, %vm279_vm14 }
 0x766   :  { %v275_v38 = vsub.f32 1.0, %v274_v37 }
 0x768   :  { %v276_v39 = vmul.f32 %v649_v36, %v275_v38 }
 0x76a   :  { %v277_v40 = vadd.f32 %v649_v36, %v276_v39 }
 0x76c   :  { %v281_v43 = vsel %vm280_vm2, %v649_v36, %v277_v40 }
 0x76d   :  { %v286_v46 = vsel %vm283_vm3, %v285_v44, %v281_v43 }
 0x76e   :  { %v299_v51 = vsub.f32 1.0, %v286_v46  ;;  %v305_v53 = vmul.f32 %v286_v46, %v237_v27 }
 0x7c2   :  { %v290_v45 = vpop.permute.xlu1 %289 }
 0x7c3   :  { %v292_v47 = vmul.f32 %v290_v45, %v286_v46 }
 0x7c5   :  { %294 = vrot.lane.b32.xlu2 %v292_v47, %s676_s25 }
 0x81f   :  { %v295_v48 = vpop.permute.xlu2 %294 }
 0x820   :  { %v297_v49 = vadd.f32 %v604_v31, %v295_v48 }
 0x822   :  { %650 = vtanh.f32 %v297_v49 }
 0x828   :  { %v651_v50 = vpop.eup %650 }
 0x829   :  { %301 = vrot.lane.b32.xlu0 %v651_v50, %s677_s3 }
 0x89b   :  { %v302_v52 = vpop.permute.xlu0 %301 }
 0x89c   :  { %v304_v54 = vmul.f32 %v302_v52, %v299_v51  ;;  %v616_v52 = vld [vmem:[%s833_s0 + $0xc] sm:$0x3] }
 0x89e   :  { %v306_v55 = vadd.f32 %v305_v53, %v304_v54 }
 0x8a0   :  { %308 = vrot.lane.b32.xlu1 %v306_v55, %s677_s3 }
 0x912   :  { %v309_v56 = vpop.permute.xlu1 %308 }
 0x913   :  { %607 = vst.msk [vmem:[%s834_s4 + $0x6] sm:$0x3] %vm22_vm0, %v309_v56  ;;  %609 = vmatmul.msk.f32.vlgmr.msrb.gmra.mxu0 %vm34_vm1, %v309_v56 }
 0x990   :  { %v334_v57 = vpop.f32.mrf.mxu0 }
 0x991   :  { %v335_v58 = vadd.f32 %v724_v6, %v334_v57 }
 0x993   :  { %358 = vrot.lane.b32.xlu2 %v335_v58, %s676_s25  ;;  %v337_v60 = vadd.f32 %v608_v59, %v335_v58 }
 0x995   :  { %v610_v61 = vmul.f32 -1.442695, %v337_v60 }
 0x997   :  { %652 = vpow2.f32 %v610_v61 }
 0x99d   :  { %v653_v62 = vpop.eup %652 }
 0x99e   :  { %v341_v63 = vadd.f32 1.0, %v653_v62 }
 0x9a0   :  { %654 = vrcp.f32 %v341_v63  ;;  %v353_v5 = vand.u32 2147483648, %v341_v63  ;;  %vm347_vm5 = vweird.f32 %v341_v63  ;;  %v351_v7 = vand.u32 2147483647, %v341_v63 }
 0x9a2   :  { %v354_v9 = vor.u32 1.1754944e-38, %v353_v5  ;;  %vm352_vm7 = vcmp.eq.f32.partialorder %v351_v7, 8.507059e+37 }
 0x9a6   :  { %v655_v0 = vpop.eup %654 }
 0x9a7   :  { %v343_v1 = vmul.f32 %v655_v0, %v341_v63  ;;  %vm348_vm4 = vweird.f32 %v655_v0 }
 0x9a8   :  { %vm349_vm6 = vmor %vm347_vm5, %vm348_vm4 }
 0x9a9   :  { %v344_v2 = vsub.f32 1.0, %v343_v1 }
 0x9ab   :  { %v345_v3 = vmul.f32 %v655_v0, %v344_v2 }
 0x9ad   :  { %v346_v4 = vadd.f32 %v655_v0, %v345_v3 }
 0x9af   :  { %v350_v8 = vsel %vm349_vm6, %v655_v0, %v346_v4 }
 0x9b0   :  { %v355_v11 = vsel %vm352_vm7, %v354_v9, %v350_v8 }
 0x9b1   :  { %v368_v16 = vsub.f32 1.0, %v355_v11  ;;  %v374_v18 = vmul.f32 %v355_v11, %v306_v55 }
 0x9ed   :  { %v359_v10 = vpop.permute.xlu2 %358 }
 0x9ee   :  { %v361_v12 = vmul.f32 %v359_v10, %v355_v11 }
 0x9f0   :  { %363 = vrot.lane.b32.xlu0 %v361_v12, %s676_s25 }
 0xa62   :  { %v364_v13 = vpop.permute.xlu0 %363 }
 0xa63   :  { %v366_v14 = vadd.f32 %v608_v59, %v364_v13 }
 0xa65   :  { %656 = vtanh.f32 %v366_v14 }
 0xa6b   :  { %v657_v15 = vpop.eup %656 }
 0xa6c   :  { %370 = vrot.lane.b32.xlu1 %v657_v15, %s677_s3 }
 0xade   :  { %v371_v17 = vpop.permute.xlu1 %370 }
 0xadf   :  { %v373_v19 = vmul.f32 %v371_v17, %v368_v16  ;;  %v620_v17 = vld [vmem:[%s833_s0 + $0xe] sm:$0x3] }
 0xae1   :  { %v375_v20 = vadd.f32 %v374_v18, %v373_v19 }
 0xae3   :  { %377 = vrot.lane.b32.xlu2 %v375_v20, %s677_s3 }
 0xb3d   :  { %v378_v21 = vpop.permute.xlu2 %377 }
 0xb3e   :  { %611 = vst.msk [vmem:[%s834_s4 + $0x8] sm:$0x3] %vm22_vm0, %v378_v21  ;;  %613 = vmatmul.msk.f32.vlgmr.msrb.gmra.mxu1 %vm34_vm1, %v378_v21 }
 0xbbb   :  { %v403_v22 = vpop.f32.mrf.mxu1 }
 0xbbc   :  { %v404_v23 = vadd.f32 %v724_v6, %v403_v22 }
 0xbbe   :  { %427 = vrot.lane.b32.xlu0 %v404_v23, %s676_s25  ;;  %v406_v25 = vadd.f32 %v612_v24, %v404_v23 }
 0xbc0   :  { %v614_v26 = vmul.f32 -1.442695, %v406_v25 }
 0xbc2   :  { %658 = vpow2.f32 %v614_v26 }
 0xbc8   :  { %v659_v27 = vpop.eup %658 }
 0xbc9   :  { %v410_v28 = vadd.f32 1.0, %v659_v27 }
 0xbcb   :  { %660 = vrcp.f32 %v410_v28  ;;  %v422_v34 = vand.u32 2147483648, %v410_v28  ;;  %vm416_vm9 = vweird.f32 %v410_v28  ;;  %v420_v35 = vand.u32 2147483647, %v410_v28 }
 0xbcd   :  { %v423_v37 = vor.u32 1.1754944e-38, %v422_v34  ;;  %vm421_vm11 = vcmp.eq.f32.partialorder %v420_v35, 8.507059e+37 }
 0xbd1   :  { %v661_v29 = vpop.eup %660 }
 0xbd2   :  { %v412_v30 = vmul.f32 %v661_v29, %v410_v28  ;;  %vm417_vm8 = vweird.f32 %v661_v29 }
 0xbd3   :  { %vm418_vm10 = vmor %vm416_vm9, %vm417_vm8 }
 0xbd4   :  { %v413_v31 = vsub.f32 1.0, %v412_v30 }
 0xbd6   :  { %v414_v32 = vmul.f32 %v661_v29, %v413_v31 }
 0xbd8   :  { %v415_v33 = vadd.f32 %v661_v29, %v414_v32 }
 0xbda   :  { %v419_v36 = vsel %vm418_vm10, %v661_v29, %v415_v33 }
 0xbdb   :  { %v424_v39 = vsel %vm421_vm11, %v423_v37, %v419_v36 }
 0xbdc   :  { %v437_v44 = vsub.f32 1.0, %v424_v39  ;;  %v443_v46 = vmul.f32 %v424_v39, %v375_v20 }
 0xc30   :  { %v428_v38 = vpop.permute.xlu0 %427 }
 0xc31   :  { %v430_v40 = vmul.f32 %v428_v38, %v424_v39 }
 0xc33   :  { %432 = vrot.lane.b32.xlu1 %v430_v40, %s676_s25 }
 0xca5   :  { %v433_v41 = vpop.permute.xlu1 %432 }
 0xca6   :  { %v435_v42 = vadd.f32 %v612_v24, %v433_v41 }
 0xca8   :  { %662 = vtanh.f32 %v435_v42 }
 0xcae   :  { %v663_v43 = vpop.eup %662 }
 0xcaf   :  { %439 = vrot.lane.b32.xlu2 %v663_v43, %s677_s3 }
 0xd09   :  { %v440_v45 = vpop.permute.xlu2 %439 }
 0xd0a   :  { %v442_v47 = vmul.f32 %v440_v45, %v437_v44 }
 0xd0c   :  { %v444_v48 = vadd.f32 %v443_v46, %v442_v47 }
 0xd0e   :  { %446 = vrot.lane.b32.xlu0 %v444_v48, %s677_s3 }
 0xd80   :  { %v447_v49 = vpop.permute.xlu0 %446 }
 0xd81   :  { %615 = vst.msk [vmem:[%s834_s4 + $0xa] sm:$0x3] %vm22_vm0, %v447_v49  ;;  %617 = vmatmul.msk.f32.vlgmr.msrb.gmra.mxu2 %vm34_vm1, %v447_v49 }
 0xe04   :  { %v472_v50 = vpop.f32.mrf.mxu2 }
 0xe05   :  { %v473_v51 = vadd.f32 %v724_v6, %v472_v50 }
 0xe07   :  { %496 = vrot.lane.b32.xlu1 %v473_v51, %s676_s25  ;;  %v475_v53 = vadd.f32 %v616_v52, %v473_v51 }
 0xe09   :  { %v618_v54 = vmul.f32 -1.442695, %v475_v53 }
 0xe0b   :  { %664 = vpow2.f32 %v618_v54 }
 0xe11   :  { %v665_v55 = vpop.eup %664 }
 0xe12   :  { %v479_v56 = vadd.f32 1.0, %v665_v55 }
 0xe14   :  { %666 = vrcp.f32 %v479_v56  ;;  %v491_v62 = vand.u32 2147483648, %v479_v56  ;;  %vm485_vm13 = vweird.f32 %v479_v56  ;;  %v489_v63 = vand.u32 2147483647, %v479_v56 }
 0xe16   :  { %v492_v1 = vor.u32 1.1754944e-38, %v491_v62  ;;  %vm490_vm15 = vcmp.eq.f32.partialorder %v489_v63, 8.507059e+37 }
 0xe1a   :  { %v667_v57 = vpop.eup %666 }
 0xe1b   :  { %v481_v58 = vmul.f32 %v667_v57, %v479_v56  ;;  %vm486_vm12 = vweird.f32 %v667_v57 }
 0xe1c   :  { %vm487_vm14 = vmor %vm485_vm13, %vm486_vm12 }
 0xe1d   :  { %v482_v59 = vsub.f32 1.0, %v481_v58 }
 0xe1f   :  { %v483_v60 = vmul.f32 %v667_v57, %v482_v59 }
 0xe21   :  { %v484_v61 = vadd.f32 %v667_v57, %v483_v60 }
 0xe23   :  { %v488_v0 = vsel %vm487_vm14, %v667_v57, %v484_v61 }
 0xe24   :  { %v493_v3 = vsel %vm490_vm15, %v492_v1, %v488_v0 }
 0xe25   :  { %v506_v9 = vsub.f32 1.0, %v493_v3  ;;  %v512_v11 = vmul.f32 %v493_v3, %v444_v48 }
 0xe79   :  { %v497_v2 = vpop.permute.xlu1 %496 }
 0xe7a   :  { %v499_v4 = vmul.f32 %v497_v2, %v493_v3 }
 0xe7c   :  { %501 = vrot.lane.b32.xlu2 %v499_v4, %s676_s25 }
 0xed6   :  { %v502_v5 = vpop.permute.xlu2 %501 }
 0xed7   :  { %v504_v7 = vadd.f32 %v616_v52, %v502_v5 }
 0xed9   :  { %668 = vtanh.f32 %v504_v7 }
 0xedf   :  { %v669_v8 = vpop.eup %668 }
 0xee0   :  { %508 = vrot.lane.b32.xlu0 %v669_v8, %s677_s3 }
 0xf52   :  { %v509_v10 = vpop.permute.xlu0 %508 }
 0xf53   :  { %v511_v12 = vmul.f32 %v509_v10, %v506_v9 }
 0xf55   :  { %v513_v13 = vadd.f32 %v512_v11, %v511_v12 }
 0xf57   :  { %515 = vrot.lane.b32.xlu1 %v513_v13, %s677_s3 }
 0xfc9   :  { %v516_v14 = vpop.permute.xlu1 %515 }
 0xfca   :  { %619 = vst.msk [vmem:[%s834_s4 + $0xc] sm:$0x3] %vm22_vm0, %v516_v14  ;;  %621 = vmatmul.msk.f32.vlgmr.msrb.gmra.mxu3 %vm34_vm1, %v516_v14 }
0x104d   :  { %v541_v15 = vpop.f32.mrf.mxu3 }
0x104e   :  { %v542_v16 = vadd.f32 %v724_v6, %v541_v15 }
0x1050   :  { %565 = vrot.lane.b32.xlu2 %v542_v16, %s676_s25  ;;  %v544_v18 = vadd.f32 %v620_v17, %v542_v16 }
0x1052   :  { %v622_v19 = vmul.f32 -1.442695, %v544_v18 }
0x1054   :  { %670 = vpow2.f32 %v622_v19 }
0x105a   :  { %v671_v20 = vpop.eup %670 }
0x105b   :  { %v548_v21 = vadd.f32 1.0, %v671_v20 }
0x105d   :  { %672 = vrcp.f32 %v548_v21  ;;  %v560_v27 = vand.u32 2147483648, %v548_v21  ;;  %vm554_vm2 = vweird.f32 %v548_v21  ;;  %v558_v6 = vand.u32 2147483647, %v548_v21 }
0x105f   :  { %v561_v29 = vor.u32 1.1754944e-38, %v560_v27  ;;  %vm559_vm4 = vcmp.eq.f32.partialorder %v558_v6, 8.507059e+37 }
0x1063   :  { %v673_v22 = vpop.eup %672 }
0x1064   :  { %v550_v23 = vmul.f32 %v673_v22, %v548_v21  ;;  %vm555_vm1 = vweird.f32 %v673_v22 }
0x1065   :  { %vm556_vm3 = vmor %vm554_vm2, %vm555_vm1 }
0x1066   :  { %v551_v24 = vsub.f32 1.0, %v550_v23 }
0x1068   :  { %v552_v25 = vmul.f32 %v673_v22, %v551_v24 }
0x106a   :  { %v553_v26 = vadd.f32 %v673_v22, %v552_v25 }
0x106c   :  { %v557_v28 = vsel %vm556_vm3, %v673_v22, %v553_v26 }
0x106d   :  { %v562_v31 = vsel %vm559_vm4, %v561_v29, %v557_v28 }
0x106e   :  { %v575_v36 = vsub.f32 1.0, %v562_v31  ;;  %v581_v38 = vmul.f32 %v562_v31, %v513_v13 }
0x10aa   :  { %v566_v30 = vpop.permute.xlu2 %565 }
0x10ab   :  { %v568_v32 = vmul.f32 %v566_v30, %v562_v31 }
0x10ad   :  { %570 = vrot.lane.b32.xlu0 %v568_v32, %s676_s25 }
0x111f   :  { %v571_v33 = vpop.permute.xlu0 %570 }
0x1120   :  { %v573_v34 = vadd.f32 %v620_v17, %v571_v33 }
0x1122   :  { %674 = vtanh.f32 %v573_v34 }
0x1128   :  { %v675_v35 = vpop.eup %674 }
0x1129   :  { %577 = vrot.lane.b32.xlu1 %v675_v35, %s677_s3 }
0x119b   :  { %v578_v37 = vpop.permute.xlu1 %577 }
0x119c   :  { %v580_v39 = vmul.f32 %v578_v37, %v575_v36 }
0x119e   :  { %v582_v40 = vadd.f32 %v581_v38, %v580_v39 }
0x11a0   :  { %584 = vrot.lane.b32.xlu2 %v582_v40, %s677_s3 }
0x11fa   :  { %v585_v41 = vpop.permute.xlu2 %584 }
0x11fb   :  { %623 = vst.msk [vmem:[%s834_s4 + $0xe] sm:$0x3] %vm22_vm0, %v585_v41 }
0x11fc   :  { %589 = vst.msk [vmem:[#allocation2] sm:$0x3] %vm22_vm0, %v585_v41 }

// kernel: double_seq2seq_forward.5
= control target key start
LH: loop header
LB: loop body
LE: loop exit
PB: predicated region body
PF: predicated region fallthrough
CT: control target
= control target key end

     0   :  { %vm27_vm0 = vcmask 261120   ;;  %vm80_vm1 = vcmask 64512   ;;  %s834_s0 = inlined_call_operand.vmem [shape: f32[2,8,32], index: 0, kind: input, shape index: {}]   ;;  %s835_s1 = inlined_call_operand.vmem [shape: f32[2,2,8,32], index: 1, kind: input, shape index: {}]   ;;  %s836_s2 = inlined_call_operand.vmem [shape: f32[2,2,32,32], index: 2, kind: input, shape index: {}]   ;;  %s837_s3 = inlined_call_operand.vmem [shape: f32[2,1,32], index: 3, kind: input, shape index: {}]   ;;  %s838_s5 = inlined_call_operand.vmem [shape: f32[2,1,128], index: 5, kind: input, shape index: {}]   ;;  %s839_s4 = inlined_call_operand.vmem [shape: f32[2,32,128], index: 4, kind: input, shape index: {}]   ;;  %s840_s6 = inlined_call_operand.vmem [shape: f32[2,2,8,128], index: 6, kind: output, shape index: {}]  }
   0x1   :  { %v663_v0 = vld [vmem:[%s834_s0] sm:$0xff]  ;;  %v668_v1 = vld [vmem:[%s834_s0 + $0x8] sm:$0xff]  ;;  %v697_v4 = vld [vmem:[%s835_s1 + $0x10] sm:$0xff] }
   0x2   :  { %531 = vmatpush.xpose.msk.msra.mxu0 %vm27_vm0, %v663_v0  ;;  %533 = vmatpush.xpose.msk.msra.mxu1 %vm27_vm0, %v668_v1  ;;  %v677_v2 = vld [vmem:[%s835_s1] sm:$0xff]  ;;  %v682_v3 = vld [vmem:[%s835_s1 + $0x8] sm:$0xff]  ;;  %v704_v5 = vld [vmem:[%s835_s1 + $0x18] sm:$0xff] }
   0x3   :  { %121 = vmatpush.msra.mxu2 %v663_v0  ;;  %144 = vmatpush.msra.mxu3 %v668_v1  ;;  %v540_v34 = vld [vmem:[%s836_s2 + $0x38] sm:$0xff]  ;;  %v539_v35 = vld [vmem:[%s836_s2 + $0x30] sm:$0xff]  ;;  %v538_v36 = vld [vmem:[%s836_s2 + $0x28] sm:$0xff] }
   0x4   :  { %v537_v37 = vld [vmem:[%s836_s2 + $0x20] sm:$0xff]  ;;  %v152_v45 = vld [vmem:[%s836_s2 + $0x18] sm:$0xff]  ;;  %v151_v46 = vld [vmem:[%s836_s2 + $0x10] sm:$0xff] }
   0x5   :  { %532 = vmatmul.msk.f32.vlgmr.msra.gmra.mxu0 %vm27_vm0, %v677_v2  ;;  %534 = vmatmul.msk.f32.vlgmr.msra.gmra.mxu1 %vm27_vm0, %v682_v3  ;;  %v150_v48 = vld [vmem:[%s836_s2 + $0x8] sm:$0xff]  ;;  %v149_v49 = vld [vmem:[%s836_s2] sm:$0xff]  ;;  %v558_v51 = vld [vmem:[%s836_s2 + $0x58] sm:$0xff] }
   0x6   :  { %549 = vmatpush.xpose.msk.msrb.mxu1 %vm27_vm0, %v663_v0  ;;  %170 = vmatpush.msrb.mxu2 %v540_v34  ;;  %v557_v52 = vld [vmem:[%s836_s2 + $0x50] sm:$0xff]  ;;  %v556_v53 = vld [vmem:[%s836_s2 + $0x48] sm:$0xff]  ;;  %v555_v54 = vld [vmem:[%s836_s2 + $0x40] sm:$0xff] }
   0x7   :  { %577 = vmatpush.msrb.mxu3 %v540_v34  ;;  %v221_v62 = vld [vmem:[%s839_s4 + $0x18] sm:$0xff]  ;;  %v220_v63 = vld [vmem:[%s839_s4 + $0x10] sm:$0xff] }
   0x8   :  { %171 = vmatpush.msrb.mxu2 %v539_v35  ;;  %244 = vmatpush.msrb.mxu0 %v221_v62 }
   0x9   :  { %578 = vmatpush.msrb.mxu3 %v539_v35 }
   0xa   :  { %551 = vmatpush.xpose.msk.msra.mxu1 %vm27_vm0, %v668_v1  ;;  %172 = vmatpush.msrb.mxu2 %v538_v36 }
   0xb   :  { %579 = vmatpush.msrb.mxu3 %v538_v36  ;;  %245 = vmatpush.msrb.mxu0 %v220_v63 }
   0xc   :  { %173 = vmatpush.msrb.mxu2 %v537_v37 }
   0xd   :  { %550 = vmatmul.msk.f32.vlgmr.msrb.gmra.mxu1 %vm27_vm0, %v697_v4  ;;  %580 = vmatpush.msrb.mxu3 %v537_v37 }
   0xe   :  { %445 = vmatpush.msrb.mxu1 %v558_v51 }
  0x10   :  { %446 = vmatpush.msrb.mxu1 %v557_v52 }
  0x12   :  { %447 = vmatpush.msrb.mxu1 %v556_v53 }
  0x14   :  { %448 = vmatpush.msrb.mxu1 %v555_v54 }
  0x15   :  { %552 = vmatmul.msk.f32.vlgmr.msra.gmra.mxu1 %vm27_vm0, %v704_v5 }
  0x82   :  { %v51_v6 = vpop.f32.mrf.mxu0  ;;  %v77_v7 = vpop.f32.mrf.mxu1 }
  0x83   :  { %v81_v8 = vsel %vm80_vm1, %v51_v6, -inf  ;;  %v84_v9 = vsel %vm80_vm1, %v77_v7, -inf }
  0x84   :  { %82 = vmax.xlane.f32.xlu0 %v81_v8 }
  0x8a   :  { %v300_v10 = vpop.f32.mrf.mxu1 }
  0x8b   :  { %v326_v11 = vsel %vm80_vm1, %v300_v10, -inf }
  0x8c   :  { %327 = vmax.xlane.f32.xlu2 %v326_v11  ;;  %85 = vmax.xlane.f32.xlu0 %v84_v9  ;;  %v581_v9 = vld [vmem:[%s837_s3] ss:$0 sm:$0xff] }
  0x92   :  { %v323_v12 = vpop.f32.mrf.mxu1 }
  0x93   :  { %v329_v13 = vsel %vm80_vm1, %v323_v12, -inf }
  0x94   :  { %330 = vmax.xlane.f32.xlu2 %v329_v13 }
  0xf7   :  { %v83_v14 = vpop.xlane.xlu0 %82 }
  0xf8   :  { %v87_v15 = vsub.f32 %v51_v6, %v83_v14  ;;  %v560_v6 = vld [vmem:[%s836_s2 + $0x68] sm:$0xff] }
  0xfa   :  { %v89_v16 = vmul.f32 1.442695, %v87_v15 }
  0xfc   :  { %585 = vpow2.f32 %v89_v16 }
  0xff   :  { %v328_v17 = vpop.xlane.xlu2 %327  ;;  %v86_v18 = vpop.xlane.xlu0 %85 }
 0x100   :  { %v332_v19 = vsub.f32 %v300_v10, %v328_v17  ;;  %v88_v20 = vsub.f32 %v77_v7, %v86_v18  ;;  %v559_v7 = vld [vmem:[%s836_s2 + $0x60] sm:$0xff] }
 0x102   :  { %v586_v21 = vpop.eup %585  ;;  %v334_v22 = vmul.f32 1.442695, %v332_v19  ;;  %v91_v23 = vmul.f32 1.442695, %v88_v20  ;;  %v571_v19 = vld [vmem:[%s839_s4 + $0x38] sm:$0xff]  ;;  %v570_v20 = vld [vmem:[%s839_s4 + $0x30] sm:$0xff] }
 0x103   :  { %v93_v24 = vsel %vm80_vm1, %v586_v21, 0.0 }
 0x104   :  { %587 = vpow2.f32 %v334_v22  ;;  %94 = vadd.xlane.f32.xlu1 %v93_v24 }
 0x105   :  { %589 = vpow2.f32 %v91_v23 }
 0x107   :  { %v331_v25 = vpop.xlane.xlu2 %330 }
 0x108   :  { %v333_v26 = vsub.f32 %v323_v12, %v331_v25 }
 0x10a   :  { %v588_v27 = vpop.eup %587  ;;  %v336_v28 = vmul.f32 1.442695, %v333_v26  ;;  %v583_v26 = vld [vmem:[%s837_s3 + $0x1] ss:$0 sm:$0xff] }
 0x10b   :  { %v590_v29 = vpop.eup %589  ;;  %v338_v30 = vsel %vm80_vm1, %v588_v27, 0.0 }
 0x10c   :  { %591 = vpow2.f32 %v336_v28  ;;  %339 = vadd.xlane.f32.xlu0 %v338_v30  ;;  %v96_v31 = vsel %vm80_vm1, %v590_v29, 0.0 }
 0x10d   :  { %97 = vadd.xlane.f32.xlu1 %v96_v31 }
 0x112   :  { %v592_v32 = vpop.eup %591 }
 0x113   :  { %v341_v33 = vsel %vm80_vm1, %v592_v32, 0.0 }
 0x115   :  { %342 = vadd.xlane.f32.xlu1 %v341_v33 }
 0x177   :  { %v95_v38 = vpop.xlane.xlu1 %94 }
 0x178   :  { %593 = vrcp.f32 %v95_v38 }
 0x17e   :  { %v594_v39 = vpop.eup %593 }
 0x17f   :  { %v101_v40 = vmul.f32 %v594_v39, %v586_v21  ;;  %v340_v42 = vpop.xlane.xlu0 %339  ;;  %v569_v21 = vld [vmem:[%s839_s4 + $0x28] sm:$0xff] }
 0x180   :  { %v98_v41 = vpop.xlane.xlu1 %97 }
 0x181   :  { %595 = vrcp.f32 %v98_v41  ;;  %535 = vmatmul.msk.f32.vlgmr.msra.gmra.mxu2 %vm80_vm1, %v101_v40 }
 0x182   :  { %366 = vmatpush.msra.mxu2 %v663_v0  ;;  %597 = vrcp.f32 %v340_v42  ;;  %v219_v0 = vld [vmem:[%s839_s4 + $0x8] sm:$0xff] }
 0x183   :  { %246 = vmatpush.msrb.mxu0 %v219_v0 }
 0x187   :  { %v596_v43 = vpop.eup %595 }
 0x188   :  { %v102_v44 = vmul.f32 %v596_v43, %v590_v29  ;;  %v598_v47 = vpop.eup %597  ;;  %v343_v56 = vpop.xlane.xlu1 %342  ;;  %v584_v43 = vld [vmem:[%s838_s5 + $0x1] ss:$0 sm:$0xff] }
 0x189   :  { %541 = vmatmul.msk.f32.vlgmr.msrb.gmra.mxu2 %vm27_vm0, %v677_v2  ;;  %v346_v50 = vmul.f32 %v598_v47, %v588_v27  ;;  %599 = vrcp.f32 %v343_v56  ;;  %v562_v2 = vld [vmem:[%s836_s2 + $0x78] sm:$0xff] }
 0x18a   :  { %536 = vmatmul.msk.f32.vlgmr.msra.gmra.mxu3 %vm80_vm1, %v102_v44  ;;  %493 = vmatpush.msrb.mxu2 %v571_v19 }
 0x18b   :  { %199 = vmatpush.msra.mxu3 %v152_v45 }
 0x18c   :  { %494 = vmatpush.msrb.mxu2 %v570_v20 }
 0x18d   :  { %200 = vmatpush.msra.mxu3 %v151_v46 }
 0x18e   :  { %495 = vmatpush.msrb.mxu2 %v569_v21 }
 0x18f   :  { %201 = vmatpush.msra.mxu3 %v150_v48  ;;  %v600_v59 = vpop.eup %599 }
 0x190   :  { %v347_v60 = vmul.f32 %v600_v59, %v592_v32 }
 0x191   :  { %553 = vmatmul.msk.f32.vlgmr.msra.gmra.mxu2 %vm80_vm1, %v346_v50  ;;  %202 = vmatpush.msra.mxu3 %v149_v49 }
 0x192   :  { %542 = vmatmul.msk.f32.vlgmr.msrb.gmra.mxu3 %vm27_vm0, %v682_v3  ;;  %v561_v3 = vld [vmem:[%s836_s2 + $0x70] sm:$0xff] }
 0x193   :  { %389 = vmatpush.msrb.mxu3 %v668_v1  ;;  %v218_v1 = vld [vmem:[%s839_s4] sm:$0xff] }
 0x194   :  { %247 = vmatpush.msrb.mxu0 %v218_v1 }
 0x196   :  { %416 = vmatpush.msra.mxu0 %v562_v2 }
 0x198   :  { %417 = vmatpush.msra.mxu0 %v561_v3 }
 0x19a   :  { %418 = vmatpush.msra.mxu0 %v560_v6 }
 0x19c   :  { %419 = vmatpush.msra.mxu0 %v559_v7 }
 0x204   :  { %v123_v55 = vpop.f32.mrf.mxu2 }
 0x205   :  { %543 = vmatmul.msk.f32.vlgmr.msra.gmra.mxu3 %vm27_vm0, %v123_v55 }
 0x20c   :  { %v175_v57 = vpop.f32.mrf.mxu2 }
 0x20d   :  { %v146_v58 = vpop.f32.mrf.mxu3 }
 0x20e   :  { %544 = vmatmul.msk.f32.gmra.mxu3 %vm27_vm0, %v146_v58 }
 0x214   :  { %v368_v61 = vpop.f32.mrf.mxu2 }
 0x215   :  { %565 = vmatmul.msk.f32.vlgmr.msrb.gmra.mxu1 %vm27_vm0, %v368_v61  ;;  %v178_v8 = vpop.f32.mrf.mxu3 }
 0x216   :  { %554 = vmatmul.msk.f32.vlgmr.msrb.gmra.mxu3 %vm80_vm1, %v347_v60 }
 0x288   :  { %v204_v10 = vpop.f32.mrf.mxu3 }
 0x289   :  { %v205_v11 = vadd.f32 %v204_v10, %v175_v57 }
 0x28b   :  { %v214_v12 = vadd.f32 %v581_v9, %v205_v11 }
 0x28d   :  { %601 = vtanh.f32 %v214_v12 }
 0x291   :  { %v207_v13 = vpop.f32.mrf.mxu3 }
 0x292   :  { %v208_v14 = vadd.f32 %v207_v13, %v178_v8  ;;  %v450_v27 = vpop.f32.mrf.mxu1 }
 0x293   :  { %v602_v15 = vpop.eup %601 }
 0x294   :  { %v215_v16 = vadd.f32 %v581_v9, %v208_v14  ;;  %545 = vmatmul.msk.f32.vlgmr.msrb.gmra.mxu0 %vm27_vm0, %v602_v15 }
 0x296   :  { %603 = vtanh.f32 %v215_v16 }
 0x299   :  { %v391_v17 = vpop.f32.mrf.mxu3 }
 0x29a   :  { %566 = vmatmul.msk.f32.gmra.mxu1 %vm27_vm0, %v391_v17 }
 0x29c   :  { %v604_v18 = vpop.eup %603 }
 0x29d   :  { %546 = vmatmul.msk.f32.gmra.mxu0 %vm27_vm0, %v604_v18 }
 0x2a5   :  { %563 = vmatmul.msk.f32.vlgmr.msra.gmra.mxu0 %vm27_vm0, %v697_v4  ;;  %v568_v4 = vld [vmem:[%s839_s4 + $0x20] sm:$0xff] }
 0x2a6   :  { %496 = vmatpush.msrb.mxu2 %v568_v4 }
 0x2ad   :  { %564 = vmatmul.msk.f32.gmra.mxu0 %vm27_vm0, %v704_v5  ;;  %v582_v5 = vld [vmem:[%s838_s5] ss:$0 sm:$0xff] }
 0x311   :  { %v249_v22 = vpop.f32.mrf.mxu0 }
 0x312   :  { %v250_v23 = vadd.f32 %v582_v5, %v249_v22 }
 0x314   :  { %255 = vmax.xlane.f32.xlu2 %v250_v23 }
 0x317   :  { %v453_v31 = vpop.f32.mrf.mxu1 }
 0x31a   :  { %v252_v24 = vpop.f32.mrf.mxu0 }
 0x31b   :  { %v253_v25 = vadd.f32 %v582_v5, %v252_v24 }
 0x31d   :  { %257 = vmax.xlane.f32.xlu0 %v253_v25 }
 0x322   :  { %v421_v28 = vpop.f32.mrf.mxu0 }
 0x323   :  { %v451_v29 = vadd.f32 %v450_v27, %v421_v28 }
 0x325   :  { %v461_v30 = vadd.f32 %v583_v26, %v451_v29 }
 0x327   :  { %605 = vtanh.f32 %v461_v30 }
 0x32a   :  { %v424_v32 = vpop.f32.mrf.mxu0 }
 0x32b   :  { %v454_v33 = vadd.f32 %v453_v31, %v424_v32 }
 0x32d   :  { %v606_v34 = vpop.eup %605  ;;  %v462_v35 = vadd.f32 %v583_v26, %v454_v33 }
 0x32e   :  { %573 = vmatmul.msk.f32.vlgmr.msrb.gmra.mxu2 %vm27_vm0, %v606_v34 }
 0x32f   :  { %607 = vtanh.f32 %v462_v35 }
 0x335   :  { %v608_v36 = vpop.eup %607 }
 0x336   :  { %574 = vmatmul.msk.f32.gmra.mxu2 %vm27_vm0, %v608_v36 }
 0x387   :  { %v256_v37 = vpop.xlane.xlu2 %255 }
 0x388   :  { %v259_v38 = vsub.f32 %v250_v23, %v256_v37 }
 0x38a   :  { %v261_v39 = vmul.f32 1.442695, %v259_v38 }
 0x38c   :  { %609 = vpow2.f32 %v261_v39 }
 0x390   :  { %v258_v41 = vpop.xlane.xlu0 %257 }
 0x391   :  { %v260_v42 = vsub.f32 %v253_v25, %v258_v41 }
 0x392   :  { %v610_v40 = vpop.eup %609 }
 0x393   :  { %265 = vadd.xlane.f32.xlu0 %v610_v40  ;;  %v263_v44 = vmul.f32 1.442695, %v260_v42 }
 0x395   :  { %611 = vpow2.f32 %v263_v44 }
 0x39b   :  { %v612_v49 = vpop.eup %611 }
 0x3b1   :  { %v498_v45 = vpop.f32.mrf.mxu2 }
 0x3b2   :  { %v499_v46 = vadd.f32 %v584_v43, %v498_v45 }
 0x3b4   :  { %504 = vmax.xlane.f32.xlu1 %v499_v46 }
 0x3b9   :  { %v501_v47 = vpop.f32.mrf.mxu2 }
 0x3ba   :  { %v502_v48 = vadd.f32 %v584_v43, %v501_v47 }
 0x3bc   :  { %506 = vmax.xlane.f32.xlu2 %v502_v48  ;;  %267 = vadd.xlane.f32.xlu1 %v612_v49 }
 0x406   :  { %v266_v50 = vpop.xlane.xlu0 %265 }
 0x407   :  { %613 = vlog2.f32 %v266_v50 }
 0x40d   :  { %v614_v51 = vpop.eup %613 }
 0x40e   :  { %v270_v52 = vmul.f32 0.6931472, %v614_v51 }
 0x410   :  { %v273_v53 = vsub.f32 %v259_v38, %v270_v52 }
 0x412   :  { %275 = vst [vmem:[%s840_s6] sm:$0xff] %v273_v53 }
 0x427   :  { %v505_v54 = vpop.xlane.xlu1 %504 }
 0x428   :  { %v508_v55 = vsub.f32 %v499_v46, %v505_v54 }
 0x42a   :  { %v510_v56 = vmul.f32 1.442695, %v508_v55 }
 0x42c   :  { %615 = vpow2.f32 %v510_v56 }
 0x42f   :  { %v507_v57 = vpop.xlane.xlu2 %506  ;;  %v268_v58 = vpop.xlane.xlu1 %267 }
 0x430   :  { %v509_v59 = vsub.f32 %v502_v48, %v507_v57  ;;  %617 = vlog2.f32 %v268_v58 }
 0x432   :  { %v616_v60 = vpop.eup %615  ;;  %v512_v61 = vmul.f32 1.442695, %v509_v59 }
 0x433   :  { %514 = vadd.xlane.f32.xlu2 %v616_v60 }
 0x434   :  { %619 = vpow2.f32 %v512_v61 }
 0x436   :  { %v618_v62 = vpop.eup %617 }
 0x437   :  { %v272_v63 = vmul.f32 0.6931472, %v618_v62 }
 0x439   :  { %v274_v0 = vsub.f32 %v260_v42, %v272_v63 }
 0x43a   :  { %v620_v1 = vpop.eup %619 }
 0x43b   :  { %276 = vst [vmem:[%s840_s6 + $0x8] sm:$0xff] %v274_v0  ;;  %516 = vadd.xlane.f32.xlu0 %v620_v1 }
 0x4a6   :  { %v515_v2 = vpop.xlane.xlu2 %514 }
 0x4a7   :  { %621 = vlog2.f32 %v515_v2 }
 0x4ad   :  { %v622_v3 = vpop.eup %621 }
 0x4ae   :  { %v519_v6 = vmul.f32 0.6931472, %v622_v3  ;;  %v517_v7 = vpop.xlane.xlu0 %516 }
 0x4af   :  { %623 = vlog2.f32 %v517_v7 }
 0x4b0   :  { %v522_v8 = vsub.f32 %v508_v55, %v519_v6 }
 0x4b2   :  { %575 = vst [vmem:[%s840_s6 + $0x10] sm:$0xff] %v522_v8 }
 0x4b5   :  { %v624_v9 = vpop.eup %623 }
 0x4b6   :  { %v521_v10 = vmul.f32 0.6931472, %v624_v9 }
 0x4b8   :  { %v523_v11 = vsub.f32 %v509_v59, %v521_v10 }
 0x4ba   :  { %576 = vst [vmem:[%s840_s6 + $0x18] sm:$0xff] %v523_v11 }

// kernel: double_seq2seq_forward.4
= control target key start
LH: loop header
LB: loop body
LE: loop exit
PB: predicated region body
PF: predicated region fallthrough
CT: control target
= control target key end

     0   :  { %vm23_vm0 = vcmask 254976   ;;  %vm46_vm1 = vcmask 261120   ;;  %s1309_s9 = smov 64   ;;  %s1310_s12 = smov 32   ;;  %s1741_s2 = inlined_call_operand.vmem [shape: f32[2,32,96], index: 2, kind: input, shape index: {}]   ;;  %s1742_s1 = inlined_call_operand.vmem [shape: f32[2,2,32], index: 1, kind: input, shape index: {}]   ;;  %s1743_s3 = inlined_call_operand.vmem [shape: f32[2,1,96], index: 3, kind: input, shape index: {}]   ;;  %s1744_s0 = inlined_call_operand.vmem [shape: f32[8,2,2,96], index: 0, kind: input, shape index: {}]   ;;  %s1745_s4 = inlined_call_operand.vmem [shape: f32[8,2,2,32], index: 4, kind: output, shape index: {}]  }
   0x1   :  { %v1340_v0 = vld [vmem:[%s1741_s2 + $0x18] sm:$0xff]  ;;  %v1350_v2 = vld [vmem:[%s1741_s2 + $0x10] sm:$0xff]  ;;  %v1362_v4 = vld [vmem:[%s1741_s2 + $0x8] sm:$0xff]  ;;  %s1311_s17 = smov 96  }
   0x2   :  { %v1345_v1 = vld [vmem:[%s1741_s2 + $0x38] sm:$0xff]  ;;  %62 = vmatpush.msra.mxu0 %v1340_v0  ;;  %v1357_v3 = vld [vmem:[%s1741_s2 + $0x30] sm:$0xff]  ;;  %v1367_v5 = vld [vmem:[%s1741_s2 + $0x28] sm:$0xff]  ;;  %205 = vmatpush.msra.mxu2 %v1340_v0 }
   0x3   :  { %85 = vmatpush.msra.mxu1 %v1345_v1  ;;  %v21_v6 = vld [vmem:[%s1742_s1] sm:$0x3]  ;;  %227 = vmatpush.msra.mxu3 %v1345_v1  ;;  %v22_v7 = vld [vmem:[%s1742_s1 + $0x2] sm:$0x3] }
   0x4   :  { %63 = vmatpush.msra.mxu0 %v1350_v2  ;;  %24 = vst.msk [vmem:[#allocation2] sm:$0x3] %vm23_vm0, %v21_v6  ;;  %v1383_v8 = vld [vmem:[%s1741_s2] sm:$0xff]  ;;  %206 = vmatpush.msra.mxu2 %v1350_v2 }
   0x5   :  { %86 = vmatpush.msra.mxu1 %v1357_v3  ;;  %v1388_v9 = vld [vmem:[%s1741_s2 + $0x20] sm:$0xff]  ;;  %25 = vst.msk [vmem:[#allocation2 + $0x2] sm:$0x3] %vm23_vm0, %v22_v7  ;;  %228 = vmatpush.msra.mxu3 %v1357_v3 }
   0x6   :  { %64 = vmatpush.msra.mxu0 %v1362_v4  ;;  %207 = vmatpush.msra.mxu2 %v1362_v4  ;;  %v1433_v12 = vld [vmem:[%s1743_s3] ss:$0 sm:$0xff]  ;;  %v1440_v15 = vld [vmem:[%s1743_s3 + $0x1] ss:$0 sm:$0xff]  ;;  %v45_v21 = vld [vmem:[%s1744_s0 + $0x2] sm:$0x3] }
   0x7   :  { %87 = vmatpush.msra.mxu1 %v1367_v5  ;;  %229 = vmatpush.msra.mxu3 %v1367_v5  ;;  %v44_v18 = vld [vmem:[%s1744_s0] sm:$0x3] }
   0x8   :  { %65 = vmatpush.msra.mxu0 %v1383_v8  ;;  %208 = vmatpush.msra.mxu2 %v1383_v8 }
   0x9   :  { %88 = vmatpush.msra.mxu1 %v1388_v9  ;;  %230 = vmatpush.msra.mxu3 %v1388_v9 }
   0xa   :  { %341 = vmatpush.msrb.mxu0 %v1340_v0  ;;  %477 = vmatpush.msrb.mxu2 %v1340_v0 }
   0xb   :  { %363 = vmatpush.msrb.mxu1 %v1345_v1  ;;  %v42_v10 = vld [vmem:[#allocation2] sm:$0x3]  ;;  %499 = vmatpush.msrb.mxu3 %v1345_v1 }
   0xc   :  { %1146 = vmatmul.msk.f32.vlgmr.msra.gmra.mxu0 %vm46_vm1, %v42_v10  ;;  %v1406_v11 = vld [vmem:[#allocation2 + $0x2] sm:$0x3]  ;;  %478 = vmatpush.msrb.mxu2 %v1350_v2 }
   0xd   :  { %364 = vmatpush.msrb.mxu1 %v1357_v3  ;;  %342 = vmatpush.msrb.mxu0 %v1350_v2 }
   0xe   :  { %1147 = vmatmul.msk.f32.vlgmr.msra.gmra.mxu1 %vm46_vm1, %v1406_v11  ;;  %500 = vmatpush.msrb.mxu3 %v1357_v3 }
   0xf   :  { %365 = vmatpush.msrb.mxu1 %v1367_v5  ;;  %343 = vmatpush.msrb.mxu0 %v1362_v4 }
  0x10   :  { %479 = vmatpush.msrb.mxu2 %v1362_v4  ;;  %501 = vmatpush.msrb.mxu3 %v1367_v5 }
  0x11   :  { %366 = vmatpush.msrb.mxu1 %v1388_v9  ;;  %344 = vmatpush.msrb.mxu0 %v1383_v8 }
  0x12   :  { %480 = vmatpush.msrb.mxu2 %v1383_v8  ;;  %502 = vmatpush.msrb.mxu3 %v1388_v9 }
  0x13   :  { %613 = vmatpush.msra.mxu0 %v1340_v0  ;;  %635 = vmatpush.msra.mxu1 %v1345_v1 }
  0x15   :  { %614 = vmatpush.msra.mxu0 %v1350_v2  ;;  %636 = vmatpush.msra.mxu1 %v1357_v3 }
  0x17   :  { %615 = vmatpush.msra.mxu0 %v1362_v4  ;;  %637 = vmatpush.msra.mxu1 %v1367_v5 }
  0x19   :  { %616 = vmatpush.msra.mxu0 %v1383_v8  ;;  %638 = vmatpush.msra.mxu1 %v1388_v9 }
  0x89   :  { %v67_v13 = vpop.f32.mrf.mxu0 }
  0x8a   :  { %v68_v14 = vadd.f32 %v1433_v12, %v67_v13 }
  0x8b   :  { %v90_v16 = vpop.f32.mrf.mxu1 }
  0x8c   :  { %135 = vrot.lane.b32.xlu0 %v68_v14, %s1309_s9  ;;  %v91_v17 = vadd.f32 %v1440_v15, %v90_v16  ;;  %v93_v19 = vadd.f32 %v68_v14, %v44_v18 }
  0x8e   :  { %v1148_v20 = vmul.f32 -1.442695, %v93_v19  ;;  %v94_v22 = vadd.f32 %v91_v17, %v45_v21 }
  0x90   :  { %1211 = vpow2.f32 %v1148_v20  ;;  %v1149_v23 = vmul.f32 -1.442695, %v94_v22  ;;  %v1150_v22 = vld [vmem:[%s1744_s0 + $0x4] sm:$0x3] }
  0x92   :  { %1213 = vpow2.f32 %v1149_v23 }
  0x94   :  { %137 = vrot.lane.b32.xlu0 %v91_v17, %s1309_s9 }
  0x96   :  { %v1212_v24 = vpop.eup %1211 }
  0x97   :  { %v101_v25 = vadd.f32 1.0, %v1212_v24 }
  0x98   :  { %v1214_v26 = vpop.eup %1213 }
  0x99   :  { %1215 = vrcp.f32 %v101_v25  ;;  %v102_v27 = vadd.f32 1.0, %v1214_v26  ;;  %v114_v36 = vand.u32 2147483648, %v101_v25  ;;  %vm108_vm3 = vweird.f32 %v101_v25 }
  0x9a   :  { %v112_v37 = vand.u32 2147483647, %v101_v25 }
  0x9b   :  { %1217 = vrcp.f32 %v102_v27  ;;  %v115_v40 = vor.u32 1.1754944e-38, %v114_v36  ;;  %vm123_vm6 = vweird.f32 %v102_v27  ;;  %v129_v45 = vand.u32 2147483648, %v102_v27 }
  0x9c   :  { %167 = vrot.lane.b32.xlu0 %v42_v10, %s1310_s12  ;;  %vm113_vm5 = vcmp.eq.f32.partialorder %v112_v37, 8.507059e+37  ;;  %v127_v46 = vand.u32 2147483647, %v102_v27 }
  0x9d   :  { %v130_v48 = vor.u32 1.1754944e-38, %v129_v45 }
  0x9e   :  { %vm128_vm9 = vcmp.eq.f32.partialorder %v127_v46, 8.507059e+37 }
  0x9f   :  { %v1216_v28 = vpop.eup %1215 }
  0xa0   :  { %v104_v29 = vmul.f32 %v1216_v28, %v101_v25  ;;  %vm109_vm2 = vweird.f32 %v1216_v28  ;;  %v1151_v25 = vld [vmem:[%s1744_s0 + $0x6] sm:$0x3] }
  0xa1   :  { %v1218_v31 = vpop.eup %1217  ;;  %vm110_vm4 = vmor %vm108_vm3, %vm109_vm2 }
  0xa2   :  { %v105_v30 = vsub.f32 1.0, %v104_v29  ;;  %v119_v33 = vmul.f32 %v1218_v31, %v102_v27  ;;  %vm124_vm7 = vweird.f32 %v1218_v31 }
  0xa3   :  { %vm125_vm8 = vmor %vm123_vm6, %vm124_vm7 }
  0xa4   :  { %v106_v32 = vmul.f32 %v1216_v28, %v105_v30  ;;  %v120_v35 = vsub.f32 1.0, %v119_v33 }
  0xa6   :  { %v107_v34 = vadd.f32 %v1216_v28, %v106_v32  ;;  %v121_v39 = vmul.f32 %v1218_v31, %v120_v35 }
  0xa8   :  { %v111_v38 = vsel %vm110_vm4, %v1216_v28, %v107_v34  ;;  %v122_v44 = vadd.f32 %v1218_v31, %v121_v39 }
  0xa9   :  { %v116_v42 = vsel %vm113_vm5, %v115_v40, %v111_v38 }
  0xaa   :  { %v126_v47 = vsel %vm125_vm8, %v1218_v31, %v122_v44  ;;  %v155_v59 = vsub.f32 1.0, %v116_v42 }
  0xab   :  { %v131_v50 = vsel %vm128_vm9, %v130_v48, %v126_v47 }
  0xac   :  { %v156_v7 = vsub.f32 1.0, %v131_v50 }
  0xfe   :  { %v136_v41 = vpop.permute.xlu0 %135 }
  0xff   :  { %v141_v43 = vmul.f32 %v136_v41, %v116_v42 }
 0x101   :  { %145 = vrot.lane.b32.xlu1 %v141_v43, %s1309_s9 }
 0x106   :  { %v138_v49 = vpop.permute.xlu0 %137 }
 0x107   :  { %v142_v51 = vmul.f32 %v138_v49, %v131_v50 }
 0x109   :  { %147 = vrot.lane.b32.xlu1 %v142_v51, %s1309_s9 }
 0x10e   :  { %v168_v58 = vpop.permute.xlu0 %167 }
 0x10f   :  { %v173_v61 = vmul.f32 %v168_v58, %v116_v42 }
 0x111   :  { %169 = vrot.lane.b32.xlu1 %v1406_v11, %s1310_s12 }
 0x173   :  { %v146_v52 = vpop.permute.xlu1 %145 }
 0x174   :  { %v151_v53 = vadd.f32 %v146_v52, %v44_v18 }
 0x176   :  { %1219 = vtanh.f32 %v151_v53 }
 0x17b   :  { %v148_v54 = vpop.permute.xlu1 %147 }
 0x17c   :  { %v1220_v55 = vpop.eup %1219  ;;  %v152_v56 = vadd.f32 %v148_v54, %v45_v21 }
 0x17d   :  { %159 = vrot.lane.b32.xlu2 %v1220_v55, %s1311_s17 }
 0x17e   :  { %1221 = vtanh.f32 %v152_v56 }
 0x183   :  { %v170_v6 = vpop.permute.xlu1 %169 }
 0x184   :  { %v1222_v57 = vpop.eup %1221  ;;  %v174_v11 = vmul.f32 %v170_v6, %v131_v50 }
 0x185   :  { %161 = vrot.lane.b32.xlu2 %v1222_v57, %s1311_s17 }
 0x1d7   :  { %v160_v60 = vpop.permute.xlu2 %159 }
 0x1d8   :  { %v165_v62 = vmul.f32 %v160_v60, %v155_v59 }
 0x1da   :  { %v1457_v63 = vadd.f32 %v173_v61, %v165_v62 }
 0x1dc   :  { %179 = vrot.lane.b32.xlu2 %v1457_v63, %s1311_s17 }
 0x1df   :  { %v162_v10 = vpop.permute.xlu2 %161 }
 0x1e0   :  { %v166_v13 = vmul.f32 %v162_v10, %v156_v7 }
 0x1e2   :  { %v1461_v14 = vadd.f32 %v174_v11, %v166_v13 }
 0x1e4   :  { %181 = vrot.lane.b32.xlu0 %v1461_v14, %s1311_s17 }
 0x236   :  { %v180_v16 = vpop.permute.xlu2 %179 }
 0x237   :  { %186 = vst.msk [vmem:[%s1745_s4] sm:$0x3] %vm23_vm0, %v180_v16  ;;  %1152 = vmatmul.msk.f32.vlgmr.msra.gmra.mxu2 %vm46_vm1, %v180_v16 }
 0x238   :  { %749 = vmatpush.msra.mxu2 %v1340_v0 }
 0x23a   :  { %750 = vmatpush.msra.mxu2 %v1350_v2 }
 0x23c   :  { %751 = vmatpush.msra.mxu2 %v1362_v4 }
 0x23e   :  { %752 = vmatpush.msra.mxu2 %v1383_v8 }
 0x256   :  { %v182_v17 = vpop.permute.xlu0 %181 }
 0x257   :  { %187 = vst.msk [vmem:[%s1745_s4 + $0x2] sm:$0x3] %vm23_vm0, %v182_v17  ;;  %1153 = vmatmul.msk.f32.vlgmr.msra.gmra.mxu3 %vm46_vm1, %v182_v17 }
 0x258   :  { %771 = vmatpush.msra.mxu3 %v1345_v1 }
 0x25a   :  { %772 = vmatpush.msra.mxu3 %v1357_v3 }
 0x25c   :  { %773 = vmatpush.msra.mxu3 %v1367_v5 }
 0x25e   :  { %774 = vmatpush.msra.mxu3 %v1388_v9 }
 0x2ba   :  { %v210_v18 = vpop.f32.mrf.mxu2 }
 0x2bb   :  { %v211_v19 = vadd.f32 %v1433_v12, %v210_v18 }
 0x2bd   :  { %277 = vrot.lane.b32.xlu1 %v211_v19, %s1309_s9  ;;  %v235_v23 = vadd.f32 %v1150_v22, %v211_v19 }
 0x2bf   :  { %v1154_v24 = vmul.f32 -1.442695, %v235_v23 }
 0x2c1   :  { %1223 = vpow2.f32 %v1154_v24  ;;  %v1158_v24 = vld [vmem:[%s1744_s0 + $0x8] sm:$0x3] }
 0x2c7   :  { %v1224_v28 = vpop.eup %1223 }
 0x2c8   :  { %v243_v29 = vadd.f32 1.0, %v1224_v28 }
 0x2ca   :  { %v256_v40 = vand.u32 2147483648, %v243_v29  ;;  %vm250_vm11 = vweird.f32 %v243_v29  ;;  %v254_v41 = vand.u32 2147483647, %v243_v29 }
 0x2cc   :  { %v257_v44 = vor.u32 1.1754944e-38, %v256_v40  ;;  %vm255_vm13 = vcmp.eq.f32.partialorder %v254_v41, 8.507059e+37 }
 0x2da   :  { %v232_v20 = vpop.f32.mrf.mxu3 }
 0x2db   :  { %v233_v21 = vadd.f32 %v1440_v15, %v232_v20 }
 0x2dd   :  { %279 = vrot.lane.b32.xlu2 %v233_v21, %s1309_s9  ;;  %v236_v26 = vadd.f32 %v1151_v25, %v233_v21 }
 0x2df   :  { %v1155_v27 = vmul.f32 -1.442695, %v236_v26 }
 0x2e1   :  { %1225 = vpow2.f32 %v1155_v27  ;;  %v1159_v27 = vld [vmem:[%s1744_s0 + $0xa] sm:$0x3] }
 0x2e2   :  { %1227 = vrcp.f32 %v243_v29 }
 0x2e7   :  { %v1226_v30 = vpop.eup %1225 }
 0x2e8   :  { %v244_v31 = vadd.f32 1.0, %v1226_v30  ;;  %v1228_v32 = vpop.eup %1227 }
 0x2e9   :  { %v246_v33 = vmul.f32 %v1228_v32, %v243_v29  ;;  %vm251_vm10 = vweird.f32 %v1228_v32 }
 0x2ea   :  { %1229 = vrcp.f32 %v244_v31  ;;  %vm252_vm12 = vmor %vm250_vm11, %vm251_vm10  ;;  %v271_v49 = vand.u32 2147483648, %v244_v31  ;;  %vm265_vm15 = vweird.f32 %v244_v31  ;;  %v269_v50 = vand.u32 2147483647, %v244_v31 }
 0x2eb   :  { %v247_v34 = vsub.f32 1.0, %v246_v33 }
 0x2ec   :  { %v272_v52 = vor.u32 1.1754944e-38, %v271_v49  ;;  %vm270_vm3 = vcmp.eq.f32.partialorder %v269_v50, 8.507059e+37 }
 0x2ed   :  { %v248_v36 = vmul.f32 %v1228_v32, %v247_v34 }
 0x2ef   :  { %v249_v38 = vadd.f32 %v1228_v32, %v248_v36 }
 0x2f0   :  { %v1230_v35 = vpop.eup %1229 }
 0x2f1   :  { %v261_v37 = vmul.f32 %v1230_v35, %v244_v31  ;;  %v253_v42 = vsel %vm252_vm12, %v1228_v32, %v249_v38  ;;  %vm266_vm14 = vweird.f32 %v1230_v35 }
 0x2f2   :  { %v258_v45 = vsel %vm255_vm13, %v257_v44, %v253_v42  ;;  %vm267_vm2 = vmor %vm265_vm15, %vm266_vm14 }
 0x2f3   :  { %v262_v39 = vsub.f32 1.0, %v261_v37  ;;  %v297_v62 = vsub.f32 1.0, %v258_v45  ;;  %v309_v7 = vmul.f32 %v258_v45, %v1457_v63 }
 0x2f5   :  { %v263_v43 = vmul.f32 %v1230_v35, %v262_v39 }
 0x2f7   :  { %v264_v48 = vadd.f32 %v1230_v35, %v263_v43 }
 0x2f9   :  { %v268_v51 = vsel %vm267_vm2, %v1230_v35, %v264_v48 }
 0x2fa   :  { %v273_v54 = vsel %vm270_vm3, %v272_v52, %v268_v51 }
 0x2fb   :  { %v298_v13 = vsub.f32 1.0, %v273_v54  ;;  %v310_v17 = vmul.f32 %v273_v54, %v1461_v14 }
 0x32f   :  { %v278_v46 = vpop.permute.xlu1 %277 }
 0x330   :  { %v283_v47 = vmul.f32 %v278_v46, %v258_v45 }
 0x332   :  { %287 = vrot.lane.b32.xlu0 %v283_v47, %s1309_s9 }
 0x337   :  { %v280_v53 = vpop.permute.xlu2 %279 }
 0x338   :  { %v284_v55 = vmul.f32 %v280_v53, %v273_v54 }
 0x33a   :  { %289 = vrot.lane.b32.xlu1 %v284_v55, %s1309_s9 }
 0x3a4   :  { %v288_v56 = vpop.permute.xlu0 %287 }
 0x3a5   :  { %v293_v57 = vadd.f32 %v1150_v22, %v288_v56 }
 0x3a7   :  { %1231 = vtanh.f32 %v293_v57 }
 0x3ac   :  { %v290_v58 = vpop.permute.xlu1 %289 }
 0x3ad   :  { %v1232_v59 = vpop.eup %1231  ;;  %v294_v60 = vadd.f32 %v1151_v25, %v290_v58 }
 0x3ae   :  { %301 = vrot.lane.b32.xlu2 %v1232_v59, %s1311_s17 }
 0x3af   :  { %1233 = vtanh.f32 %v294_v60 }
 0x3b5   :  { %v1234_v61 = vpop.eup %1233 }
 0x3b6   :  { %303 = vrot.lane.b32.xlu0 %v1234_v61, %s1311_s17 }
 0x408   :  { %v302_v6 = vpop.permute.xlu2 %301 }
 0x409   :  { %v307_v10 = vmul.f32 %v302_v6, %v297_v62 }
 0x40b   :  { %v1498_v11 = vadd.f32 %v309_v7, %v307_v10 }
 0x40d   :  { %315 = vrot.lane.b32.xlu1 %v1498_v11, %s1311_s17 }
 0x428   :  { %v304_v16 = vpop.permute.xlu0 %303 }
 0x429   :  { %v308_v18 = vmul.f32 %v304_v16, %v298_v13 }
 0x42b   :  { %v1503_v19 = vadd.f32 %v310_v17, %v308_v18 }
 0x42d   :  { %317 = vrot.lane.b32.xlu2 %v1503_v19, %s1311_s17 }
 0x47f   :  { %v316_v20 = vpop.permute.xlu1 %315 }
 0x480   :  { %1156 = vst.msk [vmem:[%s1745_s4 + $0x4] sm:$0x3] %vm23_vm0, %v316_v20  ;;  %1160 = vmatmul.msk.f32.vlgmr.msrb.gmra.mxu0 %vm46_vm1, %v316_v20 }
 0x481   :  { %885 = vmatpush.msrb.mxu0 %v1340_v0 }
 0x483   :  { %886 = vmatpush.msrb.mxu0 %v1350_v2 }
 0x485   :  { %887 = vmatpush.msrb.mxu0 %v1362_v4 }
 0x487   :  { %v318_v63 = vpop.permute.xlu2 %317  ;;  %888 = vmatpush.msrb.mxu0 %v1383_v8 }
 0x488   :  { %1157 = vst.msk [vmem:[%s1745_s4 + $0x6] sm:$0x3] %vm23_vm0, %v318_v63  ;;  %1161 = vmatmul.msk.f32.vlgmr.msrb.gmra.mxu1 %vm46_vm1, %v318_v63 }
 0x489   :  { %907 = vmatpush.msrb.mxu1 %v1345_v1 }
 0x48b   :  { %908 = vmatpush.msrb.mxu1 %v1357_v3 }
 0x48d   :  { %909 = vmatpush.msrb.mxu1 %v1367_v5 }
 0x48f   :  { %910 = vmatpush.msrb.mxu1 %v1388_v9 }
 0x4fd   :  { %v346_v14 = vpop.f32.mrf.mxu0 }
 0x4fe   :  { %v347_v21 = vadd.f32 %v1433_v12, %v346_v14 }
 0x500   :  { %413 = vrot.lane.b32.xlu0 %v347_v21, %s1309_s9  ;;  %v371_v25 = vadd.f32 %v1158_v24, %v347_v21 }
 0x502   :  { %v1162_v26 = vmul.f32 -1.442695, %v371_v25 }
 0x504   :  { %1235 = vpow2.f32 %v1162_v26 }
 0x505   :  { %v368_v22 = vpop.f32.mrf.mxu1 }
 0x506   :  { %v369_v23 = vadd.f32 %v1440_v15, %v368_v22 }
 0x508   :  { %415 = vrot.lane.b32.xlu1 %v369_v23, %s1309_s9  ;;  %v372_v28 = vadd.f32 %v1159_v27, %v369_v23 }
 0x50a   :  { %v1163_v29 = vmul.f32 -1.442695, %v372_v28  ;;  %v1236_v30 = vpop.eup %1235 }
 0x50b   :  { %v379_v31 = vadd.f32 1.0, %v1236_v30 }
 0x50c   :  { %1237 = vpow2.f32 %v1163_v29 }
 0x50d   :  { %1239 = vrcp.f32 %v379_v31  ;;  %v392_v42 = vand.u32 2147483648, %v379_v31  ;;  %vm386_vm5 = vweird.f32 %v379_v31  ;;  %v390_v43 = vand.u32 2147483647, %v379_v31 }
 0x50f   :  { %v393_v46 = vor.u32 1.1754944e-38, %v392_v42  ;;  %vm391_vm7 = vcmp.eq.f32.partialorder %v390_v43, 8.507059e+37 }
 0x512   :  { %v1238_v32 = vpop.eup %1237 }
 0x513   :  { %v380_v33 = vadd.f32 1.0, %v1238_v32  ;;  %v1240_v34 = vpop.eup %1239 }
 0x514   :  { %v382_v35 = vmul.f32 %v1240_v34, %v379_v31  ;;  %vm387_vm4 = vweird.f32 %v1240_v34 }
 0x515   :  { %1241 = vrcp.f32 %v380_v33  ;;  %vm388_vm6 = vmor %vm386_vm5, %vm387_vm4  ;;  %v407_v51 = vand.u32 2147483648, %v380_v33  ;;  %vm401_vm9 = vweird.f32 %v380_v33  ;;  %v405_v52 = vand.u32 2147483647, %v380_v33 }
 0x516   :  { %v383_v36 = vsub.f32 1.0, %v382_v35 }
 0x517   :  { %v408_v54 = vor.u32 1.1754944e-38, %v407_v51  ;;  %vm406_vm11 = vcmp.eq.f32.partialorder %v405_v52, 8.507059e+37 }
 0x518   :  { %v384_v38 = vmul.f32 %v1240_v34, %v383_v36 }
 0x51a   :  { %v385_v40 = vadd.f32 %v1240_v34, %v384_v38 }
 0x51b   :  { %v1242_v37 = vpop.eup %1241 }
 0x51c   :  { %v397_v39 = vmul.f32 %v1242_v37, %v380_v33  ;;  %v389_v44 = vsel %vm388_vm6, %v1240_v34, %v385_v40  ;;  %vm402_vm8 = vweird.f32 %v1242_v37 }
 0x51d   :  { %v394_v48 = vsel %vm391_vm7, %v393_v46, %v389_v44  ;;  %vm403_vm10 = vmor %vm401_vm9, %vm402_vm8 }
 0x51e   :  { %v398_v41 = vsub.f32 1.0, %v397_v39  ;;  %v433_v7 = vsub.f32 1.0, %v394_v48  ;;  %v445_v13 = vmul.f32 %v394_v48, %v1498_v11 }
 0x520   :  { %v399_v45 = vmul.f32 %v1242_v37, %v398_v41 }
 0x522   :  { %v400_v50 = vadd.f32 %v1242_v37, %v399_v45 }
 0x524   :  { %v404_v53 = vsel %vm403_vm10, %v1242_v37, %v400_v50 }
 0x525   :  { %v409_v55 = vsel %vm406_vm11, %v408_v54, %v404_v53 }
 0x526   :  { %v434_v18 = vsub.f32 1.0, %v409_v55  ;;  %v446_v63 = vmul.f32 %v409_v55, %v1503_v19 }
 0x572   :  { %v414_v47 = vpop.permute.xlu0 %413 }
 0x573   :  { %v419_v49 = vmul.f32 %v414_v47, %v394_v48 }
 0x575   :  { %423 = vrot.lane.b32.xlu2 %v419_v49, %s1309_s9 }
 0x57a   :  { %v416_v56 = vpop.permute.xlu1 %415 }
 0x57b   :  { %v420_v57 = vmul.f32 %v416_v56, %v409_v55 }
 0x57d   :  { %425 = vrot.lane.b32.xlu0 %v420_v57, %s1309_s9 }
 0x5cf   :  { %v424_v58 = vpop.permute.xlu2 %423 }
 0x5d0   :  { %v429_v59 = vadd.f32 %v1158_v24, %v424_v58  ;;  %v1167_v24 = vld [vmem:[%s1744_s0 + $0xe] sm:$0x3] }
 0x5d2   :  { %1243 = vtanh.f32 %v429_v59 }
 0x5d8   :  { %v1244_v60 = vpop.eup %1243 }
 0x5d9   :  { %437 = vrot.lane.b32.xlu1 %v1244_v60, %s1311_s17 }
 0x5ef   :  { %v426_v61 = vpop.permute.xlu0 %425 }
 0x5f0   :  { %v430_v62 = vadd.f32 %v1159_v27, %v426_v61 }
 0x5f2   :  { %1245 = vtanh.f32 %v430_v62 }
 0x5f8   :  { %v1246_v6 = vpop.eup %1245 }
 0x5f9   :  { %439 = vrot.lane.b32.xlu2 %v1246_v6, %s1311_s17 }
 0x64b   :  { %v438_v10 = vpop.permute.xlu1 %437 }
 0x64c   :  { %v443_v16 = vmul.f32 %v438_v10, %v433_v7 }
 0x64e   :  { %v1540_v17 = vadd.f32 %v445_v13, %v443_v16 }
 0x650   :  { %451 = vrot.lane.b32.xlu0 %v1540_v17, %s1311_s17 }
 0x653   :  { %v440_v20 = vpop.permute.xlu2 %439 }
 0x654   :  { %v444_v14 = vmul.f32 %v440_v20, %v434_v18 }
 0x656   :  { %v1545_v21 = vadd.f32 %v446_v63, %v444_v14 }
 0x658   :  { %453 = vrot.lane.b32.xlu1 %v1545_v21, %s1311_s17 }
 0x6c2   :  { %v452_v22 = vpop.permute.xlu0 %451 }
 0x6c3   :  { %1164 = vst.msk [vmem:[%s1745_s4 + $0x8] sm:$0x3] %vm23_vm0, %v452_v22  ;;  %1168 = vmatmul.msk.f32.vlgmr.msrb.gmra.mxu2 %vm46_vm1, %v452_v22  ;;  %v1174_v22 = vld [vmem:[%s1744_s0 + $0x10] sm:$0x3] }
 0x6c4   :  { %1021 = vmatpush.msrb.mxu2 %v1340_v0 }
 0x6c6   :  { %1022 = vmatpush.msrb.mxu2 %v1350_v2 }
 0x6c8   :  { %1023 = vmatpush.msrb.mxu2 %v1362_v4 }
 0x6ca   :  { %v454_v11 = vpop.permute.xlu1 %453  ;;  %1024 = vmatpush.msrb.mxu2 %v1383_v8 }
 0x6cb   :  { %1165 = vst.msk [vmem:[%s1745_s4 + $0xa] sm:$0x3] %vm23_vm0, %v454_v11  ;;  %1169 = vmatmul.msk.f32.vlgmr.msrb.gmra.mxu3 %vm46_vm1, %v454_v11 }
 0x6cc   :  { %1043 = vmatpush.msrb.mxu3 %v1345_v1  ;;  %v1166_v1 = vld [vmem:[%s1744_s0 + $0xc] sm:$0x3] }
 0x6ce   :  { %1044 = vmatpush.msrb.mxu3 %v1357_v3 }
 0x6d0   :  { %1045 = vmatpush.msrb.mxu3 %v1367_v5 }
 0x6d2   :  { %1046 = vmatpush.msrb.mxu3 %v1388_v9 }
 0x746   :  { %v482_v0 = vpop.f32.mrf.mxu2 }
 0x747   :  { %v483_v2 = vadd.f32 %v1433_v12, %v482_v0 }
 0x749   :  { %549 = vrot.lane.b32.xlu2 %v483_v2, %s1309_s9  ;;  %v507_v19 = vadd.f32 %v1166_v1, %v483_v2  ;;  %v1175_v2 = vld [vmem:[%s1744_s0 + $0x12] sm:$0x3] }
 0x74b   :  { %v1170_v3 = vmul.f32 -1.442695, %v507_v19 }
 0x74d   :  { %1247 = vpow2.f32 %v1170_v3 }
 0x74e   :  { %v504_v4 = vpop.f32.mrf.mxu3 }
 0x74f   :  { %v505_v8 = vadd.f32 %v1440_v15, %v504_v4 }
 0x751   :  { %551 = vrot.lane.b32.xlu0 %v505_v8, %s1309_s9  ;;  %v508_v26 = vadd.f32 %v1167_v24, %v505_v8 }
 0x753   :  { %v1248_v5 = vpop.eup %1247  ;;  %v1171_v28 = vmul.f32 -1.442695, %v508_v26 }
 0x754   :  { %v515_v23 = vadd.f32 1.0, %v1248_v5 }
 0x756   :  { %1249 = vrcp.f32 %v515_v23  ;;  %v528_v31 = vand.u32 2147483648, %v515_v23  ;;  %vm522_vm13 = vweird.f32 %v515_v23  ;;  %v526_v32 = vand.u32 2147483647, %v515_v23 }
 0x757   :  { %1251 = vpow2.f32 %v1171_v28 }
 0x758   :  { %v529_v35 = vor.u32 1.1754944e-38, %v528_v31  ;;  %vm527_vm15 = vcmp.eq.f32.partialorder %v526_v32, 8.507059e+37 }
 0x75c   :  { %v1250_v9 = vpop.eup %1249 }
 0x75d   :  { %v518_v25 = vmul.f32 %v1250_v9, %v515_v23  ;;  %vm523_vm12 = vweird.f32 %v1250_v9  ;;  %v1252_v33 = vpop.eup %1251 }
 0x75e   :  { %vm524_vm14 = vmor %vm522_vm13, %vm523_vm12  ;;  %v516_v36 = vadd.f32 1.0, %v1252_v33 }
 0x75f   :  { %v519_v27 = vsub.f32 1.0, %v518_v25 }
 0x760   :  { %1253 = vrcp.f32 %v516_v36  ;;  %v543_v45 = vand.u32 2147483648, %v516_v36  ;;  %vm537_vm3 = vweird.f32 %v516_v36  ;;  %v541_v46 = vand.u32 2147483647, %v516_v36 }
 0x761   :  { %v520_v29 = vmul.f32 %v1250_v9, %v519_v27 }
 0x762   :  { %v544_v48 = vor.u32 1.1754944e-38, %v543_v45  ;;  %vm542_vm5 = vcmp.eq.f32.partialorder %v541_v46, 8.507059e+37 }
 0x763   :  { %v521_v30 = vadd.f32 %v1250_v9, %v520_v29 }
 0x765   :  { %v525_v34 = vsel %vm524_vm14, %v1250_v9, %v521_v30 }
 0x766   :  { %v530_v38 = vsel %vm527_vm15, %v529_v35, %v525_v34  ;;  %v1254_v40 = vpop.eup %1253 }
 0x767   :  { %v533_v41 = vmul.f32 %v1254_v40, %v516_v36  ;;  %vm538_vm2 = vweird.f32 %v1254_v40  ;;  %v569_v58 = vsub.f32 1.0, %v530_v38  ;;  %v581_v60 = vmul.f32 %v530_v38, %v1540_v17 }
 0x768   :  { %vm539_vm4 = vmor %vm537_vm3, %vm538_vm2 }
 0x769   :  { %v534_v42 = vsub.f32 1.0, %v533_v41 }
 0x76b   :  { %v535_v43 = vmul.f32 %v1254_v40, %v534_v42 }
 0x76d   :  { %v536_v44 = vadd.f32 %v1254_v40, %v535_v43 }
 0x76f   :  { %v540_v47 = vsel %vm539_vm4, %v1254_v40, %v536_v44 }
 0x770   :  { %v545_v50 = vsel %vm542_vm5, %v544_v48, %v540_v47 }
 0x771   :  { %v570_v6 = vsub.f32 1.0, %v545_v50  ;;  %v582_v10 = vmul.f32 %v545_v50, %v1545_v21 }
 0x7a3   :  { %v550_v37 = vpop.permute.xlu2 %549 }
 0x7a4   :  { %v555_v39 = vmul.f32 %v550_v37, %v530_v38 }
 0x7a6   :  { %559 = vrot.lane.b32.xlu1 %v555_v39, %s1309_s9 }
 0x7c3   :  { %v552_v49 = vpop.permute.xlu0 %551 }
 0x7c4   :  { %v556_v51 = vmul.f32 %v552_v49, %v545_v50 }
 0x7c6   :  { %561 = vrot.lane.b32.xlu2 %v556_v51, %s1309_s9 }
 0x818   :  { %v560_v52 = vpop.permute.xlu1 %559 }
 0x819   :  { %v565_v53 = vadd.f32 %v1166_v1, %v560_v52 }
 0x81b   :  { %1255 = vtanh.f32 %v565_v53 }
 0x820   :  { %v562_v54 = vpop.permute.xlu2 %561 }
 0x821   :  { %v1256_v55 = vpop.eup %1255  ;;  %v566_v56 = vadd.f32 %v1167_v24, %v562_v54 }
 0x822   :  { %573 = vrot.lane.b32.xlu0 %v1256_v55, %s1311_s17 }
 0x823   :  { %1257 = vtanh.f32 %v566_v56 }
 0x829   :  { %v1258_v57 = vpop.eup %1257 }
 0x82a   :  { %575 = vrot.lane.b32.xlu1 %v1258_v57, %s1311_s17 }
 0x894   :  { %v574_v59 = vpop.permute.xlu0 %573 }
 0x895   :  { %v579_v61 = vmul.f32 %v574_v59, %v569_v58 }
 0x897   :  { %v1582_v62 = vadd.f32 %v581_v60, %v579_v61 }
 0x899   :  { %587 = vrot.lane.b32.xlu2 %v1582_v62, %s1311_s17 }
 0x89c   :  { %v576_v7 = vpop.permute.xlu1 %575 }
 0x89d   :  { %v580_v13 = vmul.f32 %v576_v7, %v570_v6 }
 0x89f   :  { %v1587_v16 = vadd.f32 %v582_v10, %v580_v13 }
 0x8a1   :  { %589 = vrot.lane.b32.xlu0 %v1587_v16, %s1311_s17 }
 0x8f3   :  { %v588_v18 = vpop.permute.xlu2 %587 }
 0x8f4   :  { %1172 = vst.msk [vmem:[%s1745_s4 + $0xc] sm:$0x3] %vm23_vm0, %v588_v18  ;;  %1176 = vmatmul.msk.f32.vlgmr.msra.gmra.mxu0 %vm46_vm1, %v588_v18  ;;  %v1182_v18 = vld [vmem:[%s1744_s0 + $0x14] sm:$0x3] }
 0x913   :  { %v590_v17 = vpop.permute.xlu0 %589 }
 0x914   :  { %1173 = vst.msk [vmem:[%s1745_s4 + $0xe] sm:$0x3] %vm23_vm0, %v590_v17  ;;  %1177 = vmatmul.msk.f32.vlgmr.msra.gmra.mxu1 %vm46_vm1, %v590_v17 }
 0x971   :  { %v618_v20 = vpop.f32.mrf.mxu0 }
 0x972   :  { %v619_v63 = vadd.f32 %v1433_v12, %v618_v20 }
 0x974   :  { %685 = vrot.lane.b32.xlu1 %v619_v63, %s1309_s9  ;;  %v643_v11 = vadd.f32 %v1174_v22, %v619_v63  ;;  %v1183_v63 = vld [vmem:[%s1744_s0 + $0x16] sm:$0x3] }
 0x976   :  { %v1178_v0 = vmul.f32 -1.442695, %v643_v11 }
 0x978   :  { %1259 = vpow2.f32 %v1178_v0 }
 0x97e   :  { %v1260_v1 = vpop.eup %1259 }
 0x97f   :  { %v651_v19 = vadd.f32 1.0, %v1260_v1 }
 0x981   :  { %v664_v30 = vand.u32 2147483648, %v651_v19  ;;  %vm658_vm7 = vweird.f32 %v651_v19  ;;  %v662_v31 = vand.u32 2147483647, %v651_v19 }
 0x983   :  { %v665_v34 = vor.u32 1.1754944e-38, %v664_v30  ;;  %vm663_vm9 = vcmp.eq.f32.partialorder %v662_v31, 8.507059e+37 }
 0x991   :  { %v640_v14 = vpop.f32.mrf.mxu1 }
 0x992   :  { %v641_v21 = vadd.f32 %v1440_v15, %v640_v14 }
 0x994   :  { %687 = vrot.lane.b32.xlu2 %v641_v21, %s1309_s9  ;;  %v644_v4 = vadd.f32 %v1175_v2, %v641_v21 }
 0x996   :  { %v1179_v8 = vmul.f32 -1.442695, %v644_v4 }
 0x998   :  { %1261 = vpow2.f32 %v1179_v8 }
 0x999   :  { %1263 = vrcp.f32 %v651_v19 }
 0x99e   :  { %v1262_v3 = vpop.eup %1261 }
 0x99f   :  { %v652_v5 = vadd.f32 1.0, %v1262_v3  ;;  %v1264_v23 = vpop.eup %1263 }
 0x9a0   :  { %v654_v9 = vmul.f32 %v1264_v23, %v651_v19  ;;  %vm659_vm6 = vweird.f32 %v1264_v23 }
 0x9a1   :  { %1265 = vrcp.f32 %v652_v5  ;;  %vm660_vm8 = vmor %vm658_vm7, %vm659_vm6  ;;  %v679_v39 = vand.u32 2147483648, %v652_v5  ;;  %vm673_vm11 = vweird.f32 %v652_v5  ;;  %v677_v40 = vand.u32 2147483647, %v652_v5 }
 0x9a2   :  { %v655_v24 = vsub.f32 1.0, %v654_v9 }
 0x9a3   :  { %v680_v42 = vor.u32 1.1754944e-38, %v679_v39  ;;  %vm678_vm13 = vcmp.eq.f32.partialorder %v677_v40, 8.507059e+37 }
 0x9a4   :  { %v656_v26 = vmul.f32 %v1264_v23, %v655_v24 }
 0x9a6   :  { %v657_v28 = vadd.f32 %v1264_v23, %v656_v26 }
 0x9a7   :  { %v1266_v25 = vpop.eup %1265 }
 0x9a8   :  { %v669_v27 = vmul.f32 %v1266_v25, %v652_v5  ;;  %v661_v32 = vsel %vm660_vm8, %v1264_v23, %v657_v28  ;;  %vm674_vm10 = vweird.f32 %v1266_v25 }
 0x9a9   :  { %v666_v35 = vsel %vm663_vm9, %v665_v34, %v661_v32  ;;  %vm675_vm12 = vmor %vm673_vm11, %vm674_vm10 }
 0x9aa   :  { %v670_v29 = vsub.f32 1.0, %v669_v27  ;;  %v705_v52 = vsub.f32 1.0, %v666_v35  ;;  %v717_v54 = vmul.f32 %v666_v35, %v1582_v62 }
 0x9ac   :  { %v671_v33 = vmul.f32 %v1266_v25, %v670_v29 }
 0x9ae   :  { %v672_v38 = vadd.f32 %v1266_v25, %v671_v33 }
 0x9b0   :  { %v676_v41 = vsel %vm675_vm12, %v1266_v25, %v672_v38 }
 0x9b1   :  { %v681_v44 = vsel %vm678_vm13, %v680_v42, %v676_v41 }
 0x9b2   :  { %v706_v57 = vsub.f32 1.0, %v681_v44  ;;  %v718_v59 = vmul.f32 %v681_v44, %v1587_v16 }
 0x9e6   :  { %v686_v36 = vpop.permute.xlu1 %685 }
 0x9e7   :  { %v691_v37 = vmul.f32 %v686_v36, %v666_v35 }
 0x9e9   :  { %695 = vrot.lane.b32.xlu0 %v691_v37, %s1309_s9 }
 0x9ee   :  { %v688_v43 = vpop.permute.xlu2 %687 }
 0x9ef   :  { %v692_v45 = vmul.f32 %v688_v43, %v681_v44 }
 0x9f1   :  { %697 = vrot.lane.b32.xlu1 %v692_v45, %s1309_s9 }
 0xa5b   :  { %v696_v46 = vpop.permute.xlu0 %695 }
 0xa5c   :  { %v701_v47 = vadd.f32 %v1174_v22, %v696_v46 }
 0xa5e   :  { %1267 = vtanh.f32 %v701_v47 }
 0xa63   :  { %v698_v48 = vpop.permute.xlu1 %697 }
 0xa64   :  { %v1268_v49 = vpop.eup %1267  ;;  %v702_v50 = vadd.f32 %v1175_v2, %v698_v48 }
 0xa65   :  { %709 = vrot.lane.b32.xlu2 %v1268_v49, %s1311_s17 }
 0xa66   :  { %1269 = vtanh.f32 %v702_v50 }
 0xa6c   :  { %v1270_v51 = vpop.eup %1269 }
 0xa6d   :  { %711 = vrot.lane.b32.xlu0 %v1270_v51, %s1311_s17 }
 0xabf   :  { %v710_v53 = vpop.permute.xlu2 %709 }
 0xac0   :  { %v715_v55 = vmul.f32 %v710_v53, %v705_v52 }
 0xac2   :  { %v1616_v56 = vadd.f32 %v717_v54, %v715_v55 }
 0xac4   :  { %723 = vrot.lane.b32.xlu1 %v1616_v56, %s1311_s17 }
 0xadf   :  { %v712_v58 = vpop.permute.xlu0 %711 }
 0xae0   :  { %v716_v60 = vmul.f32 %v712_v58, %v706_v57  ;;  %v1672_v57 = vld [vmem:[%s1743_s3] ss:$0 sm:$0xff] }
 0xae2   :  { %v1621_v61 = vadd.f32 %v718_v59, %v716_v60  ;;  %v1679_v60 = vld [vmem:[%s1743_s3 + $0x1] ss:$0 sm:$0xff] }
 0xae4   :  { %725 = vrot.lane.b32.xlu2 %v1621_v61, %s1311_s17 }
 0xb36   :  { %v724_v6 = vpop.permute.xlu1 %723 }
 0xb37   :  { %1180 = vst.msk [vmem:[%s1745_s4 + $0x10] sm:$0x3] %vm23_vm0, %v724_v6  ;;  %1184 = vmatmul.msk.f32.vlgmr.msra.gmra.mxu2 %vm46_vm1, %v724_v6  ;;  %v1190_v6 = vld [vmem:[%s1744_s0 + $0x18] sm:$0x3] }
 0xb3e   :  { %v726_v62 = vpop.permute.xlu2 %725 }
 0xb3f   :  { %1181 = vst.msk [vmem:[%s1745_s4 + $0x12] sm:$0x3] %vm23_vm0, %v726_v62  ;;  %1185 = vmatmul.msk.f32.vlgmr.msra.gmra.mxu3 %vm46_vm1, %v726_v62 }
 0xbba   :  { %v754_v7 = vpop.f32.mrf.mxu2 }
 0xbbb   :  { %v755_v10 = vadd.f32 %v1433_v12, %v754_v7 }
 0xbbd   :  { %821 = vrot.lane.b32.xlu0 %v755_v10, %s1309_s9  ;;  %v779_v17 = vadd.f32 %v1182_v18, %v755_v10 }
 0xbbf   :  { %v1186_v20 = vmul.f32 -1.442695, %v779_v17 }
 0xbc1   :  { %1271 = vpow2.f32 %v1186_v20 }
 0xbc2   :  { %v776_v13 = vpop.f32.mrf.mxu3 }
 0xbc3   :  { %v777_v16 = vadd.f32 %v1440_v15, %v776_v13 }
 0xbc5   :  { %823 = vrot.lane.b32.xlu1 %v777_v16, %s1309_s9  ;;  %v780_v14 = vadd.f32 %v1183_v63, %v777_v16 }
 0xbc7   :  { %v1187_v12 = vmul.f32 -1.442695, %v780_v14  ;;  %v1272_v21 = vpop.eup %1271 }
 0xbc8   :  { %v787_v22 = vadd.f32 1.0, %v1272_v21 }
 0xbc9   :  { %1273 = vpow2.f32 %v1187_v12 }
 0xbca   :  { %1275 = vrcp.f32 %v787_v22  ;;  %v800_v23 = vand.u32 2147483648, %v787_v22  ;;  %vm794_vm15 = vweird.f32 %v787_v22  ;;  %v798_v9 = vand.u32 2147483647, %v787_v22 }
 0xbcc   :  { %v801_v26 = vor.u32 1.1754944e-38, %v800_v23  ;;  %vm799_vm3 = vcmp.eq.f32.partialorder %v798_v9, 8.507059e+37 }
 0xbcf   :  { %v1274_v15 = vpop.eup %1273 }
 0xbd0   :  { %v788_v11 = vadd.f32 1.0, %v1274_v15  ;;  %v1276_v0 = vpop.eup %1275 }
 0xbd1   :  { %v790_v2 = vmul.f32 %v1276_v0, %v787_v22  ;;  %vm795_vm14 = vweird.f32 %v1276_v0 }
 0xbd2   :  { %1277 = vrcp.f32 %v788_v11  ;;  %vm796_vm2 = vmor %vm794_vm15, %vm795_vm14  ;;  %v815_v31 = vand.u32 2147483648, %v788_v11  ;;  %vm809_vm5 = vweird.f32 %v788_v11  ;;  %v813_v32 = vand.u32 2147483647, %v788_v11 }
 0xbd3   :  { %v791_v4 = vsub.f32 1.0, %v790_v2 }
 0xbd4   :  { %v816_v34 = vor.u32 1.1754944e-38, %v815_v31  ;;  %vm814_vm7 = vcmp.eq.f32.partialorder %v813_v32, 8.507059e+37 }
 0xbd5   :  { %v792_v1 = vmul.f32 %v1276_v0, %v791_v4 }
 0xbd7   :  { %v793_v3 = vadd.f32 %v1276_v0, %v792_v1 }
 0xbd8   :  { %v1278_v8 = vpop.eup %1277 }
 0xbd9   :  { %v805_v19 = vmul.f32 %v1278_v8, %v788_v11  ;;  %v797_v24 = vsel %vm796_vm2, %v1276_v0, %v793_v3  ;;  %vm810_vm4 = vweird.f32 %v1278_v8 }
 0xbda   :  { %v802_v28 = vsel %vm799_vm3, %v801_v26, %v797_v24  ;;  %vm811_vm6 = vmor %vm809_vm5, %vm810_vm4 }
 0xbdb   :  { %v806_v5 = vsub.f32 1.0, %v805_v19  ;;  %v841_v44 = vsub.f32 1.0, %v802_v28  ;;  %v853_v46 = vmul.f32 %v802_v28, %v1616_v56 }
 0xbdd   :  { %v807_v25 = vmul.f32 %v1278_v8, %v806_v5 }
 0xbdf   :  { %v808_v30 = vadd.f32 %v1278_v8, %v807_v25 }
 0xbe1   :  { %v812_v33 = vsel %vm811_vm6, %v1278_v8, %v808_v30 }
 0xbe2   :  { %v817_v35 = vsel %vm814_vm7, %v816_v34, %v812_v33 }
 0xbe3   :  { %v842_v49 = vsub.f32 1.0, %v817_v35  ;;  %v854_v51 = vmul.f32 %v817_v35, %v1621_v61 }
 0xc2f   :  { %v822_v27 = vpop.permute.xlu0 %821 }
 0xc30   :  { %v827_v29 = vmul.f32 %v822_v27, %v802_v28 }
 0xc32   :  { %831 = vrot.lane.b32.xlu2 %v827_v29, %s1309_s9 }
 0xc37   :  { %v824_v36 = vpop.permute.xlu1 %823 }
 0xc38   :  { %v828_v37 = vmul.f32 %v824_v36, %v817_v35 }
 0xc3a   :  { %833 = vrot.lane.b32.xlu0 %v828_v37, %s1309_s9 }
 0xc8c   :  { %v832_v38 = vpop.permute.xlu2 %831 }
 0xc8d   :  { %v837_v39 = vadd.f32 %v1182_v18, %v832_v38  ;;  %v1191_v18 = vld [vmem:[%s1744_s0 + $0x1a] sm:$0x3] }
 0xc8f   :  { %1279 = vtanh.f32 %v837_v39 }
 0xc95   :  { %v1280_v40 = vpop.eup %1279 }
 0xc96   :  { %845 = vrot.lane.b32.xlu1 %v1280_v40, %s1311_s17 }
 0xcac   :  { %v834_v41 = vpop.permute.xlu0 %833 }
 0xcad   :  { %v838_v42 = vadd.f32 %v1183_v63, %v834_v41 }
 0xcaf   :  { %1281 = vtanh.f32 %v838_v42 }
 0xcb5   :  { %v1282_v43 = vpop.eup %1281 }
 0xcb6   :  { %847 = vrot.lane.b32.xlu2 %v1282_v43, %s1311_s17 }
 0xd08   :  { %v846_v45 = vpop.permute.xlu1 %845 }
 0xd09   :  { %v851_v47 = vmul.f32 %v846_v45, %v841_v44 }
 0xd0b   :  { %v1650_v48 = vadd.f32 %v853_v46, %v851_v47 }
 0xd0d   :  { %859 = vrot.lane.b32.xlu0 %v1650_v48, %s1311_s17 }
 0xd10   :  { %v848_v50 = vpop.permute.xlu2 %847 }
 0xd11   :  { %v852_v52 = vmul.f32 %v848_v50, %v842_v49 }
 0xd13   :  { %v1655_v53 = vadd.f32 %v854_v51, %v852_v52 }
 0xd15   :  { %861 = vrot.lane.b32.xlu1 %v1655_v53, %s1311_s17 }
 0xd7f   :  { %v860_v54 = vpop.permute.xlu0 %859 }
 0xd80   :  { %1188 = vst.msk [vmem:[%s1745_s4 + $0x14] sm:$0x3] %vm23_vm0, %v860_v54  ;;  %1192 = vmatmul.msk.f32.vlgmr.msrb.gmra.mxu0 %vm46_vm1, %v860_v54  ;;  %v1198_v54 = vld [vmem:[%s1744_s0 + $0x1c] sm:$0x3] }
 0xd87   :  { %v862_v55 = vpop.permute.xlu1 %861 }
 0xd88   :  { %1189 = vst.msk [vmem:[%s1745_s4 + $0x16] sm:$0x3] %vm23_vm0, %v862_v55  ;;  %1193 = vmatmul.msk.f32.vlgmr.msrb.gmra.mxu1 %vm46_vm1, %v862_v55 }
 0xdfd   :  { %v890_v56 = vpop.f32.mrf.mxu0 }
 0xdfe   :  { %v891_v58 = vadd.f32 %v1672_v57, %v890_v56 }
 0xe00   :  { %957 = vrot.lane.b32.xlu2 %v891_v58, %s1309_s9  ;;  %v915_v62 = vadd.f32 %v1190_v6, %v891_v58  ;;  %v1199_v58 = vld [vmem:[%s1744_s0 + $0x1e] sm:$0x3] }
 0xe02   :  { %v1194_v7 = vmul.f32 -1.442695, %v915_v62 }
 0xe04   :  { %1283 = vpow2.f32 %v1194_v7 }
 0xe05   :  { %v912_v59 = vpop.f32.mrf.mxu1 }
 0xe06   :  { %v913_v61 = vadd.f32 %v1679_v60, %v912_v59 }
 0xe08   :  { %959 = vrot.lane.b32.xlu0 %v913_v61, %s1309_s9  ;;  %v916_v20 = vadd.f32 %v1191_v18, %v913_v61 }
 0xe0a   :  { %v1284_v10 = vpop.eup %1283  ;;  %v1195_v14 = vmul.f32 -1.442695, %v916_v20 }
 0xe0b   :  { %v923_v13 = vadd.f32 1.0, %v1284_v10 }
 0xe0d   :  { %1285 = vrcp.f32 %v923_v13  ;;  %v936_v22 = vand.u32 2147483648, %v923_v13  ;;  %vm930_vm9 = vweird.f32 %v923_v13  ;;  %v934_v15 = vand.u32 2147483647, %v923_v13 }
 0xe0e   :  { %1287 = vpow2.f32 %v1195_v14 }
 0xe0f   :  { %v937_v2 = vor.u32 1.1754944e-38, %v936_v22  ;;  %vm935_vm11 = vcmp.eq.f32.partialorder %v934_v15, 8.507059e+37 }
 0xe13   :  { %v1286_v16 = vpop.eup %1285 }
 0xe14   :  { %v926_v17 = vmul.f32 %v1286_v16, %v923_v13  ;;  %vm931_vm8 = vweird.f32 %v1286_v16  ;;  %v1288_v11 = vpop.eup %1287 }
 0xe15   :  { %vm932_vm10 = vmor %vm930_vm9, %vm931_vm8  ;;  %v924_v4 = vadd.f32 1.0, %v1288_v11 }
 0xe16   :  { %v927_v63 = vsub.f32 1.0, %v926_v17 }
 0xe17   :  { %1289 = vrcp.f32 %v924_v4  ;;  %v951_v25 = vand.u32 2147483648, %v924_v4  ;;  %vm945_vm13 = vweird.f32 %v924_v4  ;;  %v949_v26 = vand.u32 2147483647, %v924_v4 }
 0xe18   :  { %v928_v12 = vmul.f32 %v1286_v16, %v927_v63 }
 0xe19   :  { %v952_v28 = vor.u32 1.1754944e-38, %v951_v25  ;;  %vm950_vm15 = vcmp.eq.f32.partialorder %v949_v26, 8.507059e+37 }
 0xe1a   :  { %v929_v21 = vadd.f32 %v1286_v16, %v928_v12 }
 0xe1c   :  { %v933_v0 = vsel %vm932_vm10, %v1286_v16, %v929_v21 }
 0xe1d   :  { %v938_v1 = vsel %vm935_vm11, %v937_v2, %v933_v0  ;;  %v1290_v3 = vpop.eup %1289 }
 0xe1e   :  { %v941_v5 = vmul.f32 %v1290_v3, %v924_v4  ;;  %vm946_vm12 = vweird.f32 %v1290_v3  ;;  %v977_v38 = vsub.f32 1.0, %v938_v1  ;;  %v989_v40 = vmul.f32 %v938_v1, %v1650_v48 }
 0xe1f   :  { %vm947_vm14 = vmor %vm945_vm13, %vm946_vm12 }
 0xe20   :  { %v942_v23 = vsub.f32 1.0, %v941_v5 }
 0xe22   :  { %v943_v9 = vmul.f32 %v1290_v3, %v942_v23 }
 0xe24   :  { %v944_v24 = vadd.f32 %v1290_v3, %v943_v9 }
 0xe26   :  { %v948_v27 = vsel %vm947_vm14, %v1290_v3, %v944_v24 }
 0xe27   :  { %v953_v30 = vsel %vm950_vm15, %v952_v28, %v948_v27 }
 0xe28   :  { %v978_v43 = vsub.f32 1.0, %v953_v30  ;;  %v990_v45 = vmul.f32 %v953_v30, %v1655_v53 }
 0xe5a   :  { %v958_v8 = vpop.permute.xlu2 %957 }
 0xe5b   :  { %v963_v19 = vmul.f32 %v958_v8, %v938_v1 }
 0xe5d   :  { %967 = vrot.lane.b32.xlu1 %v963_v19, %s1309_s9 }
 0xe7a   :  { %v960_v29 = vpop.permute.xlu0 %959 }
 0xe7b   :  { %v964_v31 = vmul.f32 %v960_v29, %v953_v30 }
 0xe7d   :  { %969 = vrot.lane.b32.xlu2 %v964_v31, %s1309_s9 }
 0xecf   :  { %v968_v32 = vpop.permute.xlu1 %967 }
 0xed0   :  { %v973_v33 = vadd.f32 %v1190_v6, %v968_v32 }
 0xed2   :  { %1291 = vtanh.f32 %v973_v33 }
 0xed7   :  { %v970_v34 = vpop.permute.xlu2 %969 }
 0xed8   :  { %v1292_v35 = vpop.eup %1291  ;;  %v974_v36 = vadd.f32 %v1191_v18, %v970_v34 }
 0xed9   :  { %981 = vrot.lane.b32.xlu0 %v1292_v35, %s1311_s17 }
 0xeda   :  { %1293 = vtanh.f32 %v974_v36 }
 0xee0   :  { %v1294_v37 = vpop.eup %1293 }
 0xee1   :  { %983 = vrot.lane.b32.xlu1 %v1294_v37, %s1311_s17 }
 0xf4b   :  { %v982_v39 = vpop.permute.xlu0 %981 }
 0xf4c   :  { %v987_v41 = vmul.f32 %v982_v39, %v977_v38 }
 0xf4e   :  { %v1694_v42 = vadd.f32 %v989_v40, %v987_v41 }
 0xf50   :  { %995 = vrot.lane.b32.xlu2 %v1694_v42, %s1311_s17 }
 0xf53   :  { %v984_v44 = vpop.permute.xlu1 %983 }
 0xf54   :  { %v988_v46 = vmul.f32 %v984_v44, %v978_v43 }
 0xf56   :  { %v1699_v47 = vadd.f32 %v990_v45, %v988_v46 }
 0xf58   :  { %997 = vrot.lane.b32.xlu0 %v1699_v47, %s1311_s17 }
 0xfaa   :  { %v996_v49 = vpop.permute.xlu2 %995 }
 0xfab   :  { %1196 = vst.msk [vmem:[%s1745_s4 + $0x18] sm:$0x3] %vm23_vm0, %v996_v49  ;;  %1200 = vmatmul.msk.f32.vlgmr.msrb.gmra.mxu2 %vm46_vm1, %v996_v49 }
 0xfca   :  { %v998_v48 = vpop.permute.xlu0 %997 }
 0xfcb   :  { %1197 = vst.msk [vmem:[%s1745_s4 + $0x1a] sm:$0x3] %vm23_vm0, %v998_v48  ;;  %1201 = vmatmul.msk.f32.vlgmr.msrb.gmra.mxu3 %vm46_vm1, %v998_v48 }
0x102e   :  { %v1026_v50 = vpop.f32.mrf.mxu2 }
0x102f   :  { %v1027_v51 = vadd.f32 %v1672_v57, %v1026_v50 }
0x1031   :  { %1093 = vrot.lane.b32.xlu1 %v1027_v51, %s1309_s9  ;;  %v1051_v55 = vadd.f32 %v1198_v54, %v1027_v51 }
0x1033   :  { %v1202_v56 = vmul.f32 -1.442695, %v1051_v55 }
0x1035   :  { %1295 = vpow2.f32 %v1202_v56 }
0x103b   :  { %v1296_v61 = vpop.eup %1295 }
0x103c   :  { %v1059_v6 = vadd.f32 1.0, %v1296_v61 }
0x103e   :  { %v1072_v14 = vand.u32 2147483648, %v1059_v6  ;;  %vm1066_vm2 = vweird.f32 %v1059_v6  ;;  %v1070_v12 = vand.u32 2147483647, %v1059_v6 }
0x1040   :  { %v1073_v15 = vor.u32 1.1754944e-38, %v1072_v14  ;;  %vm1071_vm4 = vcmp.eq.f32.partialorder %v1070_v12, 8.507059e+37 }
0x104e   :  { %v1048_v52 = vpop.f32.mrf.mxu3 }
0x104f   :  { %v1049_v53 = vadd.f32 %v1679_v60, %v1048_v52 }
0x1051   :  { %1095 = vrot.lane.b32.xlu2 %v1049_v53, %s1309_s9  ;;  %v1052_v59 = vadd.f32 %v1199_v58, %v1049_v53 }
0x1053   :  { %v1203_v57 = vmul.f32 -1.442695, %v1052_v59 }
0x1055   :  { %1297 = vpow2.f32 %v1203_v57 }
0x1056   :  { %1299 = vrcp.f32 %v1059_v6 }
0x105b   :  { %v1298_v60 = vpop.eup %1297 }
0x105c   :  { %v1060_v62 = vadd.f32 1.0, %v1298_v60  ;;  %v1300_v7 = vpop.eup %1299 }
0x105d   :  { %v1062_v10 = vmul.f32 %v1300_v7, %v1059_v6  ;;  %vm1067_vm1 = vweird.f32 %v1300_v7 }
0x105e   :  { %1301 = vrcp.f32 %v1060_v62  ;;  %vm1068_vm3 = vmor %vm1066_vm2, %vm1067_vm1  ;;  %v1087_v8 = vand.u32 2147483648, %v1060_v62  ;;  %vm1081_vm6 = vweird.f32 %v1060_v62  ;;  %v1085_v1 = vand.u32 2147483647, %v1060_v62 }
0x105f   :  { %v1063_v13 = vsub.f32 1.0, %v1062_v10 }
0x1060   :  { %v1088_v3 = vor.u32 1.1754944e-38, %v1087_v8  ;;  %vm1086_vm8 = vcmp.eq.f32.partialorder %v1085_v1, 8.507059e+37 }
0x1061   :  { %v1064_v18 = vmul.f32 %v1300_v7, %v1063_v13 }
0x1063   :  { %v1065_v20 = vadd.f32 %v1300_v7, %v1064_v18 }
0x1064   :  { %v1302_v16 = vpop.eup %1301 }
0x1065   :  { %v1077_v17 = vmul.f32 %v1302_v16, %v1060_v62  ;;  %v1069_v21 = vsel %vm1068_vm3, %v1300_v7, %v1065_v20  ;;  %vm1082_vm5 = vweird.f32 %v1302_v16 }
0x1066   :  { %v1074_v11 = vsel %vm1071_vm4, %v1073_v15, %v1069_v21  ;;  %vm1083_vm7 = vmor %vm1081_vm6, %vm1082_vm5 }
0x1067   :  { %v1078_v63 = vsub.f32 1.0, %v1077_v17  ;;  %v1113_v30 = vsub.f32 1.0, %v1074_v11  ;;  %v1125_v32 = vmul.f32 %v1074_v11, %v1694_v42 }
0x1069   :  { %v1079_v22 = vmul.f32 %v1302_v16, %v1078_v63 }
0x106b   :  { %v1080_v4 = vadd.f32 %v1302_v16, %v1079_v22 }
0x106d   :  { %v1084_v19 = vsel %vm1083_vm7, %v1302_v16, %v1080_v4 }
0x106e   :  { %v1089_v23 = vsel %vm1086_vm8, %v1088_v3, %v1084_v19 }
0x106f   :  { %v1114_v35 = vsub.f32 1.0, %v1089_v23  ;;  %v1126_v37 = vmul.f32 %v1089_v23, %v1699_v47 }
0x10a3   :  { %v1094_v0 = vpop.permute.xlu1 %1093 }
0x10a4   :  { %v1099_v2 = vmul.f32 %v1094_v0, %v1074_v11 }
0x10a6   :  { %1103 = vrot.lane.b32.xlu0 %v1099_v2, %s1309_s9 }
0x10ab   :  { %v1096_v5 = vpop.permute.xlu2 %1095 }
0x10ac   :  { %v1100_v9 = vmul.f32 %v1096_v5, %v1089_v23 }
0x10ae   :  { %1105 = vrot.lane.b32.xlu1 %v1100_v9, %s1309_s9 }
0x1118   :  { %v1104_v24 = vpop.permute.xlu0 %1103 }
0x1119   :  { %v1109_v25 = vadd.f32 %v1198_v54, %v1104_v24 }
0x111b   :  { %1303 = vtanh.f32 %v1109_v25 }
0x1120   :  { %v1106_v26 = vpop.permute.xlu1 %1105 }
0x1121   :  { %v1304_v27 = vpop.eup %1303  ;;  %v1110_v28 = vadd.f32 %v1199_v58, %v1106_v26 }
0x1122   :  { %1117 = vrot.lane.b32.xlu2 %v1304_v27, %s1311_s17 }
0x1123   :  { %1305 = vtanh.f32 %v1110_v28 }
0x1129   :  { %v1306_v29 = vpop.eup %1305 }
0x112a   :  { %1119 = vrot.lane.b32.xlu0 %v1306_v29, %s1311_s17 }
0x117c   :  { %v1118_v31 = vpop.permute.xlu2 %1117 }
0x117d   :  { %v1123_v33 = vmul.f32 %v1118_v31, %v1113_v30 }
0x117f   :  { %v1127_v34 = vadd.f32 %v1125_v32, %v1123_v33 }
0x1181   :  { %1131 = vrot.lane.b32.xlu1 %v1127_v34, %s1311_s17 }
0x119c   :  { %v1120_v36 = vpop.permute.xlu0 %1119 }
0x119d   :  { %v1124_v38 = vmul.f32 %v1120_v36, %v1114_v35 }
0x119f   :  { %v1128_v39 = vadd.f32 %v1126_v37, %v1124_v38 }
0x11a1   :  { %1133 = vrot.lane.b32.xlu2 %v1128_v39, %s1311_s17 }
0x11f3   :  { %v1132_v40 = vpop.permute.xlu1 %1131 }
0x11f4   :  { %1204 = vst.msk [vmem:[%s1745_s4 + $0x1c] sm:$0x3] %vm23_vm0, %v1132_v40 }
0x11f5   :  { %1140 = vst.msk [vmem:[#allocation2] sm:$0x3] %vm23_vm0, %v1132_v40 }
0x11fb   :  { %v1134_v41 = vpop.permute.xlu2 %1133 }
0x11fc   :  { %1205 = vst.msk [vmem:[%s1745_s4 + $0x1e] sm:$0x3] %vm23_vm0, %v1134_v41 }
0x11fd   :  { %1141 = vst.msk [vmem:[#allocation2 + $0x2] sm:$0x3] %vm23_vm0, %v1134_v41 }

</bundles_post_ra>
